<compile_context>
chip_gen: v7x
topology: tpu7x:2x2x1
jax: 0.10.0
libtpu: 0.0.40
codegen_flags: <defaults>
</compile_context>

<pallas_src>
import functools

import jax
import jax.numpy as jnp
from jax import lax
from jax.experimental import pallas as pl
from jax.experimental.pallas import tpu as pltpu  # noqa: F401  (TPU backend)

IMAGE_WIDTH = IMAGE_HEIGHT = 28
IMAGE_SIZE = 784

SELU_ALPHA = 1.6732632423543772
SELU_SCALE = 1.0507009873554805


def _selu(x):
    # clamp exp argument so the unselected branch never produces inf
    return SELU_SCALE * jnp.where(
        x > 0, x, SELU_ALPHA * (jnp.exp(jnp.minimum(x, 0.0)) - 1.0)
    )


# ----------------------------- Pallas kernels ------------------------------

def _conv_pool_selu_kernel(p_ref, w_ref, b_ref, o_ref, *, mp):
    """p_ref: [4*mp, K] patches (pool-window position major),
    w_ref: [K, C], b_ref: [1, C]  ->  o_ref: [mp, C] = selu(maxpool(conv))."""
    acc = jnp.dot(p_ref[...], w_ref[...], preferred_element_type=jnp.float32)
    m = jnp.maximum(
        jnp.maximum(acc[0 * mp:1 * mp], acc[1 * mp:2 * mp]),
        jnp.maximum(acc[2 * mp:3 * mp], acc[3 * mp:4 * mp]),
    )
    o_ref[...] = _selu(m + b_ref[...])


def conv_pool_selu(patches4, w, b):
    """patches4: [4*Mp, K]; w: [K, C]; b: [1, C] -> [Mp, C]."""
    m4, k = patches4.shape
    mp = m4 // 4
    c = w.shape[1]
    kernel = functools.partial(_conv_pool_selu_kernel, mp=mp)
    return pl.pallas_call(
        kernel,
        out_shape=jax.ShapeDtypeStruct((mp, c), jnp.float32),
        grid=(1,),
        in_specs=[
            pl.BlockSpec((m4, k), lambda i: (0, 0)),
            pl.BlockSpec((k, c), lambda i: (0, 0)),
            pl.BlockSpec((1, c), lambda i: (0, 0)),
        ],
        out_specs=pl.BlockSpec((mp, c), lambda i: (0, 0)),
        cost_estimate=pl.CostEstimate(
            flops=2 * m4 * k * c,
            transcendentals=mp * c,
            bytes_accessed=4 * (m4 * k + k * c + c + mp * c),
        ),
    )(patches4, w, b)


def _dense_tail_kernel(x_ref, w1_ref, b1_ref, w2_ref, b2_ref,
                       w3_ref, b3_ref, w4_ref, b4_ref, out_ref, code_ref):
    """Fused enc_linear_1/2 + dec_linear_1/2; all intermediates stay in VMEM."""
    f32 = jnp.float32
    h = _selu(jnp.dot(x_ref[...], w1_ref[...], preferred_element_type=f32)
              + b1_ref[...])
    code = jnp.dot(h, w2_ref[...], preferred_element_type=f32) + b2_ref[...]
    code_ref[...] = code
    d = _selu(jnp.dot(code, w3_ref[...], preferred_element_type=f32)
              + b3_ref[...])
    logits = jnp.dot(d, w4_ref[...], preferred_element_type=f32) + b4_ref[...]
    # numerically stable sigmoid; exp + approx reciprocal both run on the EUP
    z = jnp.exp(-jnp.abs(logits))
    inv = pl.reciprocal(1.0 + z, approx=True)
    out_ref[...] = jnp.where(logits >= 0, inv, z * inv)


def _full_spec(a):
    zeros = (0,) * a.ndim
    return pl.BlockSpec(a.shape, lambda i: zeros)


def dense_tail(flat, p):
    """flat: [B, 320] -> (sigmoid output [B, 784], code [B, code_size])."""
    b_sz, k_in = flat.shape
    cs = p["w_l2"].shape[1]
    n_out = p["w_d2"].shape[1]
    args = (flat, p["w_l1"], p["b_l1"], p["w_l2"], p["b_l2"],
            p["w_d1"], p["b_d1"], p["w_d2"], p["b_d2"])
    flops = 2 * b_sz * (k_in * 50 + 50 * cs + cs * 160 + 160 * n_out)
    bytes_acc = 4 * (sum(a.size for a in args) + b_sz * (n_out + cs))
    return pl.pallas_call(
        _dense_tail_kernel,
        out_shape=(jax.ShapeDtypeStruct((b_sz, n_out), jnp.float32),
                   jax.ShapeDtypeStruct((b_sz, cs), jnp.float32)),
        grid=(1,),
        in_specs=[_full_spec(a) for a in args],
        out_specs=(pl.BlockSpec((b_sz, n_out), lambda i: (0, 0)),
                   pl.BlockSpec((b_sz, cs), lambda i: (0, 0))),
        cost_estimate=pl.CostEstimate(
            flops=flops,
            transcendentals=b_sz * (50 + 160 + n_out),
            bytes_accessed=bytes_acc,
        ),
    )(*args)


# ------------------------------ JAX glue ----------------------------------

def _pool_grouped_patches(x_nhwc, ksize):
    """Extract ksize x ksize 'VALID' conv patches of an NHWC tensor (single XLA
    op, K ordered (cin, kh, kw) = PyTorch weight.reshape(Cout,-1) order) and
    regroup rows so the four 2x2-maxpool window positions are leading.

    Returns ([4 * B*PH*PW, C*ksize*ksize], (B, PH, PW))."""
    b, h, w, c = x_nhwc.shape
    oh, ow = h - ksize + 1, w - ksize + 1
    ph, pw = oh // 2, ow // 2
    patches = lax.conv_general_dilated_patches(
        x_nhwc, (ksize, ksize), (1, 1), "VALID",
        dimension_numbers=("NHWC", "HWIO", "NHWC"),
        precision=lax.Precision.HIGHEST,           # exact patch extraction
    )                                              # [B, OH, OW, C*k*k]
    k = c * ksize * ksize
    p = patches.reshape(b, ph, 2, pw, 2, k)        # (b, ph, dy, pw, dx, K)
    p = p.transpose(2, 4, 0, 1, 3, 5)              # (dy, dx, b, ph, pw, K)
    return p.reshape(4 * b * ph * pw, k), (b, ph, pw)


# --------------------------- Model definition ------------------------------

def init_params_torch_layout(key, code_size):
    """Parameters in PyTorch's native layout (Conv2d: [Cout,Cin,KH,KW],
    Linear: [out,in]), uniform fan-in init like torch defaults."""
    ks = jax.random.split(key, 12)

    def u(k, shape, fan_in):
        bound = 1.0 / jnp.sqrt(jnp.float32(fan_in))
        return jax.random.uniform(k, shape, jnp.float32, -bound, bound)

    return {
        "w_c1": u(ks[0], (10, 3, 5, 5), 3 * 5 * 5),
        "b_c1": u(ks[1], (10,), 3 * 5 * 5),
        "w_c2": u(ks[2], (20, 10, 5, 5), 10 * 5 * 5),
        "b_c2": u(ks[3], (20,), 10 * 5 * 5),
        "w_l1": u(ks[4], (50, 4 * 4 * 20), 4 * 4 * 20),
        "b_l1": u(ks[5], (50,), 4 * 4 * 20),
        "w_l2": u(ks[6], (code_size, 50), 50),
        "b_l2": u(ks[7], (code_size,), 50),
        "w_d1": u(ks[8], (160, code_size), code_size),
        "b_d1": u(ks[9], (160,), code_size),
        "w_d2": u(ks[10], (IMAGE_SIZE, 160), 160),
        "b_d2": u(ks[11], (IMAGE_SIZE,), 160),
    }


def prepare_params(tp):
    """One-time (outside jit) conversion into kernel layout: matmul weights are
    [K, N]; conv K is (cin, kh, kw) to match conv_general_dilated_patches;
    enc_linear_1's K is permuted from torch's NCHW flatten (c, h, w) to our
    NHWC flatten (h, w, c) so no activation transposes are needed per forward."""
    def row(v):
        return v.reshape(1, -1).astype(jnp.float32)

    w_l1 = tp["w_l1"].reshape(50, 20, 4, 4).transpose(2, 3, 1, 0)  # [h,w,c,n]
    w_l1 = w_l1.reshape(4 * 4 * 20, 50).astype(jnp.float32)

    return {
        "w_c1": tp["w_c1"].reshape(10, -1).T.astype(jnp.float32),   # [75, 10]
        "b_c1": row(tp["b_c1"]),
        "w_c2": tp["w_c2"].reshape(20, -1).T.astype(jnp.float32),   # [250, 20]
        "b_c2": row(tp["b_c2"]),
        "w_l1": w_l1,                                               # [320, 50]
        "b_l1": row(tp["b_l1"]),
        "w_l2": tp["w_l2"].T.astype(jnp.float32),                   # [50, cs]
        "b_l2": row(tp["b_l2"]),
        "w_d1": tp["w_d1"].T.astype(jnp.float32),                   # [cs, 160]
        "b_d1": row(tp["b_d1"]),
        "w_d2": tp["w_d2"].T.astype(jnp.float32),                   # [160, 784]
        "b_d2": row(tp["b_d2"]),
    }


def autoencoder_forward(params, images):
    """images: [B, 3, 28, 28] (NCHW, f32) -> (out [B,1,28,28], code [B,code])."""
    bsz = images.shape[0]
    x = jnp.transpose(images, (0, 2, 3, 1)).astype(jnp.float32)   # NHWC, once

    # ---- encode ----
    # conv1: 3 -> 10, k=5, fused with maxpool2x2 + SELU
    p1, (_, ph1, pw1) = _pool_grouped_patches(x, 5)               # [4*B*144, 75]
    h1 = conv_pool_selu(p1, params["w_c1"], params["b_c1"])       # [B*144, 10]
    h1 = h1.reshape(bsz, ph1, pw1, 10)                            # NHWC [B,12,12,10]

    # conv2: 10 -> 20, k=5, fused with maxpool2x2 + SELU
    p2, (_, ph2, pw2) = _pool_grouped_patches(h1, 5)              # [4*B*16, 250]
    h2 = conv_pool_selu(p2, params["w_c2"], params["b_c2"])       # [B*16, 20]

    # flatten in (h, w, c) order; w_l1 was pre-permuted to match torch's view()
    flat = h2.reshape(bsz, ph2 * pw2 * 20)                        # [B, 320]

    # ---- fused dense tail: l1(selu) -> l2 -> d1(selu) -> d2(sigmoid) ----
    out, code = dense_tail(flat, params)
    return out.reshape(bsz, 1, IMAGE_WIDTH, IMAGE_HEIGHT), code


if __name__ == "__main__":
    code_size = 16
    batch = 2

    key = jax.random.PRNGKey(0)
    k_params, k_input = jax.random.split(key)
    params = prepare_params(init_params_torch_layout(k_params, code_size))
    # architecture hardcodes 3-channel 28x28 inputs (4*4*20 after 2x conv+pool)
    images = jax.random.normal(k_input, (batch, 3, IMAGE_HEIGHT, IMAGE_WIDTH),
                               dtype=jnp.float32)

    fwd = jax.jit(autoencoder_forward)
    out, code = fwd(params, images)
    jax.block_until_ready((out, code))

    assert out.shape == (batch, 1, IMAGE_WIDTH, IMAGE_HEIGHT)
    assert code.shape == (batch, code_size)
    assert bool(jnp.all(jnp.isfinite(out))) and bool(jnp.all(jnp.isfinite(code)))
    assert bool(jnp.all(out >= 0.0)) and bool(jnp.all(out <= 1.0))

    print("KERNEL_OK")
</pallas_src>

<mosaic_0001>
module attributes {stable_mosaic.version = 11 : i64} {
  func.func @_conv_pool_selu_kernel(%arg0: i32, %arg1: memref<1152x75xf32, #tpu.memory_space<vmem>>, %arg2: memref<75x10xf32, #tpu.memory_space<vmem>>, %arg3: memref<1x10xf32, #tpu.memory_space<vmem>>, %arg4: memref<288x10xf32, #tpu.memory_space<vmem>>) attributes {dimension_semantics = [#tpu.dimension_semantics<arbitrary>], iteration_bounds = array<i64: 1>, scalar_prefetch = 0 : i64, scratch_operands = 0 : i64, tpu.core_type = #tpu.core_type<tc>, window_params = [{pipeline_mode = #tpu.pipeline_mode<synchronous>, transform_indices = @transform_0, window_bounds = array<i64: 1152, 75>}, {pipeline_mode = #tpu.pipeline_mode<synchronous>, transform_indices = @transform_1, window_bounds = array<i64: 75, 10>}, {pipeline_mode = #tpu.pipeline_mode<synchronous>, transform_indices = @transform_2, window_bounds = array<i64: 1, 10>}, {pipeline_mode = #tpu.pipeline_mode<synchronous>, transform_indices = @transform_3, window_bounds = array<i64: 288, 10>}]} {
    %c0 = arith.constant 0 : index
    %c0_0 = arith.constant 0 : index
    %0 = vector.load %arg1[%c0, %c0_0] : memref<1152x75xf32, #tpu.memory_space<vmem>>, vector<1152x75xf32>
    %c0_1 = arith.constant 0 : index
    %c0_2 = arith.constant 0 : index
    %1 = vector.load %arg2[%c0_1, %c0_2] : memref<75x10xf32, #tpu.memory_space<vmem>>, vector<75x10xf32>
    %cst = arith.constant dense<0.000000e+00> : vector<1152x10xf32>
    %2 = tpu.matmul %0, %1, %cst {dimension_numbers = #tpu.dot_dimension_numbers<[1], [0], [0], [1], [0, 0, 1, 1], [], []>} : vector<1152x75xf32>, vector<75x10xf32>, vector<1152x10xf32> -> vector<1152x10xf32>
    %3 = vector.extract_strided_slice %2 {offsets = [0, 0], sizes = [288, 10], strides = [1, 1]} : vector<1152x10xf32> to vector<288x10xf32>
    %4 = vector.extract_strided_slice %2 {offsets = [288, 0], sizes = [288, 10], strides = [1, 1]} : vector<1152x10xf32> to vector<288x10xf32>
    %5 = arith.maximumf %3, %4 : vector<288x10xf32>
    %6 = vector.extract_strided_slice %2 {offsets = [576, 0], sizes = [288, 10], strides = [1, 1]} : vector<1152x10xf32> to vector<288x10xf32>
    %7 = vector.extract_strided_slice %2 {offsets = [864, 0], sizes = [288, 10], strides = [1, 1]} : vector<1152x10xf32> to vector<288x10xf32>
    %8 = arith.maximumf %6, %7 : vector<288x10xf32>
    %9 = arith.maximumf %5, %8 : vector<288x10xf32>
    %c0_3 = arith.constant 0 : index
    %c0_4 = arith.constant 0 : index
    %10 = vector.load %arg3[%c0_3, %c0_4] : memref<1x10xf32, #tpu.memory_space<vmem>>, vector<1x10xf32>
    %11 = vector.broadcast %10 : vector<1x10xf32> to vector<288x10xf32>
    %12 = arith.addf %9, %11 : vector<288x10xf32>
    %cst_5 = arith.constant 0.000000e+00 : f32
    %13 = vector.broadcast %cst_5 : f32 to vector<288x10xf32>
    %14 = arith.cmpf ogt, %12, %13 : vector<288x10xf32>
    %cst_6 = arith.constant 0.000000e+00 : f32
    %15 = vector.broadcast %cst_6 : f32 to vector<288x10xf32>
    %16 = arith.minimumf %12, %15 : vector<288x10xf32>
    %17 = math.exp %16 : vector<288x10xf32>
    %cst_7 = arith.constant 1.000000e+00 : f32
    %18 = vector.broadcast %cst_7 : f32 to vector<288x10xf32>
    %19 = arith.subf %17, %18 : vector<288x10xf32>
    %cst_8 = arith.constant 1.67326319 : f32
    %20 = vector.broadcast %cst_8 : f32 to vector<288x10xf32>
    %21 = arith.mulf %20, %19 : vector<288x10xf32>
    %22 = arith.select %14, %12, %21 : vector<288x10xi1>, vector<288x10xf32>
    %cst_9 = arith.constant 1.05070102 : f32
    %23 = vector.broadcast %cst_9 : f32 to vector<288x10xf32>
    %24 = arith.mulf %23, %22 : vector<288x10xf32>
    %c0_10 = arith.constant 0 : index
    %c0_11 = arith.constant 0 : index
    %25 = vector.load %arg4[%c0_10, %c0_11] : memref<288x10xf32, #tpu.memory_space<vmem>>, vector<288x10xf32>
    tpu.vector_store %arg4[%c0_10, %c0_11], %24 {strides = array<i32>} : memref<288x10xf32, #tpu.memory_space<vmem>>, vector<288x10xf32>,
    return
  }
  func.func @transform_0(%arg0: i32) -> (i32, i32) {
    %c0_i32 = arith.constant 0 : i32
    %c0_i32_0 = arith.constant 0 : i32
    %c0_i32_1 = arith.constant 0 : i32
    return %c0_i32, %c0_i32_0 : i32, i32
  }
  func.func @transform_1(%arg0: i32) -> (i32, i32) {
    %c0_i32 = arith.constant 0 : i32
    %c0_i32_0 = arith.constant 0 : i32
    %c0_i32_1 = arith.constant 0 : i32
    return %c0_i32, %c0_i32_0 : i32, i32
  }
  func.func @transform_2(%arg0: i32) -> (i32, i32) {
    %c0_i32 = arith.constant 0 : i32
    %c0_i32_0 = arith.constant 0 : i32
    %c0_i32_1 = arith.constant 0 : i32
    return %c0_i32, %c0_i32_0 : i32, i32
  }
  func.func @transform_3(%arg0: i32) -> (i32, i32) {
    %c0_i32 = arith.constant 0 : i32
    %c0_i32_0 = arith.constant 0 : i32
    %c0_i32_1 = arith.constant 0 : i32
    return %c0_i32, %c0_i32_0 : i32, i32
  }
}

module attributes {stable_mosaic.version = 11 : i64} {
  func.func @_conv_pool_selu_kernel(%arg0: i32, %arg1: memref<128x250xf32, #tpu.memory_space<vmem>>, %arg2: memref<250x20xf32, #tpu.memory_space<vmem>>, %arg3: memref<1x20xf32, #tpu.memory_space<vmem>>, %arg4: memref<32x20xf32, #tpu.memory_space<vmem>>) attributes {dimension_semantics = [#tpu.dimension_semantics<arbitrary>], iteration_bounds = array<i64: 1>, scalar_prefetch = 0 : i64, scratch_operands = 0 : i64, tpu.core_type = #tpu.core_type<tc>, window_params = [{pipeline_mode = #tpu.pipeline_mode<synchronous>, transform_indices = @transform_0, window_bounds = array<i64: 128, 250>}, {pipeline_mode = #tpu.pipeline_mode<synchronous>, transform_indices = @transform_1, window_bounds = array<i64: 250, 20>}, {pipeline_mode = #tpu.pipeline_mode<synchronous>, transform_indices = @transform_2, window_bounds = array<i64: 1, 20>}, {pipeline_mode = #tpu.pipeline_mode<synchronous>, transform_indices = @transform_3, window_bounds = array<i64: 32, 20>}]} {
    %c0 = arith.constant 0 : index
    %c0_0 = arith.constant 0 : index
    %0 = vector.load %arg1[%c0, %c0_0] : memref<128x250xf32, #tpu.memory_space<vmem>>, vector<128x250xf32>
    %c0_1 = arith.constant 0 : index
    %c0_2 = arith.constant 0 : index
    %1 = vector.load %arg2[%c0_1, %c0_2] : memref<250x20xf32, #tpu.memory_space<vmem>>, vector<250x20xf32>
    %cst = arith.constant dense<0.000000e+00> : vector<128x20xf32>
    %2 = tpu.matmul %0, %1, %cst {dimension_numbers = #tpu.dot_dimension_numbers<[1], [0], [0], [1], [0, 0, 1, 1], [], []>} : vector<128x250xf32>, vector<250x20xf32>, vector<128x20xf32> -> vector<128x20xf32>
    %3 = vector.extract_strided_slice %2 {offsets = [0, 0], sizes = [32, 20], strides = [1, 1]} : vector<128x20xf32> to vector<32x20xf32>
    %4 = vector.extract_strided_slice %2 {offsets = [32, 0], sizes = [32, 20], strides = [1, 1]} : vector<128x20xf32> to vector<32x20xf32>
    %5 = arith.maximumf %3, %4 : vector<32x20xf32>
    %6 = vector.extract_strided_slice %2 {offsets = [64, 0], sizes = [32, 20], strides = [1, 1]} : vector<128x20xf32> to vector<32x20xf32>
    %7 = vector.extract_strided_slice %2 {offsets = [96, 0], sizes = [32, 20], strides = [1, 1]} : vector<128x20xf32> to vector<32x20xf32>
    %8 = arith.maximumf %6, %7 : vector<32x20xf32>
    %9 = arith.maximumf %5, %8 : vector<32x20xf32>
    %c0_3 = arith.constant 0 : index
    %c0_4 = arith.constant 0 : index
    %10 = vector.load %arg3[%c0_3, %c0_4] : memref<1x20xf32, #tpu.memory_space<vmem>>, vector<1x20xf32>
    %11 = vector.broadcast %10 : vector<1x20xf32> to vector<32x20xf32>
    %12 = arith.addf %9, %11 : vector<32x20xf32>
    %cst_5 = arith.constant 0.000000e+00 : f32
    %13 = vector.broadcast %cst_5 : f32 to vector<32x20xf32>
    %14 = arith.cmpf ogt, %12, %13 : vector<32x20xf32>
    %cst_6 = arith.constant 0.000000e+00 : f32
    %15 = vector.broadcast %cst_6 : f32 to vector<32x20xf32>
    %16 = arith.minimumf %12, %15 : vector<32x20xf32>
    %17 = math.exp %16 : vector<32x20xf32>
    %cst_7 = arith.constant 1.000000e+00 : f32
    %18 = vector.broadcast %cst_7 : f32 to vector<32x20xf32>
    %19 = arith.subf %17, %18 : vector<32x20xf32>
    %cst_8 = arith.constant 1.67326319 : f32
    %20 = vector.broadcast %cst_8 : f32 to vector<32x20xf32>
    %21 = arith.mulf %20, %19 : vector<32x20xf32>
    %22 = arith.select %14, %12, %21 : vector<32x20xi1>, vector<32x20xf32>
    %cst_9 = arith.constant 1.05070102 : f32
    %23 = vector.broadcast %cst_9 : f32 to vector<32x20xf32>
    %24 = arith.mulf %23, %22 : vector<32x20xf32>
    %c0_10 = arith.constant 0 : index
    %c0_11 = arith.constant 0 : index
    %25 = vector.load %arg4[%c0_10, %c0_11] : memref<32x20xf32, #tpu.memory_space<vmem>>, vector<32x20xf32>
    tpu.vector_store %arg4[%c0_10, %c0_11], %24 {strides = array<i32>} : memref<32x20xf32, #tpu.memory_space<vmem>>, vector<32x20xf32>,
    return
  }
  func.func @transform_0(%arg0: i32) -> (i32, i32) {
    %c0_i32 = arith.constant 0 : i32
    %c0_i32_0 = arith.constant 0 : i32
    %c0_i32_1 = arith.constant 0 : i32
    return %c0_i32, %c0_i32_0 : i32, i32
  }
  func.func @transform_1(%arg0: i32) -> (i32, i32) {
    %c0_i32 = arith.constant 0 : i32
    %c0_i32_0 = arith.constant 0 : i32
    %c0_i32_1 = arith.constant 0 : i32
    return %c0_i32, %c0_i32_0 : i32, i32
  }
  func.func @transform_2(%arg0: i32) -> (i32, i32) {
    %c0_i32 = arith.constant 0 : i32
    %c0_i32_0 = arith.constant 0 : i32
    %c0_i32_1 = arith.constant 0 : i32
    return %c0_i32, %c0_i32_0 : i32, i32
  }
  func.func @transform_3(%arg0: i32) -> (i32, i32) {
    %c0_i32 = arith.constant 0 : i32
    %c0_i32_0 = arith.constant 0 : i32
    %c0_i32_1 = arith.constant 0 : i32
    return %c0_i32, %c0_i32_0 : i32, i32
  }
}

module attributes {stable_mosaic.version = 11 : i64} {
  func.func @_dense_tail_kernel(%arg0: i32, %arg1: memref<2x320xf32, #tpu.memory_space<vmem>>, %arg2: memref<320x50xf32, #tpu.memory_space<vmem>>, %arg3: memref<1x50xf32, #tpu.memory_space<vmem>>, %arg4: memref<50x16xf32, #tpu.memory_space<vmem>>, %arg5: memref<1x16xf32, #tpu.memory_space<vmem>>, %arg6: memref<16x160xf32, #tpu.memory_space<vmem>>, %arg7: memref<1x160xf32, #tpu.memory_space<vmem>>, %arg8: memref<160x784xf32, #tpu.memory_space<vmem>>, %arg9: memref<1x784xf32, #tpu.memory_space<vmem>>, %arg10: memref<2x784xf32, #tpu.memory_space<vmem>>, %arg11: memref<2x16xf32, #tpu.memory_space<vmem>>) attributes {dimension_semantics = [#tpu.dimension_semantics<arbitrary>], iteration_bounds = array<i64: 1>, scalar_prefetch = 0 : i64, scratch_operands = 0 : i64, tpu.core_type = #tpu.core_type<tc>, window_params = [{pipeline_mode = #tpu.pipeline_mode<synchronous>, transform_indices = @transform_0, window_bounds = array<i64: 2, 320>}, {pipeline_mode = #tpu.pipeline_mode<synchronous>, transform_indices = @transform_1, window_bounds = array<i64: 320, 50>}, {pipeline_mode = #tpu.pipeline_mode<synchronous>, transform_indices = @transform_2, window_bounds = array<i64: 1, 50>}, {pipeline_mode = #tpu.pipeline_mode<synchronous>, transform_indices = @transform_3, window_bounds = array<i64: 50, 16>}, {pipeline_mode = #tpu.pipeline_mode<synchronous>, transform_indices = @transform_4, window_bounds = array<i64: 1, 16>}, {pipeline_mode = #tpu.pipeline_mode<synchronous>, transform_indices = @transform_5, window_bounds = array<i64: 16, 160>}, {pipeline_mode = #tpu.pipeline_mode<synchronous>, transform_indices = @transform_6, window_bounds = array<i64: 1, 160>}, {pipeline_mode = #tpu.pipeline_mode<synchronous>, transform_indices = @transform_7, window_bounds = array<i64: 160, 784>}, {pipeline_mode = #tpu.pipeline_mode<synchronous>, transform_indices = @transform_8, window_bounds = array<i64: 1, 784>}, {pipeline_mode = #tpu.pipeline_mode<synchronous>, transform_indices = @transform_9, window_bounds = array<i64: 2, 784>}, {pipeline_mode = #tpu.pipeline_mode<synchronous>, transform_indices = @transform_10, window_bounds = array<i64: 2, 16>}]} {
    %c0 = arith.constant 0 : index
    %c0_0 = arith.constant 0 : index
    %0 = vector.load %arg1[%c0, %c0_0] : memref<2x320xf32, #tpu.memory_space<vmem>>, vector<2x320xf32>
    %c0_1 = arith.constant 0 : index
    %c0_2 = arith.constant 0 : index
    %1 = vector.load %arg2[%c0_1, %c0_2] : memref<320x50xf32, #tpu.memory_space<vmem>>, vector<320x50xf32>
    %cst = arith.constant dense<0.000000e+00> : vector<2x50xf32>
    %2 = tpu.matmul %0, %1, %cst {dimension_numbers = #tpu.dot_dimension_numbers<[1], [0], [0], [1], [0, 0, 1, 1], [], []>} : vector<2x320xf32>, vector<320x50xf32>, vector<2x50xf32> -> vector<2x50xf32>
    %c0_3 = arith.constant 0 : index
    %c0_4 = arith.constant 0 : index
    %3 = vector.load %arg3[%c0_3, %c0_4] : memref<1x50xf32, #tpu.memory_space<vmem>>, vector<1x50xf32>
    %4 = vector.broadcast %3 : vector<1x50xf32> to vector<2x50xf32>
    %5 = arith.addf %2, %4 : vector<2x50xf32>
    %cst_5 = arith.constant 0.000000e+00 : f32
    %6 = vector.broadcast %cst_5 : f32 to vector<2x50xf32>
    %7 = arith.cmpf ogt, %5, %6 : vector<2x50xf32>
    %cst_6 = arith.constant 0.000000e+00 : f32
    %8 = vector.broadcast %cst_6 : f32 to vector<2x50xf32>
    %9 = arith.minimumf %5, %8 : vector<2x50xf32>
    %10 = math.exp %9 : vector<2x50xf32>
    %cst_7 = arith.constant 1.000000e+00 : f32
    %11 = vector.broadcast %cst_7 : f32 to vector<2x50xf32>
    %12 = arith.subf %10, %11 : vector<2x50xf32>
    %cst_8 = arith.constant 1.67326319 : f32
    %13 = vector.broadcast %cst_8 : f32 to vector<2x50xf32>
    %14 = arith.mulf %13, %12 : vector<2x50xf32>
    %15 = arith.select %7, %5, %14 : vector<2x50xi1>, vector<2x50xf32>
    %cst_9 = arith.constant 1.05070102 : f32
    %16 = vector.broadcast %cst_9 : f32 to vector<2x50xf32>
    %17 = arith.mulf %16, %15 : vector<2x50xf32>
    %c0_10 = arith.constant 0 : index
    %c0_11 = arith.constant 0 : index
    %18 = vector.load %arg4[%c0_10, %c0_11] : memref<50x16xf32, #tpu.memory_space<vmem>>, vector<50x16xf32>
    %cst_12 = arith.constant dense<0.000000e+00> : vector<2x16xf32>
    %19 = tpu.matmul %17, %18, %cst_12 {dimension_numbers = #tpu.dot_dimension_numbers<[1], [0], [0], [1], [0, 0, 1, 1], [], []>} : vector<2x50xf32>, vector<50x16xf32>, vector<2x16xf32> -> vector<2x16xf32>
    %c0_13 = arith.constant 0 : index
    %c0_14 = arith.constant 0 : index
    %20 = vector.load %arg5[%c0_13, %c0_14] : memref<1x16xf32, #tpu.memory_space<vmem>>, vector<1x16xf32>
    %21 = vector.broadcast %20 : vector<1x16xf32> to vector<2x16xf32>
    %22 = arith.addf %19, %21 : vector<2x16xf32>
    %c0_15 = arith.constant 0 : index
    %c0_16 = arith.constant 0 : index
    %23 = vector.load %arg11[%c0_15, %c0_16] : memref<2x16xf32, #tpu.memory_space<vmem>>, vector<2x16xf32>
    tpu.vector_store %arg11[%c0_15, %c0_16], %22 {strides = array<i32>} : memref<2x16xf32, #tpu.memory_space<vmem>>, vector<2x16xf32>,
    %c0_17 = arith.constant 0 : index
    %c0_18 = arith.constant 0 : index
    %24 = vector.load %arg6[%c0_17, %c0_18] : memref<16x160xf32, #tpu.memory_space<vmem>>, vector<16x160xf32>
    %cst_19 = arith.constant dense<0.000000e+00> : vector<2x160xf32>
    %25 = tpu.matmul %22, %24, %cst_19 {dimension_numbers = #tpu.dot_dimension_numbers<[1], [0], [0], [1], [0, 0, 1, 1], [], []>} : vector<2x16xf32>, vector<16x160xf32>, vector<2x160xf32> -> vector<2x160xf32>
    %c0_20 = arith.constant 0 : index
    %c0_21 = arith.constant 0 : index
    %26 = vector.load %arg7[%c0_20, %c0_21] : memref<1x160xf32, #tpu.memory_space<vmem>>, vector<1x160xf32>
    %27 = vector.broadcast %26 : vector<1x160xf32> to vector<2x160xf32>
    %28 = arith.addf %25, %27 : vector<2x160xf32>
    %cst_22 = arith.constant 0.000000e+00 : f32
    %29 = vector.broadcast %cst_22 : f32 to vector<2x160xf32>
    %30 = arith.cmpf ogt, %28, %29 : vector<2x160xf32>
    %cst_23 = arith.constant 0.000000e+00 : f32
    %31 = vector.broadcast %cst_23 : f32 to vector<2x160xf32>
    %32 = arith.minimumf %28, %31 : vector<2x160xf32>
    %33 = math.exp %32 : vector<2x160xf32>
    %cst_24 = arith.constant 1.000000e+00 : f32
    %34 = vector.broadcast %cst_24 : f32 to vector<2x160xf32>
    %35 = arith.subf %33, %34 : vector<2x160xf32>
    %cst_25 = arith.constant 1.67326319 : f32
    %36 = vector.broadcast %cst_25 : f32 to vector<2x160xf32>
    %37 = arith.mulf %36, %35 : vector<2x160xf32>
    %38 = arith.select %30, %28, %37 : vector<2x160xi1>, vector<2x160xf32>
    %cst_26 = arith.constant 1.05070102 : f32
    %39 = vector.broadcast %cst_26 : f32 to vector<2x160xf32>
    %40 = arith.mulf %39, %38 : vector<2x160xf32>
    %c0_27 = arith.constant 0 : index
    %c0_28 = arith.constant 0 : index
    %41 = vector.load %arg8[%c0_27, %c0_28] : memref<160x784xf32, #tpu.memory_space<vmem>>, vector<160x784xf32>
    %cst_29 = arith.constant dense<0.000000e+00> : vector<2x784xf32>
    %42 = tpu.matmul %40, %41, %cst_29 {dimension_numbers = #tpu.dot_dimension_numbers<[1], [0], [0], [1], [0, 0, 1, 1], [], []>} : vector<2x160xf32>, vector<160x784xf32>, vector<2x784xf32> -> vector<2x784xf32>
    %c0_30 = arith.constant 0 : index
    %c0_31 = arith.constant 0 : index
    %43 = vector.load %arg9[%c0_30, %c0_31] : memref<1x784xf32, #tpu.memory_space<vmem>>, vector<1x784xf32>
    %44 = vector.broadcast %43 : vector<1x784xf32> to vector<2x784xf32>
    %45 = arith.addf %42, %44 : vector<2x784xf32>
    %46 = math.absf %45 : vector<2x784xf32>
    %cst_32 = arith.constant 0.000000e+00 : f32
    %47 = vector.broadcast %cst_32 : f32 to vector<2x784xf32>
    %48 = arith.subf %47, %46 : vector<2x784xf32>
    %49 = math.exp %48 : vector<2x784xf32>
    %cst_33 = arith.constant 1.000000e+00 : f32
    %50 = vector.broadcast %cst_33 : f32 to vector<2x784xf32>
    %51 = arith.addf %50, %49 : vector<2x784xf32>
    %52 = tpu.reciprocal %51 {approx = true} : vector<2x784xf32> -> vector<2x784xf32>
    %cst_34 = arith.constant 0.000000e+00 : f32
    %53 = vector.broadcast %cst_34 : f32 to vector<2x784xf32>
    %54 = arith.cmpf oge, %45, %53 : vector<2x784xf32>
    %55 = arith.mulf %49, %52 : vector<2x784xf32>
    %56 = arith.select %54, %52, %55 : vector<2x784xi1>, vector<2x784xf32>
    %c0_35 = arith.constant 0 : index
    %c0_36 = arith.constant 0 : index
    %57 = vector.load %arg10[%c0_35, %c0_36] : memref<2x784xf32, #tpu.memory_space<vmem>>, vector<2x784xf32>
    tpu.vector_store %arg10[%c0_35, %c0_36], %56 {strides = array<i32>} : memref<2x784xf32, #tpu.memory_space<vmem>>, vector<2x784xf32>,
    return
  }
  func.func @transform_0(%arg0: i32) -> (i32, i32) {
    %c0_i32 = arith.constant 0 : i32
    %c0_i32_0 = arith.constant 0 : i32
    %c0_i32_1 = arith.constant 0 : i32
    return %c0_i32, %c0_i32_0 : i32, i32
  }
  func.func @transform_1(%arg0: i32) -> (i32, i32) {
    %c0_i32 = arith.constant 0 : i32
    %c0_i32_0 = arith.constant 0 : i32
    %c0_i32_1 = arith.constant 0 : i32
    return %c0_i32, %c0_i32_0 : i32, i32
  }
  func.func @transform_2(%arg0: i32) -> (i32, i32) {
    %c0_i32 = arith.constant 0 : i32
    %c0_i32_0 = arith.constant 0 : i32
    %c0_i32_1 = arith.constant 0 : i32
    return %c0_i32, %c0_i32_0 : i32, i32
  }
  func.func @transform_3(%arg0: i32) -> (i32, i32) {
    %c0_i32 = arith.constant 0 : i32
    %c0_i32_0 = arith.constant 0 : i32
    %c0_i32_1 = arith.constant 0 : i32
    return %c0_i32, %c0_i32_0 : i32, i32
  }
  func.func @transform_4(%arg0: i32) -> (i32, i32) {
    %c0_i32 = arith.constant 0 : i32
    %c0_i32_0 = arith.constant 0 : i32
    %c0_i32_1 = arith.constant 0 : i32
    return %c0_i32, %c0_i32_0 : i32, i32
  }
  func.func @transform_5(%arg0: i32) -> (i32, i32) {
    %c0_i32 = arith.constant 0 : i32
    %c0_i32_0 = arith.constant 0 : i32
    %c0_i32_1 = arith.constant 0 : i32
    return %c0_i32, %c0_i32_0 : i32, i32
  }
  func.func @transform_6(%arg0: i32) -> (i32, i32) {
    %c0_i32 = arith.constant 0 : i32
    %c0_i32_0 = arith.constant 0 : i32
    %c0_i32_1 = arith.constant 0 : i32
    return %c0_i32, %c0_i32_0 : i32, i32
  }
  func.func @transform_7(%arg0: i32) -> (i32, i32) {
    %c0_i32 = arith.constant 0 : i32
    %c0_i32_0 = arith.constant 0 : i32
    %c0_i32_1 = arith.constant 0 : i32
    return %c0_i32, %c0_i32_0 : i32, i32
  }
  func.func @transform_8(%arg0: i32) -> (i32, i32) {
    %c0_i32 = arith.constant 0 : i32
    %c0_i32_0 = arith.constant 0 : i32
    %c0_i32_1 = arith.constant 0 : i32
    return %c0_i32, %c0_i32_0 : i32, i32
  }
  func.func @transform_9(%arg0: i32) -> (i32, i32) {
    %c0_i32 = arith.constant 0 : i32
    %c0_i32_0 = arith.constant 0 : i32
    %c0_i32_1 = arith.constant 0 : i32
    return %c0_i32, %c0_i32_0 : i32, i32
  }
  func.func @transform_10(%arg0: i32) -> (i32, i32) {
    %c0_i32 = arith.constant 0 : i32
    %c0_i32_0 = arith.constant 0 : i32
    %c0_i32_1 = arith.constant 0 : i32
    return %c0_i32, %c0_i32_0 : i32, i32
  }
}

</mosaic_0001>

<bundles_post_ra>
// kernel: autoencoder_forward.3
= control target key start
LH: loop header
LB: loop body
LE: loop exit
PB: predicated region body
PF: predicated region fallthrough
CT: control target
= control target key end

     0   :  { %vm168_vm0 = vcmask 613376   ;;  %vm601_vm1 = vcmask 1042432   ;;  %vm2547_vm2 = vmmov 1   ;;  %vm1829_vm4 = vcmask 80896   ;;  %s3920_s1 = inlined_call_operand.vmem [shape: f32[75,10], index: 1, kind: input, shape index: {}]   ;;  %s3921_s0 = inlined_call_operand.vmem [shape: f32[1152,75], index: 0, kind: input, shape index: {}]   ;;  %s3922_s2 = inlined_call_operand.vmem [shape: f32[1,10], index: 2, kind: input, shape index: {}]   ;;  %s3923_s3 = inlined_call_operand.vmem [shape: f32[288,10], index: 3, kind: output, shape index: {}]  }
   0x1   :  { %v158_v0 = vld [vmem:[%s3920_s1] sm:$0xff]  ;;  %v159_v1 = vld [vmem:[%s3920_s1 + $0x8] sm:$0xff]  ;;  %v160_v2 = vld [vmem:[%s3920_s1 + $0x10] sm:$0xff] }
   0x2   :  { %v2442_v3 = vpack.c.bf16 %v159_v1, %v158_v0  ;;  %v161_v4 = vld [vmem:[%s3920_s1 + $0x18] sm:$0xff]  ;;  %v162_v6 = vld [vmem:[%s3920_s1 + $0x20] sm:$0xff]  ;;  %v163_v7 = vld [vmem:[%s3920_s1 + $0x28] sm:$0xff] }
   0x3   :  { %v2446_v5 = vpack.c.bf16 %v161_v4, %v160_v2  ;;  %v14_v8 = vld [vmem:[%s3921_s0] sm:$0xff]  ;;  %v2450_v10 = vpack.c.bf16 %v163_v7, %v162_v6  ;;  %v164_v11 = vld [vmem:[%s3920_s1 + $0x30] sm:$0xff]  ;;  %v165_v12 = vld [vmem:[%s3920_s1 + $0x38] sm:$0xff] }
   0x4   :  { %2443 = vmatprep.subr.bf16.mxu0 %v2442_v3  ;;  %2464 = vmatprep.subr.bf16.mxu1 %v2442_v3  ;;  %v86_v9 = vld [vmem:[%s3921_s0 + $0x240] sm:$0xff]  ;;  %v2454_v13 = vpack.c.bf16 %v165_v12, %v164_v11  ;;  %v167_v15 = vld [vmem:[%s3920_s1 + $0x48] sm:$0x7]  ;;  %vm2459_vm3 = vmpackc.low %vm601_vm1, %vm2547_vm2 }
   0x5   :  { %2445 = vmatpush3.bf16.msra.mxu0 %v2442_v3  ;;  %2469 = vmatpush3.bf16.msra.mxu1 %v2442_v3  ;;  %v166_v14 = vld [vmem:[%s3920_s1 + $0x40] sm:$0xff]  ;;  %v15_v17 = vld [vmem:[%s3921_s0 + $0x8] sm:$0xff]  ;;  %v16_v19 = vld [vmem:[%s3921_s0 + $0x10] sm:$0xff] }
   0x6   :  { %2447 = vmatprep.subr.bf16.mxu0 %v2446_v5  ;;  %2465 = vmatprep.subr.bf16.mxu1 %v2446_v5  ;;  %v2458_v16 = vpack.c.bf16 %v167_v15, %v166_v14  ;;  %v87_v18 = vld [vmem:[%s3921_s0 + $0x248] sm:$0xff]  ;;  %v88_v20 = vld [vmem:[%s3921_s0 + $0x250] sm:$0xff]  ;;  %v17_v21 = vld [vmem:[%s3921_s0 + $0x18] sm:$0xff] }
   0x7   :  { %2226 = vmatprep.mubr.msk.f32.mxu0 %vm168_vm0, %v14_v8  ;;  %2334 = vmatprep.mubr.msk.f32.mxu1 %vm168_vm0, %v86_v9  ;;  %v89_v22 = vld [vmem:[%s3921_s0 + $0x258] sm:$0xff]  ;;  %v18_v23 = vld [vmem:[%s3921_s0 + $0x20] sm:$0xff]  ;;  %v19_v25 = vld [vmem:[%s3921_s0 + $0x28] sm:$0xff] }
   0x8   :  { %v90_v24 = vld [vmem:[%s3921_s0 + $0x260] sm:$0xff]  ;;  %v91_v26 = vld [vmem:[%s3921_s0 + $0x268] sm:$0xff]  ;;  %v20_v27 = vld [vmem:[%s3921_s0 + $0x30] sm:$0xff] }
   0x9   :  { %2449 = vmatpush3.bf16.msra.mxu0 %v2446_v5  ;;  %2470 = vmatpush3.bf16.msra.mxu1 %v2446_v5  ;;  %v92_v28 = vld [vmem:[%s3921_s0 + $0x270] sm:$0xff]  ;;  %v21_v29 = vld [vmem:[%s3921_s0 + $0x38] sm:$0xff]  ;;  %v22_v31 = vld [vmem:[%s3921_s0 + $0x40] sm:$0xff] }
   0xa   :  { %2451 = vmatprep.subr.bf16.mxu0 %v2450_v10  ;;  %2466 = vmatprep.subr.bf16.mxu1 %v2450_v10  ;;  %v93_v30 = vld [vmem:[%s3921_s0 + $0x278] sm:$0xff]  ;;  %v94_v32 = vld [vmem:[%s3921_s0 + $0x280] sm:$0xff]  ;;  %v23_v33 = vld [vmem:[%s3921_s0 + $0x48] sm:$0xff] }
   0xb   :  { %v95_v34 = vld [vmem:[%s3921_s0 + $0x288] sm:$0xff]  ;;  %v24_v35 = vld [vmem:[%s3921_s0 + $0x50] sm:$0xff]  ;;  %v25_v37 = vld [vmem:[%s3921_s0 + $0x58] sm:$0xff] }
   0xc   :  { %v96_v36 = vld [vmem:[%s3921_s0 + $0x290] sm:$0xff]  ;;  %v97_v38 = vld [vmem:[%s3921_s0 + $0x298] sm:$0xff]  ;;  %v26_v39 = vld [vmem:[%s3921_s0 + $0x60] sm:$0xff] }
   0xd   :  { %2453 = vmatpush3.bf16.msra.mxu0 %v2450_v10  ;;  %2471 = vmatpush3.bf16.msra.mxu1 %v2450_v10  ;;  %v98_v40 = vld [vmem:[%s3921_s0 + $0x2a0] sm:$0xff]  ;;  %v27_v41 = vld [vmem:[%s3921_s0 + $0x68] sm:$0xff]  ;;  %v28_v43 = vld [vmem:[%s3921_s0 + $0x70] sm:$0xff] }
   0xe   :  { %2455 = vmatprep.subr.bf16.mxu0 %v2454_v13  ;;  %2467 = vmatprep.subr.bf16.mxu1 %v2454_v13  ;;  %v99_v42 = vld [vmem:[%s3921_s0 + $0x2a8] sm:$0xff]  ;;  %v100_v44 = vld [vmem:[%s3921_s0 + $0x2b0] sm:$0xff]  ;;  %v29_v45 = vld [vmem:[%s3921_s0 + $0x78] sm:$0xff] }
   0xf   :  { %v101_v46 = vld [vmem:[%s3921_s0 + $0x2b8] sm:$0xff]  ;;  %v30_v47 = vld [vmem:[%s3921_s0 + $0x80] sm:$0xff]  ;;  %v31_v49 = vld [vmem:[%s3921_s0 + $0x88] sm:$0xff] }
  0x10   :  { %v102_v48 = vld [vmem:[%s3921_s0 + $0x2c0] sm:$0xff]  ;;  %v103_v50 = vld [vmem:[%s3921_s0 + $0x2c8] sm:$0xff]  ;;  %v32_v51 = vld [vmem:[%s3921_s0 + $0x90] sm:$0xff] }
  0x11   :  { %2457 = vmatpush3.bf16.msra.mxu0 %v2454_v13  ;;  %2472 = vmatpush3.bf16.msra.mxu1 %v2454_v13  ;;  %v104_v52 = vld [vmem:[%s3921_s0 + $0x2d0] sm:$0xff]  ;;  %v33_v53 = vld [vmem:[%s3921_s0 + $0x98] sm:$0xff]  ;;  %v34_v55 = vld [vmem:[%s3921_s0 + $0xa0] sm:$0xff] }
  0x12   :  { %2460 = vmatprep.subr.msk.bf16.mxu0 %vm2459_vm3, %v2458_v16  ;;  %2468 = vmatprep.subr.msk.bf16.mxu1 %vm2459_vm3, %v2458_v16  ;;  %v105_v54 = vld [vmem:[%s3921_s0 + $0x2d8] sm:$0xff]  ;;  %v106_v56 = vld [vmem:[%s3921_s0 + $0x2e0] sm:$0xff]  ;;  %v35_v57 = vld [vmem:[%s3921_s0 + $0xa8] sm:$0xff] }
  0x13   :  { %v107_v58 = vld [vmem:[%s3921_s0 + $0x2e8] sm:$0xff]  ;;  %v36_v59 = vld [vmem:[%s3921_s0 + $0xb0] sm:$0xff]  ;;  %v37_v61 = vld [vmem:[%s3921_s0 + $0xb8] sm:$0xff] }
  0x14   :  { %v108_v60 = vld [vmem:[%s3921_s0 + $0x2f0] sm:$0xff]  ;;  %v109_v62 = vld [vmem:[%s3921_s0 + $0x2f8] sm:$0xff]  ;;  %v38_v63 = vld [vmem:[%s3921_s0 + $0xc0] sm:$0xff] }
  0x15   :  { %2463 = vmatpush3.bf16.msk.msra.mxu0 %vm2459_vm3, %v2458_v16  ;;  %2473 = vmatpush3.bf16.msk.msra.mxu1 %vm2459_vm3, %v2458_v16  ;;  %v110_v0 = vld [vmem:[%s3921_s0 + $0x300] sm:$0xff]  ;;  %v39_v1 = vld [vmem:[%s3921_s0 + $0xc8] sm:$0xff]  ;;  %v40_v3 = vld [vmem:[%s3921_s0 + $0xd0] sm:$0xff] }
  0x16   :  { %v111_v2 = vld [vmem:[%s3921_s0 + $0x308] sm:$0xff]  ;;  %v112_v4 = vld [vmem:[%s3921_s0 + $0x310] sm:$0xff]  ;;  %v41_v5 = vld [vmem:[%s3921_s0 + $0xd8] sm:$0xff] }
  0x17   :  { %v113_v6 = vld [vmem:[%s3921_s0 + $0x318] sm:$0xff]  ;;  %v42_v7 = vld [vmem:[%s3921_s0 + $0xe0] sm:$0xff]  ;;  %v43_v9 = vld [vmem:[%s3921_s0 + $0xe8] sm:$0xff] }
  0x18   :  { %2227 = vmatmul.mubr.msk.f32.vlgmr.msra.gmra.mrb[0].mxu0 %vm168_vm0, %v15_v17  ;;  %2335 = vmatmul.mubr.msk.f32.vlgmr.msra.gmra.mrb[0].mxu1 %vm168_vm0, %v87_v18  ;;  %v114_v8 = vld [vmem:[%s3921_s0 + $0x320] sm:$0xff]  ;;  %v115_v10 = vld [vmem:[%s3921_s0 + $0x328] sm:$0xff]  ;;  %v44_v11 = vld [vmem:[%s3921_s0 + $0xf0] sm:$0xff] }
  0x19   :  { %2229 = vmatprep.mubr.msk.f32.mxu0 %vm168_vm0, %v16_v19  ;;  %2337 = vmatprep.mubr.msk.f32.mxu1 %vm168_vm0, %v88_v20  ;;  %v116_v12 = vld [vmem:[%s3921_s0 + $0x330] sm:$0xff]  ;;  %v45_v13 = vld [vmem:[%s3921_s0 + $0xf8] sm:$0xff]  ;;  %v46_v15 = vld [vmem:[%s3921_s0 + $0x100] sm:$0xff] }
  0x1a   :  { %v117_v14 = vld [vmem:[%s3921_s0 + $0x338] sm:$0xff]  ;;  %v118_v16 = vld [vmem:[%s3921_s0 + $0x340] sm:$0xff]  ;;  %v47_v17 = vld [vmem:[%s3921_s0 + $0x108] sm:$0xff] }
  0x1b   :  { %v119_v18 = vld [vmem:[%s3921_s0 + $0x348] sm:$0xff]  ;;  %v48_v19 = vld [vmem:[%s3921_s0 + $0x110] sm:$0xff] }
  0x1c   :  { %2230 = vmatmul.mubr.msk.f32.gmra.mrb[2].mxu0 %vm168_vm0, %v17_v21  ;;  %2338 = vmatmul.mubr.msk.f32.gmra.mrb[2].mxu1 %vm168_vm0, %v89_v22  ;;  %v120_v20 = vld [vmem:[%s3921_s0 + $0x350] sm:$0xff]  ;;  %v49_v21 = vld [vmem:[%s3921_s0 + $0x118] sm:$0xff] }
  0x1d   :  { %2232 = vmatprep.mubr.msk.f32.mxu0 %vm168_vm0, %v18_v23  ;;  %2340 = vmatprep.mubr.msk.f32.mxu1 %vm168_vm0, %v90_v24  ;;  %v121_v22 = vld [vmem:[%s3921_s0 + $0x358] sm:$0xff]  ;;  %v50_v23 = vld [vmem:[%s3921_s0 + $0x120] sm:$0xff] }
  0x1e   :  { %v122_v24 = vld [vmem:[%s3921_s0 + $0x360] sm:$0xff] }
  0x20   :  { %2233 = vmatmul.mubr.msk.f32.gmra.mrb[4].mxu0 %vm168_vm0, %v19_v25  ;;  %2341 = vmatmul.mubr.msk.f32.gmra.mrb[4].mxu1 %vm168_vm0, %v91_v26  ;;  %v51_v25 = vld [vmem:[%s3921_s0 + $0x128] sm:$0xff] }
  0x21   :  { %2235 = vmatprep.mubr.msk.f32.mxu0 %vm168_vm0, %v20_v27  ;;  %2343 = vmatprep.mubr.msk.f32.mxu1 %vm168_vm0, %v92_v28  ;;  %v123_v26 = vld [vmem:[%s3921_s0 + $0x368] sm:$0xff]  ;;  %v52_v27 = vld [vmem:[%s3921_s0 + $0x130] sm:$0xff] }
  0x22   :  { %v124_v28 = vld [vmem:[%s3921_s0 + $0x370] sm:$0xff] }
  0x24   :  { %2236 = vmatmul.mubr.msk.f32.gmra.mrb[6].mxu0 %vm168_vm0, %v21_v29  ;;  %2344 = vmatmul.mubr.msk.f32.gmra.mrb[6].mxu1 %vm168_vm0, %v93_v30  ;;  %v53_v29 = vld [vmem:[%s3921_s0 + $0x138] sm:$0xff] }
  0x25   :  { %2238 = vmatprep.mubr.msk.f32.mxu0 %vm168_vm0, %v22_v31  ;;  %2346 = vmatprep.mubr.msk.f32.mxu1 %vm168_vm0, %v94_v32  ;;  %v125_v30 = vld [vmem:[%s3921_s0 + $0x378] sm:$0xff]  ;;  %v54_v31 = vld [vmem:[%s3921_s0 + $0x140] sm:$0xff] }
  0x26   :  { %v126_v32 = vld [vmem:[%s3921_s0 + $0x380] sm:$0xff] }
  0x28   :  { %2239 = vmatmul.mubr.msk.f32.gmra.mrb[8].mxu0 %vm168_vm0, %v23_v33  ;;  %2347 = vmatmul.mubr.msk.f32.gmra.mrb[8].mxu1 %vm168_vm0, %v95_v34  ;;  %v55_v33 = vld [vmem:[%s3921_s0 + $0x148] sm:$0xff] }
  0x29   :  { %2241 = vmatprep.mubr.msk.f32.mxu0 %vm168_vm0, %v24_v35  ;;  %2349 = vmatprep.mubr.msk.f32.mxu1 %vm168_vm0, %v96_v36  ;;  %v127_v34 = vld [vmem:[%s3921_s0 + $0x388] sm:$0xff]  ;;  %v56_v35 = vld [vmem:[%s3921_s0 + $0x150] sm:$0xff] }
  0x2a   :  { %v128_v36 = vld [vmem:[%s3921_s0 + $0x390] sm:$0xff] }
  0x2c   :  { %2242 = vmatmul.mubr.msk.f32.gmra.mrb[10].mxu0 %vm168_vm0, %v25_v37  ;;  %2350 = vmatmul.mubr.msk.f32.gmra.mrb[10].mxu1 %vm168_vm0, %v97_v38  ;;  %v57_v37 = vld [vmem:[%s3921_s0 + $0x158] sm:$0xff] }
  0x2d   :  { %2244 = vmatprep.mubr.msk.f32.mxu0 %vm168_vm0, %v26_v39  ;;  %2352 = vmatprep.mubr.msk.f32.mxu1 %vm168_vm0, %v98_v40  ;;  %v129_v38 = vld [vmem:[%s3921_s0 + $0x398] sm:$0xff]  ;;  %v58_v39 = vld [vmem:[%s3921_s0 + $0x160] sm:$0xff] }
  0x2e   :  { %v130_v40 = vld [vmem:[%s3921_s0 + $0x3a0] sm:$0xff] }
  0x30   :  { %2245 = vmatmul.mubr.msk.f32.gmra.mrb[12].mxu0 %vm168_vm0, %v27_v41  ;;  %2353 = vmatmul.mubr.msk.f32.gmra.mrb[12].mxu1 %vm168_vm0, %v99_v42  ;;  %v59_v41 = vld [vmem:[%s3921_s0 + $0x168] sm:$0xff] }
  0x31   :  { %2247 = vmatprep.mubr.msk.f32.mxu0 %vm168_vm0, %v28_v43  ;;  %2355 = vmatprep.mubr.msk.f32.mxu1 %vm168_vm0, %v100_v44  ;;  %v131_v42 = vld [vmem:[%s3921_s0 + $0x3a8] sm:$0xff]  ;;  %v60_v43 = vld [vmem:[%s3921_s0 + $0x170] sm:$0xff] }
  0x32   :  { %v132_v44 = vld [vmem:[%s3921_s0 + $0x3b0] sm:$0xff] }
  0x34   :  { %2248 = vmatmul.mubr.msk.f32.gmra.mrb[14].mxu0 %vm168_vm0, %v29_v45  ;;  %2356 = vmatmul.mubr.msk.f32.gmra.mrb[14].mxu1 %vm168_vm0, %v101_v46  ;;  %v61_v45 = vld [vmem:[%s3921_s0 + $0x178] sm:$0xff] }
  0x35   :  { %2250 = vmatprep.mubr.msk.f32.mxu0 %vm168_vm0, %v30_v47  ;;  %2358 = vmatprep.mubr.msk.f32.mxu1 %vm168_vm0, %v102_v48  ;;  %v133_v46 = vld [vmem:[%s3921_s0 + $0x3b8] sm:$0xff]  ;;  %v62_v47 = vld [vmem:[%s3921_s0 + $0x180] sm:$0xff] }
  0x36   :  { %v134_v48 = vld [vmem:[%s3921_s0 + $0x3c0] sm:$0xff] }
  0x38   :  { %2251 = vmatmul.mubr.msk.f32.gmra.mrb[16].mxu0 %vm168_vm0, %v31_v49  ;;  %2359 = vmatmul.mubr.msk.f32.gmra.mrb[16].mxu1 %vm168_vm0, %v103_v50  ;;  %v63_v49 = vld [vmem:[%s3921_s0 + $0x188] sm:$0xff] }
  0x39   :  { %2253 = vmatprep.mubr.msk.f32.mxu0 %vm168_vm0, %v32_v51  ;;  %2361 = vmatprep.mubr.msk.f32.mxu1 %vm168_vm0, %v104_v52  ;;  %v135_v50 = vld [vmem:[%s3921_s0 + $0x3c8] sm:$0xff]  ;;  %v64_v51 = vld [vmem:[%s3921_s0 + $0x190] sm:$0xff] }
  0x3a   :  { %v136_v52 = vld [vmem:[%s3921_s0 + $0x3d0] sm:$0xff] }
  0x3c   :  { %2254 = vmatmul.mubr.msk.f32.gmra.mrb[18].mxu0 %vm168_vm0, %v33_v53  ;;  %2362 = vmatmul.mubr.msk.f32.gmra.mrb[18].mxu1 %vm168_vm0, %v105_v54  ;;  %v65_v53 = vld [vmem:[%s3921_s0 + $0x198] sm:$0xff] }
  0x3d   :  { %2256 = vmatprep.mubr.msk.f32.mxu0 %vm168_vm0, %v34_v55  ;;  %2364 = vmatprep.mubr.msk.f32.mxu1 %vm168_vm0, %v106_v56  ;;  %v137_v54 = vld [vmem:[%s3921_s0 + $0x3d8] sm:$0xff]  ;;  %v66_v55 = vld [vmem:[%s3921_s0 + $0x1a0] sm:$0xff] }
  0x3e   :  { %v138_v56 = vld [vmem:[%s3921_s0 + $0x3e0] sm:$0xff] }
  0x40   :  { %2257 = vmatmul.mubr.msk.f32.gmra.mrb[20].mxu0 %vm168_vm0, %v35_v57  ;;  %2365 = vmatmul.mubr.msk.f32.gmra.mrb[20].mxu1 %vm168_vm0, %v107_v58  ;;  %v67_v57 = vld [vmem:[%s3921_s0 + $0x1a8] sm:$0xff] }
  0x41   :  { %2259 = vmatprep.mubr.msk.f32.mxu0 %vm168_vm0, %v36_v59  ;;  %2367 = vmatprep.mubr.msk.f32.mxu1 %vm168_vm0, %v108_v60  ;;  %v139_v58 = vld [vmem:[%s3921_s0 + $0x3e8] sm:$0xff]  ;;  %v68_v59 = vld [vmem:[%s3921_s0 + $0x1b0] sm:$0xff] }
  0x42   :  { %v140_v60 = vld [vmem:[%s3921_s0 + $0x3f0] sm:$0xff] }
  0x44   :  { %2260 = vmatmul.mubr.msk.f32.gmra.mrb[22].mxu0 %vm168_vm0, %v37_v61  ;;  %2368 = vmatmul.mubr.msk.f32.gmra.mrb[22].mxu1 %vm168_vm0, %v109_v62  ;;  %v69_v61 = vld [vmem:[%s3921_s0 + $0x1b8] sm:$0xff] }
  0x45   :  { %2262 = vmatprep.mubr.msk.f32.mxu0 %vm168_vm0, %v38_v63  ;;  %2370 = vmatprep.mubr.msk.f32.mxu1 %vm168_vm0, %v110_v0  ;;  %v141_v62 = vld [vmem:[%s3921_s0 + $0x3f8] sm:$0xff]  ;;  %v70_v63 = vld [vmem:[%s3921_s0 + $0x1c0] sm:$0xff] }
  0x46   :  { %v142_v0 = vld [vmem:[%s3921_s0 + $0x400] sm:$0xff] }
  0x48   :  { %2263 = vmatmul.mubr.msk.f32.gmra.mrb[24].mxu0 %vm168_vm0, %v39_v1  ;;  %2371 = vmatmul.mubr.msk.f32.gmra.mrb[24].mxu1 %vm168_vm0, %v111_v2  ;;  %v71_v1 = vld [vmem:[%s3921_s0 + $0x1c8] sm:$0xff] }
  0x49   :  { %2265 = vmatprep.mubr.msk.f32.mxu0 %vm168_vm0, %v40_v3  ;;  %2373 = vmatprep.mubr.msk.f32.mxu1 %vm168_vm0, %v112_v4  ;;  %v143_v2 = vld [vmem:[%s3921_s0 + $0x408] sm:$0xff]  ;;  %v72_v3 = vld [vmem:[%s3921_s0 + $0x1d0] sm:$0xff] }
  0x4a   :  { %v144_v4 = vld [vmem:[%s3921_s0 + $0x410] sm:$0xff] }
  0x4c   :  { %2266 = vmatmul.mubr.msk.f32.gmra.mrb[26].mxu0 %vm168_vm0, %v41_v5  ;;  %2374 = vmatmul.mubr.msk.f32.gmra.mrb[26].mxu1 %vm168_vm0, %v113_v6  ;;  %v73_v5 = vld [vmem:[%s3921_s0 + $0x1d8] sm:$0xff] }
  0x4d   :  { %2268 = vmatprep.mubr.msk.f32.mxu0 %vm168_vm0, %v42_v7  ;;  %2376 = vmatprep.mubr.msk.f32.mxu1 %vm168_vm0, %v114_v8  ;;  %v145_v6 = vld [vmem:[%s3921_s0 + $0x418] sm:$0xff]  ;;  %v74_v7 = vld [vmem:[%s3921_s0 + $0x1e0] sm:$0xff] }
  0x4e   :  { %v146_v8 = vld [vmem:[%s3921_s0 + $0x420] sm:$0xff] }
  0x50   :  { %2269 = vmatmul.mubr.msk.f32.gmra.mrb[28].mxu0 %vm168_vm0, %v43_v9  ;;  %2377 = vmatmul.mubr.msk.f32.gmra.mrb[28].mxu1 %vm168_vm0, %v115_v10  ;;  %v75_v9 = vld [vmem:[%s3921_s0 + $0x1e8] sm:$0xff] }
  0x51   :  { %2271 = vmatprep.mubr.msk.f32.mxu0 %vm168_vm0, %v44_v11  ;;  %2379 = vmatprep.mubr.msk.f32.mxu1 %vm168_vm0, %v116_v12  ;;  %v147_v10 = vld [vmem:[%s3921_s0 + $0x428] sm:$0xff]  ;;  %v76_v11 = vld [vmem:[%s3921_s0 + $0x1f0] sm:$0xff] }
  0x52   :  { %v148_v12 = vld [vmem:[%s3921_s0 + $0x430] sm:$0xff] }
  0x54   :  { %2272 = vmatmul.mubr.msk.f32.gmra.mrb[30].mxu0 %vm168_vm0, %v45_v13  ;;  %2380 = vmatmul.mubr.msk.f32.gmra.mrb[30].mxu1 %vm168_vm0, %v117_v14  ;;  %v77_v13 = vld [vmem:[%s3921_s0 + $0x1f8] sm:$0xff] }
  0x55   :  { %2274 = vmatprep.mubr.msk.f32.mxu0 %vm168_vm0, %v46_v15  ;;  %2382 = vmatprep.mubr.msk.f32.mxu1 %vm168_vm0, %v118_v16  ;;  %v149_v14 = vld [vmem:[%s3921_s0 + $0x438] sm:$0xff]  ;;  %v78_v15 = vld [vmem:[%s3921_s0 + $0x200] sm:$0xff] }
  0x56   :  { %v150_v16 = vld [vmem:[%s3921_s0 + $0x440] sm:$0xff] }
  0x58   :  { %2275 = vmatmul.mubr.msk.f32.gmra.mrb[32].mxu0 %vm168_vm0, %v47_v17  ;;  %2383 = vmatmul.mubr.msk.f32.gmra.mrb[32].mxu1 %vm168_vm0, %v119_v18  ;;  %v79_v17 = vld [vmem:[%s3921_s0 + $0x208] sm:$0xff] }
  0x59   :  { %2277 = vmatprep.mubr.msk.f32.mxu0 %vm168_vm0, %v48_v19  ;;  %2385 = vmatprep.mubr.msk.f32.mxu1 %vm168_vm0, %v120_v20  ;;  %v151_v18 = vld [vmem:[%s3921_s0 + $0x448] sm:$0xff]  ;;  %v80_v19 = vld [vmem:[%s3921_s0 + $0x210] sm:$0xff] }
  0x5a   :  { %v152_v20 = vld [vmem:[%s3921_s0 + $0x450] sm:$0xff] }
  0x5c   :  { %2278 = vmatmul.mubr.msk.f32.gmra.mrb[34].mxu0 %vm168_vm0, %v49_v21  ;;  %2386 = vmatmul.mubr.msk.f32.gmra.mrb[34].mxu1 %vm168_vm0, %v121_v22  ;;  %v81_v21 = vld [vmem:[%s3921_s0 + $0x218] sm:$0xff] }
  0x5d   :  { %2280 = vmatprep.mubr.msk.f32.mxu0 %vm168_vm0, %v50_v23  ;;  %2388 = vmatprep.mubr.msk.f32.mxu1 %vm168_vm0, %v122_v24  ;;  %v153_v22 = vld [vmem:[%s3921_s0 + $0x458] sm:$0xff]  ;;  %v82_v23 = vld [vmem:[%s3921_s0 + $0x220] sm:$0xff] }
  0x5e   :  { %v154_v24 = vld [vmem:[%s3921_s0 + $0x460] sm:$0xff] }
  0x60   :  { %2281 = vmatmul.mubr.msk.f32.gmra.mrb[36].mxu0 %vm168_vm0, %v51_v25  ;;  %2389 = vmatmul.mubr.msk.f32.gmra.mrb[36].mxu1 %vm168_vm0, %v123_v26  ;;  %v83_v25 = vld [vmem:[%s3921_s0 + $0x228] sm:$0xff] }
  0x61   :  { %2283 = vmatprep.mubr.msk.f32.mxu0 %vm168_vm0, %v52_v27  ;;  %2391 = vmatprep.mubr.msk.f32.mxu1 %vm168_vm0, %v124_v28  ;;  %v155_v26 = vld [vmem:[%s3921_s0 + $0x468] sm:$0xff]  ;;  %v84_v27 = vld [vmem:[%s3921_s0 + $0x230] sm:$0xff] }
  0x62   :  { %v156_v28 = vld [vmem:[%s3921_s0 + $0x470] sm:$0xff] }
  0x64   :  { %2284 = vmatmul.mubr.msk.f32.gmra.mrb[38].mxu0 %vm168_vm0, %v53_v29  ;;  %2392 = vmatmul.mubr.msk.f32.gmra.mrb[38].mxu1 %vm168_vm0, %v125_v30  ;;  %v85_v29 = vld [vmem:[%s3921_s0 + $0x238] sm:$0xff] }
  0x65   :  { %2286 = vmatprep.mubr.msk.f32.mxu0 %vm168_vm0, %v54_v31  ;;  %2394 = vmatprep.mubr.msk.f32.mxu1 %vm168_vm0, %v126_v32  ;;  %v157_v30 = vld [vmem:[%s3921_s0 + $0x478] sm:$0xff] }
  0x68   :  { %2287 = vmatmul.mubr.msk.f32.gmra.mrb[40].mxu0 %vm168_vm0, %v55_v33  ;;  %2395 = vmatmul.mubr.msk.f32.gmra.mrb[40].mxu1 %vm168_vm0, %v127_v34 }
  0x69   :  { %2289 = vmatprep.mubr.msk.f32.mxu0 %vm168_vm0, %v56_v35  ;;  %2397 = vmatprep.mubr.msk.f32.mxu1 %vm168_vm0, %v128_v36 }
  0x6c   :  { %2290 = vmatmul.mubr.msk.f32.gmra.mrb[42].mxu0 %vm168_vm0, %v57_v37  ;;  %2398 = vmatmul.mubr.msk.f32.gmra.mrb[42].mxu1 %vm168_vm0, %v129_v38 }
  0x6d   :  { %2292 = vmatprep.mubr.msk.f32.mxu0 %vm168_vm0, %v58_v39  ;;  %2400 = vmatprep.mubr.msk.f32.mxu1 %vm168_vm0, %v130_v40 }
  0x70   :  { %2293 = vmatmul.mubr.msk.f32.gmra.mrb[44].mxu0 %vm168_vm0, %v59_v41  ;;  %2401 = vmatmul.mubr.msk.f32.gmra.mrb[44].mxu1 %vm168_vm0, %v131_v42 }
  0x71   :  { %2295 = vmatprep.mubr.msk.f32.mxu0 %vm168_vm0, %v60_v43  ;;  %2403 = vmatprep.mubr.msk.f32.mxu1 %vm168_vm0, %v132_v44 }
  0x74   :  { %2296 = vmatmul.mubr.msk.f32.gmra.mrb[46].mxu0 %vm168_vm0, %v61_v45  ;;  %2404 = vmatmul.mubr.msk.f32.gmra.mrb[46].mxu1 %vm168_vm0, %v133_v46 }
  0x75   :  { %2298 = vmatprep.mubr.msk.f32.mxu0 %vm168_vm0, %v62_v47  ;;  %2406 = vmatprep.mubr.msk.f32.mxu1 %vm168_vm0, %v134_v48 }
  0x78   :  { %2299 = vmatmul.mubr.msk.f32.gmra.mrb[48].mxu0 %vm168_vm0, %v63_v49  ;;  %2407 = vmatmul.mubr.msk.f32.gmra.mrb[48].mxu1 %vm168_vm0, %v135_v50 }
  0x79   :  { %2301 = vmatprep.mubr.msk.f32.mxu0 %vm168_vm0, %v64_v51  ;;  %2409 = vmatprep.mubr.msk.f32.mxu1 %vm168_vm0, %v136_v52 }
  0x7c   :  { %2302 = vmatmul.mubr.msk.f32.gmra.mrb[50].mxu0 %vm168_vm0, %v65_v53  ;;  %2410 = vmatmul.mubr.msk.f32.gmra.mrb[50].mxu1 %vm168_vm0, %v137_v54 }
  0x7d   :  { %2304 = vmatprep.mubr.msk.f32.mxu0 %vm168_vm0, %v66_v55  ;;  %2412 = vmatprep.mubr.msk.f32.mxu1 %vm168_vm0, %v138_v56 }
  0x80   :  { %2305 = vmatmul.mubr.msk.f32.gmra.mrb[52].mxu0 %vm168_vm0, %v67_v57  ;;  %2413 = vmatmul.mubr.msk.f32.gmra.mrb[52].mxu1 %vm168_vm0, %v139_v58 }
  0x81   :  { %2307 = vmatprep.mubr.msk.f32.mxu0 %vm168_vm0, %v68_v59  ;;  %2415 = vmatprep.mubr.msk.f32.mxu1 %vm168_vm0, %v140_v60 }
  0x84   :  { %2308 = vmatmul.mubr.msk.f32.gmra.mrb[54].mxu0 %vm168_vm0, %v69_v61  ;;  %2416 = vmatmul.mubr.msk.f32.gmra.mrb[54].mxu1 %vm168_vm0, %v141_v62 }
  0x85   :  { %2310 = vmatprep.mubr.msk.f32.mxu0 %vm168_vm0, %v70_v63  ;;  %2418 = vmatprep.mubr.msk.f32.mxu1 %vm168_vm0, %v142_v0 }
  0x88   :  { %2311 = vmatmul.mubr.msk.f32.gmra.mrb[56].mxu0 %vm168_vm0, %v71_v1  ;;  %2419 = vmatmul.mubr.msk.f32.gmra.mrb[56].mxu1 %vm168_vm0, %v143_v2 }
  0x89   :  { %2313 = vmatprep.mubr.msk.f32.mxu0 %vm168_vm0, %v72_v3  ;;  %2421 = vmatprep.mubr.msk.f32.mxu1 %vm168_vm0, %v144_v4 }
  0x8c   :  { %2314 = vmatmul.mubr.msk.f32.gmra.mrb[58].mxu0 %vm168_vm0, %v73_v5  ;;  %2422 = vmatmul.mubr.msk.f32.gmra.mrb[58].mxu1 %vm168_vm0, %v145_v6 }
  0x8d   :  { %2316 = vmatprep.mubr.msk.f32.mxu0 %vm168_vm0, %v74_v7  ;;  %2424 = vmatprep.mubr.msk.f32.mxu1 %vm168_vm0, %v146_v8 }
  0x90   :  { %2317 = vmatmul.mubr.msk.f32.gmra.mrb[60].mxu0 %vm168_vm0, %v75_v9  ;;  %2425 = vmatmul.mubr.msk.f32.gmra.mrb[60].mxu1 %vm168_vm0, %v147_v10 }
  0x91   :  { %2319 = vmatprep.mubr.msk.f32.mxu0 %vm168_vm0, %v76_v11  ;;  %2427 = vmatprep.mubr.msk.f32.mxu1 %vm168_vm0, %v148_v12 }
  0x94   :  { %2320 = vmatmul.mubr.msk.f32.gmra.mrb[62].mxu0 %vm168_vm0, %v77_v13  ;;  %2428 = vmatmul.mubr.msk.f32.gmra.mrb[62].mxu1 %vm168_vm0, %v149_v14 }
  0x95   :  { %2322 = vmatprep.mubr.msk.f32.mxu0 %vm168_vm0, %v78_v15  ;;  %2430 = vmatprep.mubr.msk.f32.mxu1 %vm168_vm0, %v150_v16 }
  0x98   :  { %2323 = vmatmul.mubr.msk.f32.gmra.mrb[64].mxu0 %vm168_vm0, %v79_v17  ;;  %2431 = vmatmul.mubr.msk.f32.gmra.mrb[64].mxu1 %vm168_vm0, %v151_v18 }
  0x99   :  { %2325 = vmatprep.mubr.msk.f32.mxu0 %vm168_vm0, %v80_v19  ;;  %2433 = vmatprep.mubr.msk.f32.mxu1 %vm168_vm0, %v152_v20 }
  0x9c   :  { %2326 = vmatmul.mubr.msk.f32.gmra.mrb[66].mxu0 %vm168_vm0, %v81_v21  ;;  %2434 = vmatmul.mubr.msk.f32.gmra.mrb[66].mxu1 %vm168_vm0, %v153_v22 }
  0x9d   :  { %2328 = vmatprep.mubr.msk.f32.mxu0 %vm168_vm0, %v82_v23  ;;  %2436 = vmatprep.mubr.msk.f32.mxu1 %vm168_vm0, %v154_v24 }
  0xa0   :  { %2329 = vmatmul.mubr.msk.f32.gmra.mrb[68].mxu0 %vm168_vm0, %v83_v25  ;;  %2437 = vmatmul.mubr.msk.f32.gmra.mrb[68].mxu1 %vm168_vm0, %v155_v26 }
  0xa1   :  { %2331 = vmatprep.mubr.msk.f32.mxu0 %vm168_vm0, %v84_v27  ;;  %2439 = vmatprep.mubr.msk.f32.mxu1 %vm168_vm0, %v156_v28 }
  0xa4   :  { %2332 = vmatmul.mubr.msk.f32.gmra.mrb[70].mxu0 %vm168_vm0, %v85_v29  ;;  %2440 = vmatmul.mubr.msk.f32.gmra.mrb[70].mxu1 %vm168_vm0, %v157_v30 }
  0xeb   :  { %v3174_v31 = vpop.f32.mrb[0].mxu0  ;;  %v3176_v32 = vpop.f32.mrb[0].mxu1 }
  0xec   :  { %v3178_v33 = vpop.f32.mrb[1].mxu0  ;;  %v3180_v34 = vpop.f32.mrb[1].mxu1 }
  0xef   :  { %v3182_v35 = vpop.f32.mrb[2].mxu0  ;;  %v3184_v36 = vpop.f32.mrb[2].mxu1 }
  0xf0   :  { %v3186_v37 = vpop.f32.mrb[3].mxu0  ;;  %v3188_v38 = vpop.f32.mrb[3].mxu1 }
  0xf3   :  { %v3190_v39 = vpop.f32.mrb[4].mxu0  ;;  %v3192_v40 = vpop.f32.mrb[4].mxu1 }
  0xf4   :  { %v3194_v41 = vpop.f32.mrb[5].mxu0  ;;  %v3196_v42 = vpop.f32.mrb[5].mxu1 }
  0xf7   :  { %v3198_v43 = vpop.f32.mrb[6].mxu0  ;;  %v3200_v44 = vpop.f32.mrb[6].mxu1 }
  0xf8   :  { %v3202_v45 = vpop.f32.mrb[7].mxu0  ;;  %v3204_v46 = vpop.f32.mrb[7].mxu1 }
  0xfb   :  { %v3206_v47 = vpop.f32.mrb[8].mxu0  ;;  %v3208_v48 = vpop.f32.mrb[8].mxu1 }
  0xfc   :  { %v3210_v49 = vpop.f32.mrb[9].mxu0  ;;  %v3212_v50 = vpop.f32.mrb[9].mxu1 }
  0xff   :  { %v3214_v51 = vpop.f32.mrb[10].mxu0  ;;  %v3216_v52 = vpop.f32.mrb[10].mxu1 }
 0x100   :  { %v3218_v53 = vpop.f32.mrb[11].mxu0  ;;  %v3220_v54 = vpop.f32.mrb[11].mxu1 }
 0x103   :  { %v3222_v55 = vpop.f32.mrb[12].mxu0  ;;  %v3224_v56 = vpop.f32.mrb[12].mxu1 }
 0x104   :  { %v3226_v57 = vpop.f32.mrb[13].mxu0  ;;  %v3228_v58 = vpop.f32.mrb[13].mxu1 }
 0x107   :  { %v3230_v59 = vpop.f32.mrb[14].mxu0  ;;  %v3232_v60 = vpop.f32.mrb[14].mxu1 }
 0x108   :  { %v3234_v61 = vpop.f32.mrb[15].mxu0  ;;  %v3236_v62 = vpop.f32.mrb[15].mxu1 }
 0x10b   :  { %v3238_v63 = vpop.f32.mrb[16].mxu0  ;;  %v3240_v0 = vpop.f32.mrb[16].mxu1 }
 0x10c   :  { %v3242_v1 = vpop.f32.mrb[17].mxu0  ;;  %v3244_v2 = vpop.f32.mrb[17].mxu1 }
 0x10f   :  { %v3246_v3 = vpop.f32.mrb[18].mxu0  ;;  %v3248_v4 = vpop.f32.mrb[18].mxu1 }
 0x110   :  { %v3250_v5 = vpop.f32.mrb[19].mxu0  ;;  %v3252_v6 = vpop.f32.mrb[19].mxu1 }
 0x113   :  { %v3254_v7 = vpop.f32.mrb[20].mxu0  ;;  %v3256_v8 = vpop.f32.mrb[20].mxu1 }
 0x114   :  { %v3258_v9 = vpop.f32.mrb[21].mxu0  ;;  %v3260_v10 = vpop.f32.mrb[21].mxu1 }
 0x117   :  { %v3262_v11 = vpop.f32.mrb[22].mxu0  ;;  %v3264_v12 = vpop.f32.mrb[22].mxu1 }
 0x118   :  { %v3266_v13 = vpop.f32.mrb[23].mxu0  ;;  %v3268_v14 = vpop.f32.mrb[23].mxu1 }
 0x11b   :  { %v3270_v15 = vpop.f32.mrb[24].mxu0  ;;  %v3272_v16 = vpop.f32.mrb[24].mxu1 }
 0x11c   :  { %3924 = vst [vmem:[#allocation2_spill] sm:$0xff] %v3272_v16  ;;  %v3274_v17 = vpop.f32.mrb[25].mxu0  ;;  %v3276_v18 = vpop.f32.mrb[25].mxu1 }
 0x11d   :  { %3925 = vst [vmem:[#allocation3_spill] sm:$0xff] %v3274_v17  ;;  %3926 = vst [vmem:[#allocation4_spill] sm:$0xff] %v3276_v18 }
 0x11f   :  { %v3278_v19 = vpop.f32.mrb[26].mxu0  ;;  %v3280_v20 = vpop.f32.mrb[26].mxu1 }
 0x120   :  { %3927 = vst [vmem:[#allocation5_spill] sm:$0xff] %v3278_v19  ;;  %3928 = vst [vmem:[#allocation6_spill] sm:$0xff] %v3280_v20  ;;  %v3282_v21 = vpop.f32.mrb[27].mxu0  ;;  %v3284_v22 = vpop.f32.mrb[27].mxu1 }
 0x121   :  { %3929 = vst [vmem:[#allocation7_spill] sm:$0xff] %v3282_v21  ;;  %3930 = vst [vmem:[#allocation8_spill] sm:$0xff] %v3284_v22 }
 0x123   :  { %v3286_v23 = vpop.f32.mrb[28].mxu0  ;;  %v3288_v24 = vpop.f32.mrb[28].mxu1 }
 0x124   :  { %3931 = vst [vmem:[#allocation9_spill] sm:$0xff] %v3286_v23  ;;  %3932 = vst [vmem:[#allocation10_spill] sm:$0xff] %v3288_v24  ;;  %v3290_v25 = vpop.f32.mrb[29].mxu0  ;;  %v3292_v26 = vpop.f32.mrb[29].mxu1 }
 0x125   :  { %3933 = vst [vmem:[#allocation11_spill] sm:$0xff] %v3290_v25  ;;  %3934 = vst [vmem:[#allocation12_spill] sm:$0xff] %v3292_v26 }
 0x127   :  { %v3294_v27 = vpop.f32.mrb[30].mxu0  ;;  %v3296_v28 = vpop.f32.mrb[30].mxu1 }
 0x128   :  { %3935 = vst [vmem:[#allocation13_spill] sm:$0xff] %v3294_v27  ;;  %3936 = vst [vmem:[#allocation14_spill] sm:$0xff] %v3296_v28  ;;  %v3298_v29 = vpop.f32.mrb[31].mxu0  ;;  %v3300_v30 = vpop.f32.mrb[31].mxu1 }
 0x129   :  { %3937 = vst [vmem:[#allocation15_spill] sm:$0xff] %v3298_v29  ;;  %3938 = vst [vmem:[#allocation16_spill] sm:$0xff] %v3300_v30 }
 0x12b   :  { %v3302_v20 = vpop.f32.mrb[32].mxu0  ;;  %v3304_v21 = vpop.f32.mrb[32].mxu1 }
 0x12c   :  { %3939 = vst [vmem:[#allocation17_spill] sm:$0xff] %v3302_v20  ;;  %3940 = vst [vmem:[#allocation18_spill] sm:$0xff] %v3304_v21  ;;  %v3306_v22 = vpop.f32.mrb[33].mxu0  ;;  %v3308_v23 = vpop.f32.mrb[33].mxu1 }
 0x12d   :  { %3941 = vst [vmem:[#allocation19_spill] sm:$0xff] %v3306_v22  ;;  %3942 = vst [vmem:[#allocation20_spill] sm:$0xff] %v3308_v23  ;;  %v3323_v23 = vld [vmem:[%s3922_s2] ss:$0 sm:$0xff] }
 0x12f   :  { %v3310_v24 = vpop.f32.mrb[34].mxu0  ;;  %v3312_v25 = vpop.f32.mrb[34].mxu1 }
 0x130   :  { %3943 = vst [vmem:[#allocation21_spill] sm:$0xff] %v3310_v24  ;;  %3944 = vst [vmem:[#allocation22_spill] sm:$0xff] %v3312_v25  ;;  %v3314_v26 = vpop.f32.mrb[35].mxu0  ;;  %v3316_v27 = vpop.f32.mrb[35].mxu1 }
 0x131   :  { %3945 = vst [vmem:[#allocation23_spill] sm:$0xff] %v3314_v26  ;;  %3946 = vst [vmem:[#allocation24_spill] sm:$0xff] %v3316_v27 }
 0x133   :  { %v2282_v28 = vpop.f32.mrb[36].mxu0  ;;  %v2390_v29 = vpop.f32.mrb[36].mxu1 }
 0x134   :  { %v1391_v30 = vmax.f32 %v3174_v31, %v2282_v28  ;;  %v1427_v20 = vmax.f32 %v3176_v32, %v2390_v29  ;;  %v851_v19 = vpop.f32.mrb[37].mxu0  ;;  %v1211_v21 = vpop.f32.mrb[37].mxu1 }
 0x135   :  { %v1390_v24 = vmax.f32 %v3178_v33, %v851_v19  ;;  %v1426_v25 = vmax.f32 %v3180_v34, %v1211_v21 }
 0x136   :  { %v1463_v26 = vmax.f32 %v1391_v30, %v1427_v20 }
 0x137   :  { %v1462_v22 = vmax.f32 %v1390_v24, %v1426_v25  ;;  %v2285_v27 = vpop.f32.mrb[38].mxu0  ;;  %v2393_v18 = vpop.f32.mrb[38].mxu1 }
 0x138   :  { %v3328_v17 = vadd.f32 %v3323_v23, %v1463_v26  ;;  %v1393_v31 = vmax.f32 %v3182_v35, %v2285_v27  ;;  %v1429_v32 = vmax.f32 %v3184_v36, %v2393_v18  ;;  %v861_v28 = vpop.f32.mrb[39].mxu0  ;;  %v1221_v29 = vpop.f32.mrb[39].mxu1 }
 0x139   :  { %v3333_v16 = vadd.f32 %v3323_v23, %v1462_v22  ;;  %v1392_v33 = vmax.f32 %v3186_v37, %v861_v28  ;;  %v1428_v34 = vmax.f32 %v3188_v38, %v1221_v29 }
 0x13a   :  { %v1578_v19 = vmin.f32 %v3328_v17, 0.0  ;;  %v1465_v20 = vmax.f32 %v1393_v31, %v1429_v32  ;;  %vm1542_vm5 = vcmp.gt.f32.partialorder %v3328_v17, 0.0 }
 0x13b   :  { %v1577_v21 = vmin.f32 %v3333_v16, 0.0  ;;  %v1464_v24 = vmax.f32 %v1392_v33, %v1428_v34  ;;  %v2288_v25 = vpop.f32.mrb[40].mxu0  ;;  %v2396_v26 = vpop.f32.mrb[40].mxu1  ;;  %vm1541_vm6 = vcmp.gt.f32.partialorder %v3333_v16, 0.0 }
 0x13c   :  { %v1615_v35 = vmul.f32 1.442695, %v1578_v19  ;;  %v3340_v36 = vadd.f32 %v3323_v23, %v1465_v20  ;;  %v1395_v18 = vmax.f32 %v3190_v39, %v2288_v25  ;;  %v1431_v22 = vmax.f32 %v3192_v40, %v2396_v26  ;;  %v871_v27 = vpop.f32.mrb[41].mxu0  ;;  %v1231_v37 = vpop.f32.mrb[41].mxu1 }
 0x13d   :  { %v1613_v30 = vmul.f32 1.442695, %v1577_v21  ;;  %v3345_v38 = vadd.f32 %v3323_v23, %v1464_v24  ;;  %v1394_v31 = vmax.f32 %v3194_v41, %v871_v27  ;;  %v1430_v32 = vmax.f32 %v3196_v42, %v1231_v37 }
 0x13e   :  { %2475 = vpow2.f32 %v1615_v35  ;;  %v1580_v28 = vmin.f32 %v3340_v36, 0.0  ;;  %v1467_v29 = vmax.f32 %v1395_v18, %v1431_v22  ;;  %vm1544_vm7 = vcmp.gt.f32.partialorder %v3340_v36, 0.0 }
 0x13f   :  { %2477 = vpow2.f32 %v1613_v30  ;;  %v1579_v33 = vmin.f32 %v3345_v38, 0.0  ;;  %v1466_v39 = vmax.f32 %v1394_v31, %v1430_v32  ;;  %v2291_v34 = vpop.f32.mrb[42].mxu0  ;;  %v2399_v40 = vpop.f32.mrb[42].mxu1  ;;  %vm1543_vm8 = vcmp.gt.f32.partialorder %v3345_v38, 0.0 }
 0x140   :  { %v1619_v19 = vmul.f32 1.442695, %v1580_v28  ;;  %v3352_v20 = vadd.f32 %v3323_v23, %v1467_v29  ;;  %v1397_v21 = vmax.f32 %v3198_v43, %v2291_v34  ;;  %v1433_v41 = vmax.f32 %v3200_v44, %v2399_v40  ;;  %v881_v24 = vpop.f32.mrb[43].mxu0  ;;  %v1241_v42 = vpop.f32.mrb[43].mxu1 }
 0x141   :  { %v1617_v25 = vmul.f32 1.442695, %v1579_v33  ;;  %v3357_v26 = vadd.f32 %v3323_v23, %v1466_v39  ;;  %v1396_v35 = vmax.f32 %v3202_v45, %v881_v24  ;;  %v1432_v18 = vmax.f32 %v3204_v46, %v1241_v42 }
 0x142   :  { %2479 = vpow2.f32 %v1619_v19  ;;  %v1582_v22 = vmin.f32 %v3352_v20, 0.0  ;;  %v1469_v27 = vmax.f32 %v1397_v21, %v1433_v41  ;;  %vm1546_vm9 = vcmp.gt.f32.partialorder %v3352_v20, 0.0 }
 0x143   :  { %2481 = vpow2.f32 %v1617_v25  ;;  %v1581_v37 = vmin.f32 %v3357_v26, 0.0  ;;  %v1468_v43 = vmax.f32 %v1396_v35, %v1432_v18  ;;  %v2294_v30 = vpop.f32.mrb[44].mxu0  ;;  %v2402_v44 = vpop.f32.mrb[44].mxu1  ;;  %vm1545_vm10 = vcmp.gt.f32.partialorder %v3357_v26, 0.0 }
 0x144   :  { %v1623_v31 = vmul.f32 1.442695, %v1582_v22  ;;  %v3364_v32 = vadd.f32 %v3323_v23, %v1469_v27  ;;  %v1399_v28 = vmax.f32 %v3206_v47, %v2294_v30  ;;  %v1435_v45 = vmax.f32 %v3208_v48, %v2402_v44  ;;  %v891_v29 = vpop.f32.mrb[45].mxu0  ;;  %v1251_v46 = vpop.f32.mrb[45].mxu1 }
 0x145   :  { %v1621_v33 = vmul.f32 1.442695, %v1581_v37  ;;  %v3369_v39 = vadd.f32 %v3323_v23, %v1468_v43  ;;  %v1398_v34 = vmax.f32 %v3210_v49, %v891_v29  ;;  %v1434_v40 = vmax.f32 %v3212_v50, %v1251_v46 }
 0x146   :  { %2483 = vpow2.f32 %v1623_v31  ;;  %v1584_v19 = vmin.f32 %v3364_v32, 0.0  ;;  %v1471_v21 = vmax.f32 %v1399_v28, %v1435_v45  ;;  %vm1548_vm11 = vcmp.gt.f32.partialorder %v3364_v32, 0.0 }
 0x147   :  { %2485 = vpow2.f32 %v1621_v33  ;;  %v1583_v47 = vmin.f32 %v3369_v39, 0.0  ;;  %v1470_v48 = vmax.f32 %v1398_v34, %v1434_v40  ;;  %v2297_v41 = vpop.f32.mrb[46].mxu0  ;;  %v2405_v24 = vpop.f32.mrb[46].mxu1  ;;  %vm1547_vm12 = vcmp.gt.f32.partialorder %v3369_v39, 0.0 }
 0x148   :  { %v2476_v42 = vpop.eup %2475  ;;  %v1627_v25 = vmul.f32 1.442695, %v1584_v19  ;;  %v3378_v49 = vadd.f32 %v3323_v23, %v1471_v21  ;;  %v1401_v50 = vmax.f32 %v3214_v51, %v2297_v41  ;;  %v1437_v35 = vmax.f32 %v3216_v52, %v2405_v24  ;;  %v901_v18 = vpop.f32.mrb[47].mxu0 }
 0x149   :  { %v1261_v22 = vpop.f32.mrb[47].mxu1  ;;  %v2478_v27 = vpop.eup %2477  ;;  %v2017_v37 = vadd.f32 -1.0, %v2476_v42  ;;  %v1625_v43 = vmul.f32 1.442695, %v1583_v47  ;;  %v3383_v30 = vadd.f32 %v3323_v23, %v1470_v48  ;;  %v1400_v44 = vmax.f32 %v3218_v53, %v901_v18 }
 0x14a   :  { %v2016_v31 = vadd.f32 -1.0, %v2478_v27  ;;  %2487 = vpow2.f32 %v1627_v25  ;;  %v1586_v28 = vmin.f32 %v3378_v49, 0.0  ;;  %v1473_v53 = vmax.f32 %v1401_v50, %v1437_v35 }
 0x14b   :  { %v1722_v45 = vmul.f32 1.6732632, %v2017_v37  ;;  %2489 = vpow2.f32 %v1625_v43  ;;  %v1585_v51 = vmin.f32 %v3383_v30, 0.0  ;;  %v2300_v52 = vpop.f32.mrb[48].mxu0  ;;  %v2408_v29 = vpop.f32.mrb[48].mxu1  ;;  %v1436_v40 = vmax.f32 %v3220_v54, %v1261_v22 }
 0x14c   :  { %v2480_v46 = vpop.eup %2479  ;;  %v1721_v33 = vmul.f32 1.6732632, %v2016_v31  ;;  %v1631_v34 = vmul.f32 1.442695, %v1586_v28  ;;  %v3392_v19 = vpop.f32.mrb[49].mxu0  ;;  %v1403_v42 = vmax.f32 %v3222_v55, %v2300_v52  ;;  %v3405_v22 = vadd.f32 %v3323_v23, %v1473_v53 }
 0x14d   :  { %v3394_v21 = vpop.f32.mrb[49].mxu1  ;;  %v2482_v47 = vpop.eup %2481  ;;  %v1758_v48 = vsel %vm1542_vm5, %v3328_v17, %v1722_v45  ;;  %v2019_v41 = vadd.f32 -1.0, %v2480_v46  ;;  %v1629_v24 = vmul.f32 1.442695, %v1585_v51  ;;  %v1439_v43 = vmax.f32 %v3224_v56, %v2408_v29 }
 0x14e   :  { %v1794_v25 = vmul.f32 1.050701, %v1758_v48  ;;  %v1757_v54 = vsel %vm1541_vm6, %v3333_v16, %v1721_v33  ;;  %v2018_v50 = vadd.f32 -1.0, %v2482_v47  ;;  %2491 = vpow2.f32 %v1631_v34 }
 0x14f   :  { %v1793_v35 = vmul.f32 1.050701, %v1757_v54  ;;  %v1724_v18 = vmul.f32 1.6732632, %v2019_v41  ;;  %2493 = vpow2.f32 %v1629_v24  ;;  %v3407_v17 = vpop.f32.mrb[50].mxu0  ;;  %v3409_v27 = vpop.f32.mrb[50].mxu1  ;;  %v1472_v16 = vmax.f32 %v1400_v44, %v1436_v40 }
 0x150   :  { %v2484_v37 = vpop.eup %2483  ;;  %1831 = vst.msk [vmem:[%s3923_s3 + $0x8] sm:$0xff] %vm1829_vm4, %v1794_v25  ;;  %v1723_v55 = vmul.f32 1.6732632, %v2018_v50  ;;  %v1402_v31 = vmax.f32 %v3226_v57, %v3392_v19  ;;  %v3418_v28 = vpop.f32.mrb[51].mxu0  ;;  %v1588_v56 = vmin.f32 %v3405_v22, 0.0  ;;  %v1475_v19 = vmax.f32 %v1403_v42, %v1439_v43 }
 0x151   :  { %v3420_v45 = vpop.f32.mrb[51].mxu1  ;;  %v2486_v51 = vpop.eup %2485  ;;  %1830 = vst.msk [vmem:[%s3923_s3] sm:$0xff] %vm1829_vm4, %v1793_v35  ;;  %v1760_v52 = vsel %vm1544_vm7, %v3340_v36, %v1724_v18  ;;  %v2021_v44 = vadd.f32 -1.0, %v2484_v37  ;;  %v3435_v33 = vadd.f32 %v3323_v23, %v1472_v16  ;;  %vm1550_vm13 = vcmp.gt.f32.partialorder %v3378_v49, 0.0 }
 0x152   :  { %v1796_v57 = vmul.f32 1.050701, %v1760_v52  ;;  %v1759_v29 = vsel %vm1543_vm8, %v3345_v38, %v1723_v55  ;;  %v2020_v46 = vadd.f32 -1.0, %v2486_v51  ;;  %v1635_v40 = vmul.f32 1.442695, %v1588_v56 }
 0x153   :  { %v1795_v34 = vmul.f32 1.050701, %v1759_v29  ;;  %v1726_v53 = vmul.f32 1.6732632, %v2021_v44  ;;  %v1587_v48 = vmin.f32 %v3435_v33, 0.0  ;;  %v1438_v38 = vmax.f32 %v3228_v58, %v3394_v21  ;;  %v3445_v41 = vpop.f32.mrb[52].mxu0 }
 0x154   :  { %v2488_v47 = vpop.eup %2487  ;;  %1833 = vst.msk [vmem:[%s3923_s3 + $0x18] sm:$0xff] %vm1829_vm4, %v1796_v57  ;;  %v1725_v36 = vmul.f32 1.6732632, %v2020_v46  ;;  %v3447_v24 = vpop.f32.mrb[52].mxu1  ;;  %2495 = vpow2.f32 %v1635_v40  ;;  %v3457_v50 = vadd.f32 %v3323_v23, %v1475_v19  ;;  %vm1549_vm14 = vcmp.gt.f32.partialorder %v3383_v30, 0.0 }
 0x155   :  { %v2490_v25 = vpop.eup %2489  ;;  %1832 = vst.msk [vmem:[%s3923_s3 + $0x10] sm:$0xff] %vm1829_vm4, %v1795_v34  ;;  %v1762_v42 = vsel %vm1546_vm9, %v3352_v20, %v1726_v53  ;;  %v2023_v54 = vadd.f32 -1.0, %v2488_v47  ;;  %v3459_v58 = vpop.f32.mrb[53].mxu0  ;;  %v1633_v55 = vmul.f32 1.442695, %v1587_v48  ;;  %v1474_v44 = vmax.f32 %v1402_v31, %v1438_v38 }
 0x156   :  { %v3461_v21 = vpop.f32.mrb[53].mxu1  ;;  %v1798_v35 = vmul.f32 1.050701, %v1762_v42  ;;  %v1761_v18 = vsel %vm1545_vm10, %v3357_v26, %v1725_v36  ;;  %v2022_v37 = vadd.f32 -1.0, %v2490_v25  ;;  %v1590_v20 = vmin.f32 %v3457_v50, 0.0 }
 0x157   :  { %v1797_v16 = vmul.f32 1.050701, %v1761_v18  ;;  %v1728_v43 = vmul.f32 1.6732632, %v2023_v54  ;;  %2497 = vpow2.f32 %v1633_v55  ;;  %v1405_v26 = vmax.f32 %v3230_v59, %v3407_v17  ;;  %v3474_v56 = vpop.f32.mrb[54].mxu0  ;;  %v3476_v57 = vpop.f32.mrb[54].mxu1 }
 0x158   :  { %v2492_v51 = vpop.eup %2491  ;;  %1835 = vst.msk [vmem:[%s3923_s3 + $0x28] sm:$0xff] %vm1829_vm4, %v1798_v35  ;;  %v1727_v52 = vmul.f32 1.6732632, %v2022_v37  ;;  %v1639_v53 = vmul.f32 1.442695, %v1590_v20  ;;  %v1441_v31 = vmax.f32 %v3232_v60, %v3409_v27  ;;  %v3495_v36 = vadd.f32 %v3323_v23, %v1474_v44 }
 0x159   :  { %v2494_v29 = vpop.eup %2493  ;;  %1834 = vst.msk [vmem:[%s3923_s3 + $0x20] sm:$0xff] %vm1829_vm4, %v1797_v16  ;;  %v1764_v46 = vsel %vm1548_vm11, %v3364_v32, %v1728_v43  ;;  %v2025_v34 = vadd.f32 -1.0, %v2492_v51  ;;  %v3487_v59 = vpop.f32.mrb[55].mxu0  ;;  %v1404_v42 = vmax.f32 %v3234_v61, %v3418_v28  ;;  %v1440_v55 = vmax.f32 %v3236_v62, %v3420_v45 }
 0x15a   :  { %v3489_v17 = vpop.f32.mrb[55].mxu1  ;;  %v1800_v40 = vmul.f32 1.050701, %v1764_v46  ;;  %v1763_v19 = vsel %vm1547_vm12, %v3369_v39, %v1727_v52  ;;  %v2024_v47 = vadd.f32 -1.0, %v2494_v29  ;;  %2499 = vpow2.f32 %v1639_v53 }
 0x15b   :  { %v1799_v48 = vmul.f32 1.050701, %v1763_v19  ;;  %v1730_v32 = vmul.f32 1.6732632, %v2025_v34  ;;  %v1477_v38 = vmax.f32 %v1405_v26, %v1441_v31  ;;  %v3497_v25 = vpop.f32.mrb[56].mxu0  ;;  %v3499_v60 = vpop.f32.mrb[56].mxu1  ;;  %v1407_v61 = vmax.f32 %v3238_v63, %v3445_v41 }
 0x15c   :  { %1837 = vst.msk [vmem:[%s3923_s3 + $0x38] sm:$0xff] %vm1829_vm4, %v1800_v40  ;;  %v1729_v39 = vmul.f32 1.6732632, %v2024_v47  ;;  %v1589_v27 = vmin.f32 %v3495_v36, 0.0  ;;  %v3509_v54 = vpop.f32.mrb[57].mxu0  ;;  %v3511_v35 = vpop.f32.mrb[57].mxu1  ;;  %v1443_v20 = vmax.f32 %v3240_v0, %v3447_v24  ;;  %v1476_v44 = vmax.f32 %v1404_v42, %v1440_v55 }
 0x15d   :  { %1836 = vst.msk [vmem:[%s3923_s3 + $0x30] sm:$0xff] %vm1829_vm4, %v1799_v48  ;;  %v1766_v18 = vsel %vm1550_vm13, %v3378_v49, %v1730_v32  ;;  %v3521_v37 = vadd.f32 %v3323_v23, %v1477_v38  ;;  %v1406_v0 = vmax.f32 %v3242_v1, %v3459_v58  ;;  %v1442_v46 = vmax.f32 %v3244_v2, %v3461_v21 }
 0x15e   :  { %v1802_v28 = vmul.f32 1.050701, %v1766_v18  ;;  %v1765_v16 = vsel %vm1549_vm14, %v3383_v30, %v1729_v39  ;;  %v1637_v43 = vmul.f32 1.442695, %v1589_v27  ;;  %v2496_v51 = vpop.eup %2495  ;;  %v1479_v63 = vmax.f32 %v1407_v61, %v1443_v20 }
 0x15f   :  { %v1801_v52 = vmul.f32 1.050701, %v1765_v16  ;;  %v1592_v49 = vmin.f32 %v3521_v37, 0.0  ;;  %v3531_v26 = vpop.f32.mrb[58].mxu0  ;;  %v3533_v29 = vpop.f32.mrb[58].mxu1  ;;  %v2027_v62 = vadd.f32 -1.0, %v2496_v51  ;;  %v3550_v24 = vadd.f32 %v3323_v23, %v1476_v44 }
 0x160   :  { %1839 = vst.msk [vmem:[%s3923_s3 + $0x48] sm:$0xff] %vm1829_vm4, %v1802_v28  ;;  %2501 = vpow2.f32 %v1637_v43  ;;  %v3541_v30 = vpop.f32.mrb[59].mxu0  ;;  %v3543_v45 = vpop.f32.mrb[59].mxu1  ;;  %v1409_v34 = vmax.f32 %v3246_v3, %v3474_v56  ;;  %v3557_v53 = vadd.f32 %v3323_v23, %v1479_v63  ;;  %v1445_v31 = vmax.f32 %v3248_v4, %v3476_v57 }
 0x161   :  { %1838 = vst.msk [vmem:[%s3923_s3 + $0x40] sm:$0xff] %vm1829_vm4, %v1801_v52  ;;  %v1643_v41 = vmul.f32 1.442695, %v1592_v49  ;;  %v2498_v1 = vpop.eup %2497  ;;  %v1732_v58 = vmul.f32 1.6732632, %v2027_v62  ;;  %v1408_v40 = vmax.f32 %v3250_v5, %v3487_v59  ;;  %vm1552_vm15 = vcmp.gt.f32.partialorder %v3405_v22, 0.0 }
 0x162   :  { %v2026_v19 = vadd.f32 -1.0, %v2498_v1  ;;  %v1591_v2 = vmin.f32 %v3550_v24, 0.0  ;;  %vm1551_vm0 = vcmp.gt.f32.partialorder %v3435_v33, 0.0  ;;  %v1594_v47 = vmin.f32 %v3557_v53, 0.0 }
 0x163   :  { %2503 = vpow2.f32 %v1643_v41  ;;  %v3565_v21 = vpop.f32.mrb[60].mxu0  ;;  %v3567_v3 = vpop.f32.mrb[60].mxu1  ;;  %v1768_v56 = vsel %vm1552_vm15, %v3405_v22, %v1732_v58  ;;  %v1478_v4 = vmax.f32 %v1406_v0, %v1442_v46  ;;  %v1481_v39 = vmax.f32 %v1409_v34, %v1445_v31 }
 0x164   :  { %v3572_v57 = vpop.f32.mrb[61].mxu0  ;;  %v3574_v5 = vpop.f32.mrb[61].mxu1  ;;  %v1804_v48 = vmul.f32 1.050701, %v1768_v56  ;;  %v1731_v32 = vmul.f32 1.6732632, %v2026_v19  ;;  %v1444_v22 = vmax.f32 %v3252_v6, %v3489_v17  ;;  %v1411_v28 = vmax.f32 %v3254_v7, %v3497_v25 }
 0x165   :  { %v2500_v59 = vpop.eup %2499  ;;  %v1641_v38 = vmul.f32 1.442695, %v1591_v2  ;;  %v1647_v42 = vmul.f32 1.442695, %v1594_v47  ;;  %v3577_v18 = vadd.f32 %v3323_v23, %v1478_v4  ;;  %v3587_v61 = vadd.f32 %v3323_v23, %v1481_v39 }
 0x166   :  { %v2029_v27 = vadd.f32 -1.0, %v2500_v59  ;;  %1841 = vst.msk [vmem:[%s3923_s3 + $0x58] sm:$0xff] %vm1829_vm4, %v1804_v48  ;;  %v1767_v55 = vsel %vm1551_vm0, %v3435_v33, %v1731_v32  ;;  %vm1554_vm1 = vcmp.gt.f32.partialorder %v3457_v50, 0.0  ;;  %vm1553_vm2 = vcmp.gt.f32.partialorder %v3495_v36, 0.0 }
 0x167   :  { %2505 = vpow2.f32 %v1641_v38  ;;  %v3591_v16 = vpop.f32.mrb[62].mxu0  ;;  %v3593_v43 = vpop.f32.mrb[62].mxu1  ;;  %v1803_v20 = vmul.f32 1.050701, %v1767_v55  ;;  %v1593_v33 = vmin.f32 %v3577_v18, 0.0  ;;  %v1596_v51 = vmin.f32 %v3587_v61, 0.0 }
 0x168   :  { %v1734_v6 = vmul.f32 1.6732632, %v2029_v27  ;;  %2507 = vpow2.f32 %v1647_v42  ;;  %v3596_v17 = vpop.f32.mrb[63].mxu0  ;;  %v1480_v52 = vmax.f32 %v1408_v40, %v1444_v22  ;;  %v3601_v49 = vpop.f32.mrb[63].mxu1  ;;  %v1447_v44 = vmax.f32 %v3256_v8, %v3499_v60 }
 0x169   :  { %1840 = vst.msk [vmem:[%s3923_s3 + $0x50] sm:$0xff] %vm1829_vm4, %v1803_v20  ;;  %v1410_v62 = vmax.f32 %v3258_v9, %v3509_v54  ;;  %v1446_v63 = vmax.f32 %v3260_v10, %v3511_v35  ;;  %v1645_v46 = vmul.f32 1.442695, %v1593_v33  ;;  %v1651_v58 = vmul.f32 1.442695, %v1596_v51 }
 0x16a   :  { %v2502_v7 = vpop.eup %2501  ;;  %v1770_v25 = vsel %vm1554_vm1, %v3457_v50, %v1734_v6  ;;  %v3615_v34 = vadd.f32 %v3323_v23, %v1480_v52  ;;  %v1483_v31 = vmax.f32 %v1411_v28, %v1447_v44  ;;  %v1413_v8 = vmax.f32 %v3262_v11, %v3531_v26 }
 0x16b   :  { %v1806_v0 = vmul.f32 1.050701, %v1770_v25  ;;  %v2028_v41 = vadd.f32 -1.0, %v2502_v7  ;;  %v3617_v1 = vpop.f32.mrb[64].mxu0  ;;  %v1482_v50 = vmax.f32 %v1410_v62, %v1446_v63  ;;  %v3621_v60 = vpop.f32.mrb[64].mxu1  ;;  %vm1556_vm3 = vcmp.gt.f32.partialorder %v3521_v37, 0.0 }
 0x16c   :  { %v3623_v9 = vpop.f32.mrb[65].mxu0  ;;  %2509 = vpow2.f32 %v1645_v46  ;;  %v1595_v35 = vmin.f32 %v3615_v34, 0.0  ;;  %v3631_v40 = vpop.f32.mrb[65].mxu1  ;;  %v3634_v11 = vadd.f32 %v3323_v23, %v1483_v31  ;;  %v1449_v47 = vmax.f32 %v3264_v12, %v3533_v29  ;;  %v3948_v46 = vld [vmem:[#allocation3_spill] sm:$0xff] }
 0x16d   :  { %v2504_v54 = vpop.eup %2503  ;;  %1843 = vst.msk [vmem:[%s3923_s3 + $0x68] sm:$0xff] %vm1829_vm4, %v1806_v0  ;;  %v1733_v10 = vmul.f32 1.6732632, %v2028_v41  ;;  %2511 = vpow2.f32 %v1651_v58  ;;  %v3637_v26 = vadd.f32 %v3323_v23, %v1482_v50  ;;  %v1412_v4 = vmax.f32 %v3266_v13, %v3541_v30  ;;  %v3947_v0 = vld [vmem:[#allocation2_spill] sm:$0xff] }
 0x16e   :  { %v2031_v19 = vadd.f32 -1.0, %v2504_v54  ;;  %v1649_v56 = vmul.f32 1.442695, %v1595_v35  ;;  %vm1555_vm5 = vcmp.gt.f32.partialorder %v3550_v24, 0.0  ;;  %v1598_v39 = vmin.f32 %v3634_v11, 0.0 }
 0x16f   :  { %v1769_v2 = vsel %vm1553_vm2, %v3495_v36, %v1733_v10  ;;  %v3646_v59 = vpop.f32.mrb[66].mxu0  ;;  %v3648_v48 = vpop.f32.mrb[66].mxu1  ;;  %vm1558_vm6 = vcmp.gt.f32.partialorder %v3557_v53, 0.0  ;;  %v1597_v36 = vmin.f32 %v3637_v26, 0.0  ;;  %v1485_v12 = vmax.f32 %v1413_v8, %v1449_v47  ;;  %v3949_v10 = vld [vmem:[#allocation4_spill] sm:$0xff] }
 0x170   :  { %v1805_v32 = vmul.f32 1.050701, %v1769_v2  ;;  %v1736_v38 = vmul.f32 1.6732632, %v2031_v19  ;;  %2513 = vpow2.f32 %v1649_v56  ;;  %v3654_v29 = vpop.f32.mrb[67].mxu0  ;;  %v3656_v13 = vpop.f32.mrb[67].mxu1  ;;  %v1448_v28 = vmax.f32 %v3268_v14, %v3543_v45 }
 0x171   :  { %v2506_v27 = vpop.eup %2505  ;;  %v1655_v55 = vmul.f32 1.442695, %v1598_v39  ;;  %v1653_v33 = vmul.f32 1.442695, %v1597_v36  ;;  %v3668_v51 = vadd.f32 %v3323_v23, %v1485_v12  ;;  %v1415_v44 = vmax.f32 %v3270_v15, %v3565_v21  ;;  %v3951_v12 = vld [vmem:[#allocation6_spill] sm:$0xff] }
 0x172   :  { %v2508_v30 = vpop.eup %2507  ;;  %1842 = vst.msk [vmem:[%s3923_s3 + $0x60] sm:$0xff] %vm1829_vm4, %v1805_v32  ;;  %v1772_v42 = vsel %vm1556_vm3, %v3521_v37, %v1736_v38  ;;  %v2030_v22 = vadd.f32 -1.0, %v2506_v27  ;;  %v1484_v25 = vmax.f32 %v1412_v4, %v1448_v28  ;;  %vm1557_vm7 = vcmp.gt.f32.partialorder %v3577_v18, 0.0  ;;  %v3950_v27 = vld [vmem:[#allocation5_spill] sm:$0xff] }
 0x173   :  { %v1808_v20 = vmul.f32 1.050701, %v1772_v42  ;;  %v2033_v6 = vadd.f32 -1.0, %v2508_v30  ;;  %v3670_v52 = vpop.f32.mrb[68].mxu0  ;;  %2515 = vpow2.f32 %v1655_v55  ;;  %v3674_v37 = vpop.f32.mrb[68].mxu1  ;;  %v1600_v45 = vmin.f32 %v3668_v51, 0.0 }
 0x174   :  { %v1735_v7 = vmul.f32 1.6732632, %v2030_v22  ;;  %v3676_v62 = vpop.f32.mrb[69].mxu0  ;;  %2517 = vpow2.f32 %v1653_v33  ;;  %v3684_v63 = vpop.f32.mrb[69].mxu1  ;;  %v3690_v21 = vadd.f32 %v3323_v23, %v1484_v25  ;;  %v1451_v41 = vmax.f32 %v3947_v0, %v3567_v3 }
 0x175   :  { %1845 = vst.msk [vmem:[%s3923_s3 + $0x78] sm:$0xff] %vm1829_vm4, %v1808_v20  ;;  %v1738_v14 = vmul.f32 1.6732632, %v2033_v6  ;;  %v1414_v58 = vmax.f32 %v3948_v46, %v3572_v57  ;;  %v1659_v54 = vmul.f32 1.442695, %v1600_v45  ;;  %v1450_v35 = vmax.f32 %v3949_v10, %v3574_v5  ;;  %v3952_v20 = vld [vmem:[#allocation7_spill] sm:$0xff] }
 0x176   :  { %v1771_v15 = vsel %vm1555_vm5, %v3550_v24, %v1735_v7  ;;  %v2510_v31 = vpop.eup %2509  ;;  %vm1560_vm8 = vcmp.gt.f32.partialorder %v3587_v61, 0.0  ;;  %v1599_v57 = vmin.f32 %v3690_v21, 0.0  ;;  %v1487_v5 = vmax.f32 %v1415_v44, %v1451_v41  ;;  %v3953_v46 = vld [vmem:[#allocation8_spill] sm:$0xff] }
 0x177   :  { %v1807_v50 = vmul.f32 1.050701, %v1771_v15  ;;  %v1774_v8 = vsel %vm1558_vm6, %v3557_v53, %v1738_v14  ;;  %v3701_v24 = vpop.f32.mrb[70].mxu0  ;;  %v3703_v19 = vpop.f32.mrb[70].mxu1  ;;  %v2032_v3 = vadd.f32 -1.0, %v2510_v31  ;;  %2519 = vpow2.f32 %v1659_v54  ;;  %v3954_v54 = vld [vmem:[#allocation9_spill] sm:$0xff] }
 0x178   :  { %v2512_v2 = vpop.eup %2511  ;;  %v1810_v56 = vmul.f32 1.050701, %v1774_v8  ;;  %v3707_v47 = vpop.f32.mrb[71].mxu0  ;;  %v1486_v4 = vmax.f32 %v1414_v58, %v1450_v35  ;;  %v1657_v39 = vmul.f32 1.442695, %v1599_v57  ;;  %v1417_v36 = vmax.f32 %v3950_v27, %v3591_v16 }
 0x179   :  { %1844 = vst.msk [vmem:[%s3923_s3 + $0x70] sm:$0xff] %vm1829_vm4, %v1807_v50  ;;  %v2035_v53 = vadd.f32 -1.0, %v2512_v2  ;;  %v3713_v32 = vpop.f32.mrb[71].mxu1  ;;  %v1737_v38 = vmul.f32 1.6732632, %v2032_v3  ;;  %v1453_v30 = vmax.f32 %v3951_v12, %v3593_v43  ;;  %v3724_v55 = vadd.f32 %v3323_v23, %v1487_v5  ;;  %v3956_v5 = vld [vmem:[#allocation11_spill] sm:$0xff] }
 0x17a   :  { %1847 = vst.msk [vmem:[%s3923_s3 + $0x88] sm:$0xff] %vm1829_vm4, %v1810_v56  ;;  %v2514_v42 = vpop.eup %2513  ;;  %v3727_v28 = vadd.f32 %v3323_v23, %v1486_v4  ;;  %v1416_v6 = vmax.f32 %v3952_v20, %v3596_v17  ;;  %2521 = vpow2.f32 %v1657_v39  ;;  %vm1559_vm9 = vcmp.gt.f32.partialorder %v3615_v34, 0.0 }
 0x17b   :  { %v1740_v22 = vmul.f32 1.6732632, %v2035_v53  ;;  %v1773_v33 = vsel %vm1557_vm7, %v3577_v18, %v1737_v38  ;;  %v2034_v7 = vadd.f32 -1.0, %v2514_v42  ;;  %v1489_v16 = vmax.f32 %v1417_v36, %v1453_v30  ;;  %v3957_v38 = vld [vmem:[#allocation12_spill] sm:$0xff] }
 0x17c   :  { %v1809_v25 = vmul.f32 1.050701, %v1773_v33  ;;  %v1602_v44 = vmin.f32 %v3724_v55, 0.0  ;;  %vm1562_vm10 = vcmp.gt.f32.partialorder %v3634_v11, 0.0  ;;  %v1601_v17 = vmin.f32 %v3727_v28, 0.0 }
 0x17d   :  { %v1776_v43 = vsel %vm1560_vm8, %v3587_v61, %v1740_v22  ;;  %v2516_v14 = vpop.eup %2515  ;;  %v1739_v15 = vmul.f32 1.6732632, %v2034_v7  ;;  %v3746_v61 = vadd.f32 %v3323_v23, %v1489_v16  ;;  %v1452_v58 = vmax.f32 %v3953_v46, %v3601_v49 }
 0x17e   :  { %v1812_v45 = vmul.f32 1.050701, %v1776_v43  ;;  %v2518_v18 = vpop.eup %2517  ;;  %1846 = vst.msk [vmem:[%s3923_s3 + $0x80] sm:$0xff] %vm1829_vm4, %v1809_v25  ;;  %v2037_v0 = vadd.f32 -1.0, %v2516_v14  ;;  %v1663_v41 = vmul.f32 1.442695, %v1602_v44  ;;  %v1419_v10 = vmax.f32 %v3954_v54, %v3617_v1 }
 0x17f   :  { %v1775_v31 = vsel %vm1559_vm9, %v3615_v34, %v1739_v15  ;;  %v2036_v50 = vadd.f32 -1.0, %v2518_v18  ;;  %v1661_v8 = vmul.f32 1.442695, %v1601_v17  ;;  %vm1561_vm11 = vcmp.gt.f32.partialorder %v3637_v26, 0.0  ;;  %v3955_v1 = vld [vmem:[#allocation10_spill] sm:$0xff]  ;;  %v3961_v18 = vld [vmem:[#allocation16_spill] sm:$0xff] }
 0x180   :  { %1849 = vst.msk [vmem:[%s3923_s3 + $0x98] sm:$0xff] %vm1829_vm4, %v1812_v45  ;;  %v1811_v35 = vmul.f32 1.050701, %v1775_v31  ;;  %v1742_v2 = vmul.f32 1.6732632, %v2037_v0  ;;  %2523 = vpow2.f32 %v1663_v41  ;;  %v1604_v49 = vmin.f32 %v3746_v61, 0.0 }
 0x181   :  { %v1741_v56 = vmul.f32 1.6732632, %v2036_v50  ;;  %2525 = vpow2.f32 %v1661_v8  ;;  %v1488_v3 = vmax.f32 %v1416_v6, %v1452_v58  ;;  %v2520_v57 = vpop.eup %2519  ;;  %v1455_v53 = vmax.f32 %v3955_v1, %v3621_v60 }
 0x182   :  { %1848 = vst.msk [vmem:[%s3923_s3 + $0x90] sm:$0xff] %vm1829_vm4, %v1811_v35  ;;  %v1778_v34 = vsel %vm1562_vm10, %v3634_v11, %v1742_v2  ;;  %v1418_v4 = vmax.f32 %v3956_v5, %v3623_v9  ;;  %v1454_v39 = vmax.f32 %v3957_v38, %v3631_v40  ;;  %v2039_v12 = vadd.f32 -1.0, %v2520_v57  ;;  %v3958_v9 = vld [vmem:[#allocation13_spill] sm:$0xff]  ;;  %v3963_v57 = vld [vmem:[#allocation18_spill] sm:$0xff] }
 0x183   :  { %v1814_v27 = vmul.f32 1.050701, %v1778_v34  ;;  %v1777_v36 = vsel %vm1561_vm11, %v3637_v26, %v1741_v56  ;;  %v1667_v30 = vmul.f32 1.442695, %v1604_v49  ;;  %v3774_v22 = vadd.f32 %v3323_v23, %v1488_v3  ;;  %v3959_v26 = vld [vmem:[#allocation14_spill] sm:$0xff] }
 0x184   :  { %v1813_v42 = vmul.f32 1.050701, %v1777_v36  ;;  %v1491_v20 = vmax.f32 %v1419_v10, %v1455_v53  ;;  %v1490_v11 = vmax.f32 %v1418_v4, %v1454_v39  ;;  %v2522_v6 = vpop.eup %2521  ;;  %v1744_v60 = vmul.f32 1.6732632, %v2039_v12  ;;  %v3962_v10 = vld [vmem:[#allocation17_spill] sm:$0xff]  ;;  %v3964_v53 = vld [vmem:[#allocation19_spill] sm:$0xff] }
 0x185   :  { %1851 = vst.msk [vmem:[%s3923_s3 + $0xa8] sm:$0xff] %vm1829_vm4, %v1814_v27  ;;  %2527 = vpow2.f32 %v1667_v30  ;;  %v1421_v40 = vmax.f32 %v3958_v9, %v3646_v59  ;;  %v1457_v33 = vmax.f32 %v3959_v26, %v3648_v48  ;;  %vm1564_vm12 = vcmp.gt.f32.partialorder %v3668_v51, 0.0  ;;  %v3960_v48 = vld [vmem:[#allocation15_spill] sm:$0xff] }
 0x186   :  { %1850 = vst.msk [vmem:[%s3923_s3 + $0xa0] sm:$0xff] %vm1829_vm4, %v1813_v42  ;;  %v2038_v7 = vadd.f32 -1.0, %v2522_v6  ;;  %v1603_v16 = vmin.f32 %v3774_v22, 0.0  ;;  %v3791_v25 = vadd.f32 %v3323_v23, %v1491_v20  ;;  %v1780_v43 = vsel %vm1564_vm12, %v3668_v51, %v1744_v60  ;;  %v3966_v6 = vld [vmem:[#allocation21_spill] sm:$0xff] }
 0x187   :  { %v3795_v59 = vadd.f32 %v3323_v23, %v1490_v11  ;;  %v1493_v44 = vmax.f32 %v1421_v40, %v1457_v33  ;;  %v1420_v14 = vmax.f32 %v3960_v48, %v3654_v29  ;;  %v1816_v45 = vmul.f32 1.050701, %v1780_v43  ;;  %v3968_v40 = vld [vmem:[#allocation23_spill] sm:$0xff] }
 0x188   :  { %v1743_v15 = vmul.f32 1.6732632, %v2038_v7  ;;  %v1665_v17 = vmul.f32 1.442695, %v1603_v16  ;;  %v1456_v0 = vmax.f32 %v3961_v18, %v3656_v13  ;;  %vm1563_vm13 = vcmp.gt.f32.partialorder %v3690_v21, 0.0 }
 0x189   :  { %v1606_v41 = vmin.f32 %v3791_v25, 0.0  ;;  %v1605_v46 = vmin.f32 %v3795_v59, 0.0  ;;  %1853 = vst.msk [vmem:[%s3923_s3 + $0xb8] sm:$0xff] %vm1829_vm4, %v1816_v45  ;;  %v3810_v58 = vadd.f32 %v3323_v23, %v1493_v44  ;;  %v1423_v35 = vmax.f32 %v3962_v10, %v3670_v52 }
 0x18a   :  { %v2524_v51 = vpop.eup %2523  ;;  %v1779_v29 = vsel %vm1563_vm13, %v3690_v21, %v1743_v15  ;;  %2529 = vpow2.f32 %v1665_v17  ;;  %v1492_v31 = vmax.f32 %v1420_v14, %v1456_v0  ;;  %vm1566_vm14 = vcmp.gt.f32.partialorder %v3724_v55, 0.0 }
 0x18b   :  { %v2526_v13 = vpop.eup %2525  ;;  %v1815_v50 = vmul.f32 1.050701, %v1779_v29  ;;  %v2041_v8 = vadd.f32 -1.0, %v2524_v51  ;;  %v1671_v54 = vmul.f32 1.442695, %v1606_v41  ;;  %v1608_v49 = vmin.f32 %v3810_v58, 0.0 }
 0x18c   :  { %v2040_v2 = vadd.f32 -1.0, %v2526_v13  ;;  %v1669_v56 = vmul.f32 1.442695, %v1605_v46  ;;  %v3821_v3 = vadd.f32 %v3323_v23, %v1492_v31  ;;  %v1459_v34 = vmax.f32 %v3963_v57, %v3674_v37 }
 0x18d   :  { %1852 = vst.msk [vmem:[%s3923_s3 + $0xb0] sm:$0xff] %vm1829_vm4, %v1815_v50  ;;  %v1746_v21 = vmul.f32 1.6732632, %v2041_v8  ;;  %2531 = vpow2.f32 %v1671_v54  ;;  %v1675_v1 = vmul.f32 1.442695, %v1608_v49  ;;  %v1422_v5 = vmax.f32 %v3964_v53, %v3676_v62  ;;  %v3965_v62 = vld [vmem:[#allocation20_spill] sm:$0xff] }
 0x18e   :  { %v1745_v52 = vmul.f32 1.6732632, %v2040_v2  ;;  %2533 = vpow2.f32 %v1669_v56  ;;  %vm1565_vm15 = vcmp.gt.f32.partialorder %v3727_v28, 0.0  ;;  %v1607_v39 = vmin.f32 %v3821_v3, 0.0 }
 0x18f   :  { %v2528_v4 = vpop.eup %2527  ;;  %v1782_v38 = vsel %vm1566_vm14, %v3724_v55, %v1746_v21  ;;  %v1495_v27 = vmax.f32 %v1423_v35, %v1459_v34  ;;  %2535 = vpow2.f32 %v1675_v1  ;;  %v1458_v11 = vmax.f32 %v3965_v62, %v3684_v63 }
 0x190   :  { %v1818_v36 = vmul.f32 1.050701, %v1782_v38  ;;  %v1781_v12 = vsel %vm1565_vm15, %v3727_v28, %v1745_v52  ;;  %v2043_v30 = vadd.f32 -1.0, %v2528_v4  ;;  %v1673_v42 = vmul.f32 1.442695, %v1607_v39  ;;  %v3967_v28 = vld [vmem:[#allocation22_spill] sm:$0xff] }
 0x191   :  { %v1817_v37 = vmul.f32 1.050701, %v1781_v12  ;;  %v3832_v20 = vadd.f32 %v3323_v23, %v1495_v27  ;;  %v1425_v60 = vmax.f32 %v3966_v6, %v3701_v24  ;;  %v1461_v9 = vmax.f32 %v3967_v28, %v3703_v19  ;;  %v3969_v19 = vld [vmem:[#allocation24_spill] sm:$0xff] }
 0x192   :  { %1855 = vst.msk [vmem:[%s3923_s3 + $0xc8] sm:$0xff] %vm1829_vm4, %v1818_v36  ;;  %v1748_v55 = vmul.f32 1.6732632, %v2043_v30  ;;  %v1424_v26 = vmax.f32 %v3968_v40, %v3707_v47  ;;  %vm1568_vm0 = vcmp.gt.f32.partialorder %v3746_v61, 0.0  ;;  %2537 = vpow2.f32 %v1673_v42 }
 0x193   :  { %1854 = vst.msk [vmem:[%s3923_s3 + $0xc0] sm:$0xff] %vm1829_vm4, %v1817_v37  ;;  %v1610_v63 = vmin.f32 %v3832_v20, 0.0  ;;  %v1494_v33 = vmax.f32 %v1422_v5, %v1458_v11  ;;  %v1497_v16 = vmax.f32 %v1425_v60, %v1461_v9  ;;  %v1460_v43 = vmax.f32 %v3969_v19, %v3713_v32 }
 0x194   :  { %v2530_v7 = vpop.eup %2529  ;;  %v1784_v24 = vsel %vm1568_vm0, %v3746_v61, %v1748_v55  ;;  %vm1567_vm1 = vcmp.gt.f32.partialorder %v3774_v22, 0.0  ;;  %vm1570_vm2 = vcmp.gt.f32.partialorder %v3791_v25, 0.0  ;;  %vm1569_vm3 = vcmp.gt.f32.partialorder %v3795_v59, 0.0 }
 0x195   :  { %v1820_v44 = vmul.f32 1.050701, %v1784_v24  ;;  %v2042_v47 = vadd.f32 -1.0, %v2530_v7  ;;  %v1679_v48 = vmul.f32 1.442695, %v1610_v63  ;;  %v3856_v14 = vadd.f32 %v3323_v23, %v1494_v33 }
 0x196   :  { %v3859_v45 = vadd.f32 %v3323_v23, %v1497_v16  ;;  %v1496_v15 = vmax.f32 %v1424_v26, %v1460_v43  ;;  %vm1572_vm5 = vcmp.gt.f32.partialorder %v3810_v58, 0.0  ;;  %vm1571_vm6 = vcmp.gt.f32.partialorder %v3821_v3, 0.0 }
 0x197   :  { %v2532_v17 = vpop.eup %2531  ;;  %1857 = vst.msk [vmem:[%s3923_s3 + $0xd8] sm:$0xff] %vm1829_vm4, %v1820_v44  ;;  %v1747_v61 = vmul.f32 1.6732632, %v2042_v47  ;;  %2539 = vpow2.f32 %v1679_v48  ;;  %v1609_v32 = vmin.f32 %v3856_v14, 0.0  ;;  %vm1574_vm7 = vcmp.gt.f32.partialorder %v3832_v20, 0.0 }
 0x198   :  { %v2534_v18 = vpop.eup %2533  ;;  %v2045_v0 = vadd.f32 -1.0, %v2532_v17  ;;  %v1612_v41 = vmin.f32 %v3859_v45, 0.0  ;;  %v1539_v46 = vadd.f32 %v3323_v23, %v1496_v15  ;;  %vm1573_vm8 = vcmp.gt.f32.partialorder %v3856_v14, 0.0 }
 0x199   :  { %v1783_v51 = vsel %vm1567_vm1, %v3774_v22, %v1747_v61  ;;  %v2044_v29 = vadd.f32 -1.0, %v2534_v18  ;;  %v1677_v31 = vmul.f32 1.442695, %v1609_v32  ;;  %v2536_v13 = vpop.eup %2535  ;;  %vm1576_vm9 = vcmp.gt.f32.partialorder %v3859_v45, 0.0 }
 0x19a   :  { %v1819_v50 = vmul.f32 1.050701, %v1783_v51  ;;  %v1750_v8 = vmul.f32 1.6732632, %v2045_v0  ;;  %v1683_v54 = vmul.f32 1.442695, %v1612_v41 }
 0x19b   :  { %v1749_v10 = vmul.f32 1.6732632, %v2044_v29  ;;  %v2047_v35 = vadd.f32 -1.0, %v2536_v13  ;;  %2541 = vpow2.f32 %v1677_v31  ;;  %v1611_v22 = vmin.f32 %v1539_v46, 0.0 }
 0x19c   :  { %1856 = vst.msk [vmem:[%s3923_s3 + $0xd0] sm:$0xff] %vm1829_vm4, %v1819_v50  ;;  %v1786_v23 = vsel %vm1570_vm2, %v3791_v25, %v1750_v8  ;;  %2543 = vpow2.f32 %v1683_v54  ;;  %v2538_v2 = vpop.eup %2537  ;;  %vm1575_vm10 = vcmp.gt.f32.partialorder %v1539_v46, 0.0 }
 0x19d   :  { %v1822_v56 = vmul.f32 1.050701, %v1786_v23  ;;  %v1785_v49 = vsel %vm1569_vm3, %v3795_v59, %v1749_v10  ;;  %v1752_v21 = vmul.f32 1.6732632, %v2047_v35  ;;  %v2046_v34 = vadd.f32 -1.0, %v2538_v2 }
 0x19e   :  { %v1821_v57 = vmul.f32 1.050701, %v1785_v49  ;;  %v1681_v52 = vmul.f32 1.442695, %v1611_v22 }
 0x19f   :  { %1859 = vst.msk [vmem:[%s3923_s3 + $0xe8] sm:$0xff] %vm1829_vm4, %v1822_v56  ;;  %v1788_v25 = vsel %vm1572_vm5, %v3810_v58, %v1752_v21  ;;  %v1751_v59 = vmul.f32 1.6732632, %v2046_v34 }
 0x1a0   :  { %1858 = vst.msk [vmem:[%s3923_s3 + $0xe0] sm:$0xff] %vm1829_vm4, %v1821_v57  ;;  %v1824_v1 = vmul.f32 1.050701, %v1788_v25  ;;  %2545 = vpow2.f32 %v1681_v52 }
 0x1a1   :  { %v2540_v53 = vpop.eup %2539  ;;  %v1787_v5 = vsel %vm1571_vm6, %v3821_v3, %v1751_v59 }
 0x1a2   :  { %1861 = vst.msk [vmem:[%s3923_s3 + $0xf8] sm:$0xff] %vm1829_vm4, %v1824_v1  ;;  %v2049_v4 = vadd.f32 -1.0, %v2540_v53  ;;  %v1823_v58 = vmul.f32 1.050701, %v1787_v5 }
 0x1a4   :  { %v1754_v38 = vmul.f32 1.6732632, %v2049_v4  ;;  %1860 = vst.msk [vmem:[%s3923_s3 + $0xf0] sm:$0xff] %vm1829_vm4, %v1823_v58 }
 0x1a5   :  { %v2542_v39 = vpop.eup %2541 }
 0x1a6   :  { %v2544_v27 = vpop.eup %2543  ;;  %v1790_v36 = vsel %vm1574_vm7, %v3832_v20, %v1754_v38  ;;  %v2048_v12 = vadd.f32 -1.0, %v2542_v39 }
 0x1a7   :  { %v1826_v30 = vmul.f32 1.050701, %v1790_v36  ;;  %v2051_v37 = vadd.f32 -1.0, %v2544_v27 }
 0x1a8   :  { %v1753_v42 = vmul.f32 1.6732632, %v2048_v12 }
 0x1a9   :  { %1863 = vst.msk [vmem:[%s3923_s3 + $0x108] sm:$0xff] %vm1829_vm4, %v1826_v30  ;;  %v1756_v3 = vmul.f32 1.6732632, %v2051_v37 }
 0x1aa   :  { %v2546_v62 = vpop.eup %2545  ;;  %v1789_v11 = vsel %vm1573_vm8, %v3856_v14, %v1753_v42 }
 0x1ab   :  { %v1825_v55 = vmul.f32 1.050701, %v1789_v11  ;;  %v1792_v20 = vsel %vm1576_vm9, %v3859_v45, %v1756_v3  ;;  %v2050_v6 = vadd.f32 -1.0, %v2546_v62 }
 0x1ac   :  { %v1828_v60 = vmul.f32 1.050701, %v1792_v20 }
 0x1ad   :  { %1862 = vst.msk [vmem:[%s3923_s3 + $0x100] sm:$0xff] %vm1829_vm4, %v1825_v55  ;;  %v1755_v28 = vmul.f32 1.6732632, %v2050_v6 }
 0x1ae   :  { %1865 = vst.msk [vmem:[%s3923_s3 + $0x118] sm:$0xff] %vm1829_vm4, %v1828_v60 }
 0x1af   :  { %v1791_v9 = vsel %vm1575_vm10, %v1539_v46, %v1755_v28 }
 0x1b0   :  { %v1827_v40 = vmul.f32 1.050701, %v1791_v9 }
 0x1b2   :  { %1864 = vst.msk [vmem:[%s3923_s3 + $0x110] sm:$0xff] %vm1829_vm4, %v1827_v40 }

// kernel: autoencoder_forward.4
= control target key start
LH: loop header
LB: loop body
LE: loop exit
PB: predicated region body
PF: predicated region fallthrough
CT: control target
= control target key end

     0   :  { %vm78_vm0 = vcmask 998400   ;;  %vm127_vm1 = vcmask 1041408   ;;  %vm500_vm2 = vmmov 1   ;;  %vm331_vm5 = vcmask 162816   ;;  %s748_s1 = inlined_call_operand.vmem [shape: f32[250,20], index: 1, kind: input, shape index: {}]   ;;  %s749_s0 = inlined_call_operand.vmem [shape: f32[128,250], index: 0, kind: input, shape index: {}]   ;;  %s750_s2 = inlined_call_operand.vmem [shape: f32[1,20], index: 2, kind: input, shape index: {}]   ;;  %s751_s3 = inlined_call_operand.vmem [shape: f32[32,20], index: 3, kind: output, shape index: {}]  }
   0x1   :  { %v62_v0 = vld [vmem:[%s748_s1 + $0x80] sm:$0xff]  ;;  %v63_v1 = vld [vmem:[%s748_s1 + $0x88] sm:$0xff]  ;;  %v64_v5 = vld [vmem:[%s748_s1 + $0x90] sm:$0xff] }
   0x2   :  { %v46_v2 = vld [vmem:[%s748_s1] sm:$0xff]  ;;  %v442_v3 = vpack.c.bf16 %v63_v1, %v62_v0  ;;  %v47_v4 = vld [vmem:[%s748_s1 + $0x8] sm:$0xff]  ;;  %v65_v6 = vld [vmem:[%s748_s1 + $0x98] sm:$0xff] }
   0x3   :  { %v444_v7 = vpack.c.bf16 %v47_v4, %v46_v2  ;;  %v446_v8 = vpack.c.bf16 %v65_v6, %v64_v5  ;;  %v48_v9 = vld [vmem:[%s748_s1 + $0x10] sm:$0xff]  ;;  %v49_v10 = vld [vmem:[%s748_s1 + $0x18] sm:$0xff]  ;;  %v66_v11 = vld [vmem:[%s748_s1 + $0xa0] sm:$0xff] }
   0x4   :  { %443 = vmatprep.subr.bf16.mxu0 %v442_v3  ;;  %475 = vmatprep.subr.bf16.mxu1 %v442_v3  ;;  %v67_v12 = vld [vmem:[%s748_s1 + $0xa8] sm:$0xff]  ;;  %v448_v13 = vpack.c.bf16 %v49_v10, %v48_v9  ;;  %v50_v15 = vld [vmem:[%s748_s1 + $0x20] sm:$0xff]  ;;  %v68_v17 = vld [vmem:[%s748_s1 + $0xb0] sm:$0xff] }
   0x5   :  { %445 = vmatpush3.bf16.msra.mxu0 %v444_v7  ;;  %483 = vmatpush3.bf16.msra.mxu1 %v444_v7  ;;  %v450_v14 = vpack.c.bf16 %v67_v12, %v66_v11  ;;  %v51_v16 = vld [vmem:[%s748_s1 + $0x28] sm:$0xff]  ;;  %v69_v18 = vld [vmem:[%s748_s1 + $0xb8] sm:$0xff]  ;;  %v52_v21 = vld [vmem:[%s748_s1 + $0x30] sm:$0xff] }
   0x6   :  { %447 = vmatprep.subr.bf16.mxu0 %v446_v8  ;;  %476 = vmatprep.subr.bf16.mxu1 %v446_v8  ;;  %v452_v19 = vpack.c.bf16 %v51_v16, %v50_v15  ;;  %v454_v20 = vpack.c.bf16 %v69_v18, %v68_v17  ;;  %v53_v22 = vld [vmem:[%s748_s1 + $0x38] sm:$0xff]  ;;  %v70_v23 = vld [vmem:[%s748_s1 + $0xc0] sm:$0xff]  ;;  %v71_v24 = vld [vmem:[%s748_s1 + $0xc8] sm:$0xff] }
   0x7   :  { %v15_v25 = vld [vmem:[%s749_s0 + $0x8] sm:$0xff]  ;;  %v456_v27 = vpack.c.bf16 %v53_v22, %v52_v21  ;;  %v458_v28 = vpack.c.bf16 %v71_v24, %v70_v23  ;;  %v54_v29 = vld [vmem:[%s748_s1 + $0x40] sm:$0xff]  ;;  %v72_v31 = vld [vmem:[%s748_s1 + $0xd0] sm:$0xff] }
   0x8   :  { %v31_v26 = vld [vmem:[%s749_s0 + $0x88] sm:$0xff]  ;;  %v73_v32 = vld [vmem:[%s748_s1 + $0xd8] sm:$0xff]  ;;  %341 = vmatprep.mubr.msk.f32.mxu0 %vm78_vm0, %v15_v25  ;;  %v56_v35 = vld [vmem:[%s748_s1 + $0x50] sm:$0xff] }
   0x9   :  { %449 = vmatpush3.bf16.msra.mxu0 %v448_v13  ;;  %484 = vmatpush3.bf16.msra.mxu1 %v448_v13  ;;  %v55_v30 = vld [vmem:[%s748_s1 + $0x48] sm:$0xff]  ;;  %v462_v34 = vpack.c.bf16 %v73_v32, %v72_v31  ;;  %v57_v36 = vld [vmem:[%s748_s1 + $0x58] sm:$0xff]  ;;  %v74_v37 = vld [vmem:[%s748_s1 + $0xe0] sm:$0xff] }
   0xa   :  { %451 = vmatprep.subr.bf16.mxu0 %v450_v14  ;;  %477 = vmatprep.subr.bf16.mxu1 %v450_v14  ;;  %v460_v33 = vpack.c.bf16 %v55_v30, %v54_v29  ;;  %v75_v38 = vld [vmem:[%s748_s1 + $0xe8] sm:$0xff]  ;;  %v464_v39 = vpack.c.bf16 %v57_v36, %v56_v35  ;;  %v58_v41 = vld [vmem:[%s748_s1 + $0x60] sm:$0xff]  ;;  %v76_v43 = vld [vmem:[%s748_s1 + $0xf0] sm:$0xff] }
   0xb   :  { %349 = vmatprep.mubr.msk.f32.mxu1 %vm78_vm0, %v31_v26  ;;  %v466_v40 = vpack.c.bf16 %v75_v38, %v74_v37  ;;  %v59_v42 = vld [vmem:[%s748_s1 + $0x68] sm:$0xff]  ;;  %v77_v44 = vld [vmem:[%s748_s1 + $0xf8] sm:$0x3]  ;;  %v60_v47 = vld [vmem:[%s748_s1 + $0x70] sm:$0xff] }
   0xc   :  { %v468_v45 = vpack.c.bf16 %v59_v42, %v58_v41  ;;  %v470_v46 = vpack.c.bf16 %v77_v44, %v76_v43  ;;  %v61_v48 = vld [vmem:[%s748_s1 + $0x78] sm:$0xff]  ;;  %vm471_vm3 = vmpackc.low %vm127_vm1, %vm500_vm2  ;;  %v14_v50 = vld [vmem:[%s749_s0] sm:$0xff] }
   0xd   :  { %453 = vmatpush3.bf16.msra.mxu0 %v452_v19  ;;  %485 = vmatpush3.bf16.msra.mxu1 %v452_v19  ;;  %v473_v49 = vpack.c.bf16 %v61_v48, %v60_v47  ;;  %v30_v51 = vld [vmem:[%s749_s0 + $0x80] sm:$0xff]  ;;  %v17_v52 = vld [vmem:[%s749_s0 + $0x18] sm:$0xff]  ;;  %v16_v54 = vld [vmem:[%s749_s0 + $0x10] sm:$0xff] }
   0xe   :  { %455 = vmatprep.subr.bf16.mxu0 %v454_v20  ;;  %478 = vmatprep.subr.bf16.mxu1 %v454_v20  ;;  %v33_v53 = vld [vmem:[%s749_s0 + $0x98] sm:$0xff]  ;;  %v32_v55 = vld [vmem:[%s749_s0 + $0x90] sm:$0xff]  ;;  %v19_v56 = vld [vmem:[%s749_s0 + $0x28] sm:$0xff] }
   0xf   :  { %v35_v57 = vld [vmem:[%s749_s0 + $0xa8] sm:$0xff]  ;;  %v18_v58 = vld [vmem:[%s749_s0 + $0x20] sm:$0xff]  ;;  %v21_v60 = vld [vmem:[%s749_s0 + $0x38] sm:$0xff] }
  0x10   :  { %v34_v59 = vld [vmem:[%s749_s0 + $0xa0] sm:$0xff]  ;;  %v37_v61 = vld [vmem:[%s749_s0 + $0xb8] sm:$0xff]  ;;  %v20_v62 = vld [vmem:[%s749_s0 + $0x30] sm:$0xff] }
  0x11   :  { %457 = vmatpush3.bf16.msra.mxu0 %v456_v27  ;;  %486 = vmatpush3.bf16.msra.mxu1 %v456_v27  ;;  %v36_v63 = vld [vmem:[%s749_s0 + $0xb0] sm:$0xff]  ;;  %v23_v0 = vld [vmem:[%s749_s0 + $0x48] sm:$0xff]  ;;  %v22_v2 = vld [vmem:[%s749_s0 + $0x40] sm:$0xff] }
  0x12   :  { %459 = vmatprep.subr.bf16.mxu0 %v458_v28  ;;  %479 = vmatprep.subr.bf16.mxu1 %v458_v28  ;;  %v39_v1 = vld [vmem:[%s749_s0 + $0xc8] sm:$0xff]  ;;  %v38_v3 = vld [vmem:[%s749_s0 + $0xc0] sm:$0xff]  ;;  %v25_v4 = vld [vmem:[%s749_s0 + $0x58] sm:$0xff] }
  0x13   :  { %v41_v5 = vld [vmem:[%s749_s0 + $0xd8] sm:$0xff]  ;;  %v24_v6 = vld [vmem:[%s749_s0 + $0x50] sm:$0xff]  ;;  %v27_v8 = vld [vmem:[%s749_s0 + $0x68] sm:$0xff] }
  0x14   :  { %v40_v7 = vld [vmem:[%s749_s0 + $0xd0] sm:$0xff]  ;;  %v43_v9 = vld [vmem:[%s749_s0 + $0xe8] sm:$0xff]  ;;  %v26_v10 = vld [vmem:[%s749_s0 + $0x60] sm:$0xff] }
  0x15   :  { %461 = vmatpush3.bf16.msra.mxu0 %v460_v33  ;;  %487 = vmatpush3.bf16.msra.mxu1 %v460_v33  ;;  %v42_v11 = vld [vmem:[%s749_s0 + $0xe0] sm:$0xff]  ;;  %v29_v12 = vld [vmem:[%s749_s0 + $0x78] sm:$0xff]  ;;  %v28_v14 = vld [vmem:[%s749_s0 + $0x70] sm:$0xff] }
  0x16   :  { %463 = vmatprep.subr.bf16.mxu0 %v462_v34  ;;  %480 = vmatprep.subr.bf16.mxu1 %v462_v34  ;;  %v45_v13 = vld [vmem:[%s749_s0 + $0xf8] sm:$0xff]  ;;  %v44_v15 = vld [vmem:[%s749_s0 + $0xf0] sm:$0xff] }
  0x19   :  { %465 = vmatpush3.bf16.msra.mxu0 %v464_v39  ;;  %488 = vmatpush3.bf16.msra.mxu1 %v464_v39 }
  0x1a   :  { %467 = vmatprep.subr.bf16.mxu0 %v466_v40  ;;  %481 = vmatprep.subr.bf16.mxu1 %v466_v40 }
  0x1d   :  { %469 = vmatpush3.bf16.msra.mxu0 %v468_v45  ;;  %489 = vmatpush3.bf16.msra.mxu1 %v468_v45 }
  0x1e   :  { %472 = vmatprep.subr.msk.bf16.mxu0 %vm471_vm3, %v470_v46  ;;  %482 = vmatprep.subr.msk.bf16.mxu1 %vm471_vm3, %v470_v46 }
  0x21   :  { %474 = vmatpush3.bf16.msra.mxu0 %v473_v49  ;;  %490 = vmatpush3.bf16.msra.mxu1 %v473_v49 }
  0x24   :  { %196 = vmatmul.mubr.f32.vlgmr.msra.gmra.mrb[0].mxu0 %v14_v50  ;;  %236 = vmatmul.mubr.f32.vlgmr.msra.gmra.mrb[0].mxu1 %v30_v51  ;;  %v357_v50 = vld [vmem:[%s750_s2] ss:$0 sm:$0xff] }
  0x25   :  { %342 = vmatprep.mubr.msk.f32.mxu0 %vm78_vm0, %v17_v52  ;;  %350 = vmatprep.mubr.msk.f32.mxu1 %vm78_vm0, %v33_v53 }
  0x28   :  { %201 = vmatmul.mubr.f32.gmra.mrb[2].mxu0 %v16_v54  ;;  %241 = vmatmul.mubr.f32.gmra.mrb[2].mxu1 %v32_v55 }
  0x29   :  { %343 = vmatprep.mubr.msk.f32.mxu0 %vm78_vm0, %v19_v56  ;;  %351 = vmatprep.mubr.msk.f32.mxu1 %vm78_vm0, %v35_v57 }
  0x2c   :  { %206 = vmatmul.mubr.f32.gmra.mrb[4].mxu0 %v18_v58  ;;  %246 = vmatmul.mubr.f32.gmra.mrb[4].mxu1 %v34_v59 }
  0x2d   :  { %344 = vmatprep.mubr.msk.f32.mxu0 %vm78_vm0, %v21_v60  ;;  %352 = vmatprep.mubr.msk.f32.mxu1 %vm78_vm0, %v37_v61 }
  0x30   :  { %211 = vmatmul.mubr.f32.gmra.mrb[6].mxu0 %v20_v62  ;;  %251 = vmatmul.mubr.f32.gmra.mrb[6].mxu1 %v36_v63 }
  0x31   :  { %345 = vmatprep.mubr.msk.f32.mxu0 %vm78_vm0, %v23_v0  ;;  %353 = vmatprep.mubr.msk.f32.mxu1 %vm78_vm0, %v39_v1 }
  0x34   :  { %216 = vmatmul.mubr.f32.gmra.mrb[8].mxu0 %v22_v2  ;;  %256 = vmatmul.mubr.f32.gmra.mrb[8].mxu1 %v38_v3 }
  0x35   :  { %346 = vmatprep.mubr.msk.f32.mxu0 %vm78_vm0, %v25_v4  ;;  %354 = vmatprep.mubr.msk.f32.mxu1 %vm78_vm0, %v41_v5 }
  0x38   :  { %221 = vmatmul.mubr.f32.gmra.mrb[10].mxu0 %v24_v6  ;;  %261 = vmatmul.mubr.f32.gmra.mrb[10].mxu1 %v40_v7 }
  0x39   :  { %347 = vmatprep.mubr.msk.f32.mxu0 %vm78_vm0, %v27_v8  ;;  %355 = vmatprep.mubr.msk.f32.mxu1 %vm78_vm0, %v43_v9 }
  0x3c   :  { %226 = vmatmul.mubr.f32.gmra.mrb[12].mxu0 %v26_v10  ;;  %266 = vmatmul.mubr.f32.gmra.mrb[12].mxu1 %v42_v11 }
  0x3d   :  { %348 = vmatprep.mubr.msk.f32.mxu0 %vm78_vm0, %v29_v12  ;;  %356 = vmatprep.mubr.msk.f32.mxu1 %vm78_vm0, %v45_v13 }
  0x40   :  { %231 = vmatmul.mubr.f32.gmra.mrb[14].mxu0 %v28_v14  ;;  %271 = vmatmul.mubr.f32.gmra.mrb[14].mxu1 %v44_v15 }
  0xf7   :  { %v394_v16 = vpop.f32.mrb[0].mxu0  ;;  %v418_v17 = vpop.f32.mrb[0].mxu1 }
  0xf8   :  { %v395_v18 = vpop.f32.mrb[1].mxu0  ;;  %v419_v19 = vpop.f32.mrb[1].mxu1 }
  0xf9   :  { %v396_v20 = vadd.f32 %v395_v18, %v394_v16  ;;  %v420_v21 = vadd.f32 %v419_v19, %v418_v17 }
  0xfb   :  { %v397_v22 = vpop.f32.mrb[2].mxu0  ;;  %v421_v23 = vpop.f32.mrb[2].mxu1 }
  0xfc   :  { %v398_v24 = vpop.f32.mrb[3].mxu0  ;;  %v422_v25 = vpop.f32.mrb[3].mxu1 }
  0xfd   :  { %v399_v26 = vadd.f32 %v398_v24, %v397_v22  ;;  %v423_v27 = vadd.f32 %v422_v25, %v421_v23 }
  0xff   :  { %v400_v28 = vpop.f32.mrb[4].mxu0  ;;  %v424_v29 = vpop.f32.mrb[4].mxu1 }
 0x100   :  { %v401_v30 = vpop.f32.mrb[5].mxu0  ;;  %v425_v31 = vpop.f32.mrb[5].mxu1 }
 0x101   :  { %v402_v32 = vadd.f32 %v401_v30, %v400_v28  ;;  %v426_v33 = vadd.f32 %v425_v31, %v424_v29 }
 0x103   :  { %v403_v34 = vpop.f32.mrb[6].mxu0  ;;  %v427_v35 = vpop.f32.mrb[6].mxu1 }
 0x104   :  { %v404_v36 = vpop.f32.mrb[7].mxu0  ;;  %v428_v37 = vpop.f32.mrb[7].mxu1 }
 0x105   :  { %v405_v38 = vadd.f32 %v404_v36, %v403_v34  ;;  %v429_v39 = vadd.f32 %v428_v37, %v427_v35 }
 0x107   :  { %v406_v40 = vpop.f32.mrb[8].mxu0  ;;  %v430_v41 = vpop.f32.mrb[8].mxu1 }
 0x108   :  { %v407_v42 = vpop.f32.mrb[9].mxu0  ;;  %v431_v43 = vpop.f32.mrb[9].mxu1 }
 0x109   :  { %v408_v44 = vadd.f32 %v407_v42, %v406_v40  ;;  %v432_v45 = vadd.f32 %v431_v43, %v430_v41 }
 0x10b   :  { %v276_v46 = vmax.f32 %v396_v20, %v408_v44  ;;  %v280_v47 = vmax.f32 %v420_v21, %v432_v45  ;;  %v409_v48 = vpop.f32.mrb[10].mxu0  ;;  %v433_v49 = vpop.f32.mrb[10].mxu1 }
 0x10c   :  { %v410_v51 = vpop.f32.mrb[11].mxu0  ;;  %v434_v52 = vpop.f32.mrb[11].mxu1 }
 0x10d   :  { %v284_v53 = vmax.f32 %v276_v46, %v280_v47  ;;  %v411_v54 = vadd.f32 %v410_v51, %v409_v48  ;;  %v435_v55 = vadd.f32 %v434_v52, %v433_v49 }
 0x10f   :  { %v295_v56 = vadd.f32 %v357_v50, %v284_v53  ;;  %v277_v57 = vmax.f32 %v399_v26, %v411_v54  ;;  %v281_v58 = vmax.f32 %v423_v27, %v435_v55  ;;  %v412_v59 = vpop.f32.mrb[12].mxu0  ;;  %v436_v60 = vpop.f32.mrb[12].mxu1 }
 0x110   :  { %v413_v61 = vpop.f32.mrb[13].mxu0  ;;  %v437_v62 = vpop.f32.mrb[13].mxu1 }
 0x111   :  { %v303_v63 = vmin.f32 %v295_v56, 0.0  ;;  %v285_v0 = vmax.f32 %v277_v57, %v281_v58  ;;  %v414_v1 = vadd.f32 %v413_v61, %v412_v59  ;;  %v438_v2 = vadd.f32 %v437_v62, %v436_v60 }
 0x112   :  { %vm299_vm4 = vcmp.gt.f32.partialorder %v295_v56, 0.0 }
 0x113   :  { %v307_v3 = vmul.f32 1.442695, %v303_v63  ;;  %v296_v4 = vadd.f32 %v357_v50, %v285_v0  ;;  %v278_v5 = vmax.f32 %v402_v32, %v414_v1  ;;  %v415_v6 = vpop.f32.mrb[14].mxu0  ;;  %v439_v7 = vpop.f32.mrb[14].mxu1  ;;  %v282_v8 = vmax.f32 %v426_v33, %v438_v2 }
 0x114   :  { %v416_v9 = vpop.f32.mrb[15].mxu0  ;;  %v440_v10 = vpop.f32.mrb[15].mxu1 }
 0x115   :  { %492 = vpow2.f32 %v307_v3  ;;  %v304_v11 = vmin.f32 %v296_v4, 0.0  ;;  %v417_v12 = vadd.f32 %v416_v9, %v415_v6  ;;  %v286_v13 = vmax.f32 %v278_v5, %v282_v8 }
 0x116   :  { %v441_v14 = vadd.f32 %v440_v10, %v439_v7  ;;  %vm300_vm6 = vcmp.gt.f32.partialorder %v296_v4, 0.0 }
 0x117   :  { %v309_v15 = vmul.f32 1.442695, %v304_v11  ;;  %v279_v16 = vmax.f32 %v405_v38, %v417_v12  ;;  %v297_v17 = vadd.f32 %v357_v50, %v286_v13 }
 0x118   :  { %v283_v18 = vmax.f32 %v429_v39, %v441_v14 }
 0x119   :  { %494 = vpow2.f32 %v309_v15  ;;  %v305_v19 = vmin.f32 %v297_v17, 0.0  ;;  %vm301_vm7 = vcmp.gt.f32.partialorder %v297_v17, 0.0 }
 0x11a   :  { %v287_v20 = vmax.f32 %v279_v16, %v283_v18 }
 0x11b   :  { %v311_v21 = vmul.f32 1.442695, %v305_v19 }
 0x11c   :  { %v298_v22 = vadd.f32 %v357_v50, %v287_v20 }
 0x11d   :  { %496 = vpow2.f32 %v311_v21 }
 0x11e   :  { %v306_v23 = vmin.f32 %v298_v22, 0.0  ;;  %vm302_vm8 = vcmp.gt.f32.partialorder %v298_v22, 0.0 }
 0x11f   :  { %v493_v24 = vpop.eup %492 }
 0x120   :  { %v358_v25 = vadd.f32 -1.0, %v493_v24  ;;  %v313_v26 = vmul.f32 1.442695, %v306_v23 }
 0x122   :  { %v319_v27 = vmul.f32 1.6732632, %v358_v25  ;;  %498 = vpow2.f32 %v313_v26 }
 0x123   :  { %v495_v28 = vpop.eup %494 }
 0x124   :  { %v323_v29 = vsel %vm299_vm4, %v295_v56, %v319_v27  ;;  %v359_v30 = vadd.f32 -1.0, %v495_v28 }
 0x125   :  { %v327_v31 = vmul.f32 1.050701, %v323_v29 }
 0x126   :  { %v320_v32 = vmul.f32 1.6732632, %v359_v30 }
 0x127   :  { %332 = vst.msk [vmem:[%s751_s3] sm:$0xff] %vm331_vm5, %v327_v31  ;;  %v497_v33 = vpop.eup %496 }
 0x128   :  { %v324_v34 = vsel %vm300_vm6, %v296_v4, %v320_v32  ;;  %v360_v36 = vadd.f32 -1.0, %v497_v33 }
 0x129   :  { %v328_v35 = vmul.f32 1.050701, %v324_v34 }
 0x12a   :  { %v321_v37 = vmul.f32 1.6732632, %v360_v36 }
 0x12b   :  { %333 = vst.msk [vmem:[%s751_s3 + $0x8] sm:$0xff] %vm331_vm5, %v328_v35 }
 0x12c   :  { %v499_v38 = vpop.eup %498  ;;  %v325_v39 = vsel %vm301_vm7, %v297_v17, %v321_v37 }
 0x12d   :  { %v361_v40 = vadd.f32 -1.0, %v499_v38  ;;  %v329_v41 = vmul.f32 1.050701, %v325_v39 }
 0x12f   :  { %v322_v42 = vmul.f32 1.6732632, %v361_v40  ;;  %334 = vst.msk [vmem:[%s751_s3 + $0x10] sm:$0xff] %vm331_vm5, %v329_v41 }
 0x131   :  { %v326_v43 = vsel %vm302_vm8, %v298_v22, %v322_v42 }
 0x132   :  { %v330_v44 = vmul.f32 1.050701, %v326_v43 }
 0x134   :  { %335 = vst.msk [vmem:[%s751_s3 + $0x18] sm:$0xff] %vm331_vm5, %v330_v44 }

// kernel: autoencoder_forward.5
= control target key start
LH: loop header
LB: loop body
LE: loop exit
PB: predicated region body
PF: predicated region fallthrough
CT: control target
= control target key end

     0   :  { %v88_v3 = vlaneseq  ;;  %v1419_v8 = vmov 0.0|0.0   ;;  %v1420_v9 = vmov 1983009808   ;;  %vm1421_vm0 = vmmov 0   ;;  %s2155_s0 = inlined_call_operand.vmem [shape: f32[2,320], index: 0, kind: input, shape index: {}]   ;;  %s2156_s1 = inlined_call_operand.vmem [shape: f32[320,50], index: 1, kind: input, shape index: {}]   ;;  %s2157_s2 = inlined_call_operand.vmem [shape: f32[1,50], index: 2, kind: input, shape index: {}]   ;;  %s2158_s3 = inlined_call_operand.vmem [shape: f32[50,16], index: 3, kind: input, shape index: {}]   ;;  %s2159_s4 = inlined_call_operand.vmem [shape: f32[1,16], index: 4, kind: input, shape index: {}]   ;;  %s2160_s5 = inlined_call_operand.vmem [shape: f32[16,160], index: 5, kind: input, shape index: {}]   ;;  %s2161_s6 = inlined_call_operand.vmem [shape: f32[1,160], index: 6, kind: input, shape index: {}]   ;;  %s2162_s7 = inlined_call_operand.vmem [shape: f32[160,784], index: 7, kind: input, shape index: {}]   ;;  %s2163_s8 = inlined_call_operand.vmem [shape: f32[1,784], index: 8, kind: input, shape index: {}]   ;;  %s2164_s9 = inlined_call_operand.vmem [shape: f32[2,784], index: 9, kind: output, shape index: {0}]   ;;  %s2165_s10 = inlined_call_operand.hbm [shape: f32[2,16], index: 10, kind: output, shape index: {1}]  }
   0x1   :  { %v52_v0 = vld [vmem:[%s2156_s1 + $0x80] sm:$0xff]  ;;  %v53_v1 = vld [vmem:[%s2156_s1 + $0x88] sm:$0xff]  ;;  %v54_v6 = vld [vmem:[%s2156_s1 + $0x90] sm:$0xff]  ;;  %1180 = vmatprep.subr.bf16.mxu1 %v1419_v8  ;;  %v86_v10 = vunpack.c.l.s4 %v1420_v9  ;;  %v1422_v16 = vmov 0.0  }
   0x2   :  { %v36_v2 = vld [vmem:[%s2156_s1] sm:$0xff]  ;;  %v1148_v4 = vpack.c.bf16 %v53_v1, %v52_v0  ;;  %v37_v5 = vld [vmem:[%s2156_s1 + $0x8] sm:$0xff]  ;;  %v55_v7 = vld [vmem:[%s2156_s1 + $0x98] sm:$0xff]  ;;  %1128 = vmatprep.mubr.msk.f32.mxu1 %vm1421_vm0, %v1422_v16  ;;  %v1518_v23 = vshrl.u32 %v88_v3, 7 }
   0x3   :  { %v1150_v11 = vpack.c.bf16 %v37_v5, %v36_v2  ;;  %v1152_v12 = vpack.c.bf16 %v55_v7, %v54_v6  ;;  %v38_v13 = vld [vmem:[%s2156_s1 + $0x10] sm:$0xff]  ;;  %v39_v14 = vld [vmem:[%s2156_s1 + $0x18] sm:$0xff]  ;;  %v56_v15 = vld [vmem:[%s2156_s1 + $0xa0] sm:$0xff]  ;;  %v87_v22 = vunpack.c.0.s8 %v86_v10 }
   0x4   :  { %1149 = vmatprep.subr.bf16.mxu0 %v1148_v4  ;;  %v57_v17 = vld [vmem:[%s2156_s1 + $0xa8] sm:$0xff]  ;;  %v1154_v18 = vpack.c.bf16 %v39_v14, %v38_v13  ;;  %v40_v20 = vld [vmem:[%s2156_s1 + $0x20] sm:$0xff]  ;;  %v58_v24 = vld [vmem:[%s2156_s1 + $0xb0] sm:$0xff] }
   0x5   :  { %1151 = vmatpush3.bf16.msra.mxu0 %v1150_v11  ;;  %v1156_v19 = vpack.c.bf16 %v57_v17, %v56_v15  ;;  %v41_v21 = vld [vmem:[%s2156_s1 + $0x28] sm:$0xff]  ;;  %v59_v25 = vld [vmem:[%s2156_s1 + $0xb8] sm:$0xff]  ;;  %v68_v27 = vld [vmem:[%s2156_s1 + $0x100] sm:$0xff]  ;;  %v1542_v34 = vsub.s32 %v87_v22, %v1518_v23 }
   0x6   :  { %1153 = vmatprep.subr.bf16.mxu0 %v1152_v12  ;;  %v1158_v26 = vpack.c.bf16 %v41_v21, %v40_v20  ;;  %v69_v28 = vld [vmem:[%s2156_s1 + $0x108] sm:$0xff]  ;;  %v1160_v29 = vpack.c.bf16 %v59_v25, %v58_v24  ;;  %v42_v30 = vld [vmem:[%s2156_s1 + $0x30] sm:$0xff]  ;;  %v43_v31 = vld [vmem:[%s2156_s1 + $0x38] sm:$0xff] }
   0x7   :  { %v60_v32 = vld [vmem:[%s2156_s1 + $0xc0] sm:$0xff]  ;;  %v1181_v33 = vpack.c.bf16 %v69_v28, %v68_v27  ;;  %v61_v35 = vld [vmem:[%s2156_s1 + $0xc8] sm:$0xff]  ;;  %v70_v36 = vld [vmem:[%s2156_s1 + $0x110] sm:$0xff]  ;;  %v1162_v39 = vpack.c.bf16 %v43_v31, %v42_v30 }
   0x8   :  { %v71_v37 = vld [vmem:[%s2156_s1 + $0x118] sm:$0xff]  ;;  %v72_v40 = vld [vmem:[%s2156_s1 + $0x120] sm:$0xff]  ;;  %v73_v41 = vld [vmem:[%s2156_s1 + $0x128] sm:$0xff]  ;;  %v1164_v43 = vpack.c.bf16 %v61_v35, %v60_v32 }
   0x9   :  { %1155 = vmatpush3.bf16.msra.mxu0 %v1154_v18  ;;  %1182 = vmatpush3.bf16.msra.mxu1 %v1181_v33  ;;  %v1184_v38 = vpack.c.bf16 %v71_v37, %v70_v36  ;;  %v35_v42 = vld [vmem:[%s2155_s0] sm:$0x3f]  ;;  %v45_v45 = vld [vmem:[%s2156_s1 + $0x48] sm:$0xff] }
   0xa   :  { %1157 = vmatprep.subr.bf16.mxu0 %v1156_v19  ;;  %1183 = vmatprep.subr.bf16.mxu1 %v1419_v8  ;;  %v44_v44 = vld [vmem:[%s2156_s1 + $0x40] sm:$0xff]  ;;  %v91_v46 = vrot.slane %v35_v42, %v1542_v34 }
   0xd   :  { %1159 = vmatpush3.bf16.msra.mxu0 %v1158_v26 }
   0xe   :  { %1161 = vmatprep.subr.bf16.mxu0 %v1160_v29 }
   0xf   :  { %16 = vsyncpa [#allocation3], 0  ;;  %v62_v47 = vld [vmem:[%s2156_s1 + $0xd0] sm:$0xff]  ;;  %v63_v48 = vld [vmem:[%s2156_s1 + $0xd8] sm:$0xff]  ;;  %1185 = vmatpush3.bf16.msra.mxu1 %v1184_v38  ;;  %v1187_v49 = vpack.c.bf16 %v73_v41, %v72_v40  ;;  %v99_v50 = vcombine.high %v91_v46, %v91_v46  ;;  %v1166_v51 = vpack.c.bf16 %v45_v45, %v44_v44  ;;  %v84_v59 = vcombine.high %v35_v42, %v35_v42  ;;  %s1423_s0 = smov [#allocation2]  }
  0x10   :  { %1186 = vmatprep.subr.bf16.mxu1 %v1419_v8  ;;  %v74_v52 = vld [vmem:[%s2156_s1 + $0x130] sm:$0xff]  ;;  %v75_v53 = vld [vmem:[%s2156_s1 + $0x138] sm:$0xff]  ;;  %v1168_v54 = vpack.c.bf16 %v63_v48, %v62_v47  ;;  %v64_v57 = vld [vmem:[%s2156_s1 + $0xe0] sm:$0xff]  ;;  %vm102_vm1 = vcmask 523264   ;;  %vm271_vm2 = vcmask 1041408   ;;  %vm267_vm4 = vcmask 408576  }
  0x11   :  { %1163 = vmatpush3.bf16.msra.mxu0 %v1162_v39  ;;  %v46_v55 = vld [vmem:[%s2156_s1 + $0x50] sm:$0xff]  ;;  %v47_v56 = vld [vmem:[%s2156_s1 + $0x58] sm:$0xff]  ;;  %169 = vmatprep.mubr.f32.mxu0 %v99_v50  ;;  %v65_v58 = vld [vmem:[%s2156_s1 + $0xe8] sm:$0xff]  ;;  %v1190_v60 = vpack.c.bf16 %v75_v53, %v74_v52  ;;  %v98_v3 = vrot.slane %v84_v59, %v1542_v34  ;;  %vm363_vm5 = vcmask 130048   ;;  %vm345_vm6 = vcmask 123904  }
  0x12   :  { %1165 = vmatprep.subr.bf16.mxu0 %v1164_v43  ;;  %v1170_v61 = vpack.c.bf16 %v47_v56, %v46_v55  ;;  %v1172_v62 = vpack.c.bf16 %v65_v58, %v64_v57  ;;  %v48_v63 = vld [vmem:[%s2156_s1 + $0x60] sm:$0xff]  ;;  %v49_v0 = vld [vmem:[%s2156_s1 + $0x68] sm:$0xff]  ;;  %v66_v1 = vld [vmem:[%s2156_s1 + $0xf0] sm:$0xff]  ;;  %vm631_vm9 = vcmask 261120  }
  0x13   :  { %1188 = vmatpush3.bf16.msra.mxu1 %v1187_v49  ;;  %v67_v2 = vld [vmem:[%s2156_s1 + $0xf8] sm:$0xff]  ;;  %v1174_v4 = vpack.c.bf16 %v49_v0, %v48_v63  ;;  %v50_v6 = vld [vmem:[%s2156_s1 + $0x70] sm:$0xff]  ;;  %v253_v10 = vld [vmem:[%s2158_s3] sm:$0xff] }
  0x14   :  { %1189 = vmatprep.subr.bf16.mxu1 %v1419_v8  ;;  %v1176_v5 = vpack.c.bf16 %v67_v2, %v66_v1  ;;  %v51_v7 = vld [vmem:[%s2156_s1 + $0x78] sm:$0xff]  ;;  %v254_v11 = vld [vmem:[%s2158_s3 + $0x8] sm:$0xff]  ;;  %v255_v13 = vld [vmem:[%s2158_s3 + $0x10] sm:$0xff] }
  0x15   :  { %1167 = vmatpush3.bf16.msra.mxu0 %v1166_v51  ;;  %v1178_v9 = vpack.c.bf16 %v51_v7, %v50_v6  ;;  %v1193_v12 = vpack.c.bf16 %v254_v11, %v253_v10  ;;  %v256_v14 = vld [vmem:[%s2158_s3 + $0x18] sm:$0xff]  ;;  %v257_v17 = vld [vmem:[%s2158_s3 + $0x20] sm:$0xff]  ;;  %v258_v18 = vld [vmem:[%s2158_s3 + $0x28] sm:$0xff] }
  0x16   :  { %1169 = vmatprep.subr.bf16.mxu0 %v1168_v54  ;;  %v1196_v15 = vpack.c.bf16 %v256_v14, %v255_v13  ;;  %v1199_v19 = vpack.c.bf16 %v258_v18, %v257_v17  ;;  %v259_v20 = vld [vmem:[%s2158_s3 + $0x30] sm:$0x3]  ;;  %v348_v21 = vld [vmem:[%s2160_s5 + $0x8] sm:$0xff]  ;;  %v350_v22 = vld [vmem:[%s2160_s5 + $0x18] sm:$0xff]  ;;  %s1037_s3 = sshll.u32 %s1423_s0, 4  ;;  %s1038_s3 = int_to_ptr.vmem [resolvable:$true] %s1037_s3 }
  0x17   :  { %1191 = vmatpush3.bf16.msra.mxu1 %v1190_v60  ;;  %v1201_v24 = vpack.c.bf16 %v350_v22, %v348_v21  ;;  %v1047_v29 = vld [vmem:[%s2157_s2] ss:$0 sm:$0xff]  ;;  %v349_v39 = vld [vmem:[%s2160_s5 + $0x10] sm:$0xff]  ;;  %v455_v44 = vld [vmem:[%s2162_s7 + $0x8] sm:$0xff]  ;;  %s1395_s11 = scalar_lea.vmem %s1038_s3, 32  ;;  %p1400_p1 = scmp.lt.s32.totalorder %s1038_s3, %s1038_s3 }
  0x18   :  { %1192 = vmatprep.subr.bf16.mxu1 %v1419_v8  ;;  %v347_v38 = vld [vmem:[%s2160_s5] sm:$0xff]  ;;  %v464_v48 = vld [vmem:[%s2162_s7 + $0x50] sm:$0xff]  ;;  %v461_v49 = vld [vmem:[%s2162_s7 + $0x38] sm:$0xff]  ;;  %p1396_p0 = scmp.ne.s32.totalorder %s1038_s3, %s1395_s11  ;;  %p1401_p2 = scmp.lt.s32.totalorder %s1395_s11, %s1395_s11 }
  0x19   :  { %1171 = vmatpush3.bf16.msra.mxu0 %v1170_v61  ;;  %v1203_v42 = vpack.c.bf16 %v349_v39, %v347_v38  ;;  %v462_v45 = vld [vmem:[%s2162_s7 + $0x40] sm:$0xff]  ;;  %v469_v52 = vld [vmem:[%s2162_s7 + $0x78] sm:$0xff]  ;;  %v476_v53 = vld [vmem:[%s2162_s7 + $0xb0] sm:$0xff] }
  0x1a   :  { %1173 = vmatprep.subr.bf16.mxu0 %v1172_v62  ;;  %1129 = vmatmul.mubr.msk.f32.vlgmr.msra.gmra.mrb[0].mxu1 %vm102_vm1, %v98_v3  ;;  %v1205_v47 = vpack.c.bf16 %v462_v45, %v455_v44  ;;  %v1209_v54 = vpack.c.bf16 %v476_v53, %v469_v52  ;;  %v468_v55 = vld [vmem:[%s2162_s7 + $0x70] sm:$0xff]  ;;  %v475_v56 = vld [vmem:[%s2162_s7 + $0xa8] sm:$0xff]  ;;  %v490_v59 = vld [vmem:[%s2162_s7 + $0x120] sm:$0xff]  ;;  %p1402_p3 = por %p1401_p2, %p1400_p1 }
  0x1b   :  { %1145 = vmatprep.mubr.msk.f32.mxu1 %vm1421_vm0, %v1422_v16  ;;  %1194 = vmatpush3.bf16.msra.mxu1 %v1193_v12  ;;  %v1211_v57 = vpack.c.bf16 %v475_v56, %v468_v55  ;;  %v483_v58 = vld [vmem:[%s2162_s7 + $0xe8] sm:$0xff]  ;;  %v482_v61 = vld [vmem:[%s2162_s7 + $0xe0] sm:$0xff]  ;;  %v489_v62 = vld [vmem:[%s2162_s7 + $0x118] sm:$0xff] }
  0x1c   :  { %1195 = vmatprep.subr.bf16.mxu1 %v1419_v8  ;;  %v1213_v60 = vpack.c.bf16 %v490_v59, %v483_v58  ;;  %v1215_v63 = vpack.c.bf16 %v489_v62, %v482_v61  ;;  %v497_v0 = vld [vmem:[%s2162_s7 + $0x158] sm:$0xff]  ;;  %v504_v1 = vld [vmem:[%s2162_s7 + $0x190] sm:$0xff]  ;;  %v463_v7 = vld [vmem:[%s2162_s7 + $0x48] sm:$0xff]  ;;  %p1403_p4 = pnand %p1402_p3, %p1396_p0 }
  0x1d   :  { %1175 = vmatpush3.bf16.msra.mxu0 %v1174_v4  ;;  %v1217_v2 = vpack.c.bf16 %v504_v1, %v497_v0  ;;  %v496_v3 = vld [vmem:[%s2162_s7 + $0x150] sm:$0xff]  ;;  %v503_v4 = vld [vmem:[%s2162_s7 + $0x188] sm:$0xff]  ;;  %v478_v11 = vld [vmem:[%s2162_s7 + $0xc0] sm:$0xff] }
  0x1e   :  { %1177 = vmatprep.subr.bf16.mxu0 %v1176_v5  ;;  %v1219_v5 = vpack.c.bf16 %v503_v4, %v496_v3  ;;  %v456_v6 = vld [vmem:[%s2162_s7 + $0x10] sm:$0xff]  ;;  %v471_v10 = vld [vmem:[%s2162_s7 + $0x88] sm:$0xff]  ;;  %v470_v18 = vld [vmem:[%s2162_s7 + $0x80] sm:$0xff] }
  0x1f   :  { %1197 = vmatpush3.bf16.msra.mxu1 %v1196_v15  ;;  %v1247_v13 = vpack.c.bf16 %v463_v7, %v456_v6  ;;  %v1249_v17 = vpack.c.bf16 %v478_v11, %v471_v10  ;;  %v492_v21 = vld [vmem:[%s2162_s7 + $0x130] sm:$0xff]  ;;  %v519_v45 = vld [vmem:[%s2162_s7 + $0x208] sm:$0xff]  ;;  %v526_v55 = vld [vmem:[%s2162_s7 + $0x240] sm:$0xff] }
  0x20   :  { %1198 = vmatprep.subr.bf16.mxu1 %v1419_v8  ;;  %v520_v39 = vld [vmem:[%s2162_s7 + $0x210] sm:$0xff]  ;;  %v531_v52 = vld [vmem:[%s2162_s7 + $0x268] sm:$0xff]  ;;  %v533_v56 = vld [vmem:[%s2162_s7 + $0x278] sm:$0xff] }
  0x21   :  { %1179 = vmatpush3.bf16.msra.mxu0 %v1178_v9  ;;  %v1050_v9 = vld [vmem:[%s2159_s4] ss:$0 sm:$0xff]  ;;  %v512_v44 = vld [vmem:[%s2162_s7 + $0x1d0] sm:$0xff]  ;;  %v539_v58 = vld [vmem:[%s2162_s7 + $0x2a8] sm:$0xff] }
  0x22   :  { %1206 = vmatprep.subr.bf16.mxu0 %v1205_v47  ;;  %v525_v47 = vld [vmem:[%s2162_s7 + $0x238] sm:$0xff]  ;;  %v546_v59 = vld [vmem:[%s2162_s7 + $0x2e0] sm:$0xff]  ;;  %v548_v62 = vld [vmem:[%s2162_s7 + $0x2f0] sm:$0xff] }
  0x23   :  { %1200 = vmatpush3.bf16.msra.mxu1 %v1199_v19  ;;  %v477_v19 = vld [vmem:[%s2162_s7 + $0xb8] sm:$0xff]  ;;  %v1229_v61 = vpack.c.bf16 %v546_v59, %v539_v58  ;;  %v540_v3 = vld [vmem:[%s2162_s7 + $0x2b0] sm:$0xff]  ;;  %v547_v4 = vld [vmem:[%s2162_s7 + $0x2e8] sm:$0xff] }
  0x24   :  { %170 = vmatmul.mubr.f32.vlgmr.msra.gmra.mrb[0].mxu0 %v91_v46  ;;  %1143 = vmatprep.subr.mxu1 %v1422_v16  ;;  %v457_v46 = vld [vmem:[%s2162_s7 + $0x18] sm:$0xff]  ;;  %v1251_v22 = vpack.c.bf16 %v477_v19, %v470_v18  ;;  %v560_v7 = vld [vmem:[%s2162_s7 + $0x350] sm:$0xff]  ;;  %v562_v11 = vld [vmem:[%s2162_s7 + $0x360] sm:$0xff] }
  0x25   :  { %v1245_v50 = vpack.c.bf16 %v464_v48, %v457_v46  ;;  %v1263_v46 = vpack.c.bf16 %v519_v45, %v512_v44  ;;  %v532_v48 = vld [vmem:[%s2162_s7 + $0x270] sm:$0xff]  ;;  %v545_v0 = vld [vmem:[%s2162_s7 + $0x2d8] sm:$0xff] }
  0x26   :  { %v553_v6 = vld [vmem:[%s2162_s7 + $0x318] sm:$0xff] }
  0x27   :  { %1144 = vmatpush3.msk.msra.mxu1 %vm271_vm2, %v259_v20  ;;  %v485_v20 = vld [vmem:[%s2162_s7 + $0xf8] sm:$0xff]  ;;  %v1233_v10 = vpack.c.bf16 %v560_v7, %v553_v6  ;;  %v467_v6 = vld [vmem:[%s2162_s7 + $0x68] sm:$0xff] }
  0x28   :  { %1202 = vmatprep.subr.bf16.mxu1 %v1201_v24  ;;  %v1253_v24 = vpack.c.bf16 %v492_v21, %v485_v20  ;;  %v561_v18 = vld [vmem:[%s2162_s7 + $0x358] sm:$0xff]  ;;  %v567_v20 = vld [vmem:[%s2162_s7 + $0x388] sm:$0xff]  ;;  %v574_v21 = vld [vmem:[%s2162_s7 + $0x3c0] sm:$0xff] }
  0x29   :  { %v589_v44 = vld [vmem:[%s2162_s7 + $0x438] sm:$0xff] }
  0xed   :  { %v241_v25 = vpop.f32.mrb[0].mxu1 }
  0xee   :  { %v1130_v26 = vpop.f32.mrb[1].mxu1 }
  0xef   :  { %v491_v26 = vld [vmem:[%s2162_s7 + $0x128] sm:$0xff] }
  0xf7   :  { %v1092_v27 = vpop.f32.mrb[0].mxu0 }
  0xf8   :  { %v1093_v28 = vpop.f32.mrb[1].mxu0 }
  0xf9   :  { %v1094_v30 = vadd.f32 %v1093_v28, %v1092_v27  ;;  %v499_v27 = vld [vmem:[%s2162_s7 + $0x168] sm:$0xff]  ;;  %v506_v28 = vld [vmem:[%s2162_s7 + $0x1a0] sm:$0xff] }
  0xfb   :  { %v172_v31 = vadd.f32 %v1094_v30, %v1047_v29  ;;  %v1257_v30 = vpack.c.bf16 %v506_v28, %v499_v27  ;;  %v573_v27 = vld [vmem:[%s2162_s7 + $0x3b8] sm:$0xff] }
  0xfd   :  { %v242_v32 = vadd.f32 %v241_v25, %v172_v31  ;;  %v484_v25 = vld [vmem:[%s2162_s7 + $0xf0] sm:$0xff]  ;;  %v498_v31 = vld [vmem:[%s2162_s7 + $0x160] sm:$0xff] }
  0xfe   :  { %v1255_v29 = vpack.c.bf16 %v491_v26, %v484_v25  ;;  %v576_v25 = vld [vmem:[%s2162_s7 + $0x3d0] sm:$0xff]  ;;  %v566_v26 = vld [vmem:[%s2162_s7 + $0x380] sm:$0xff] }
  0xff   :  { %v246_v33 = vmin.f32 %v242_v32, 0.0  ;;  %vm245_vm3 = vcmp.gt.f32.partialorder %v242_v32, 0.0 }
 0x101   :  { %v247_v35 = vmul.f32 1.442695, %v246_v33 }
 0x103   :  { %1361 = vpow2.f32 %v247_v35  ;;  %v511_v35 = vld [vmem:[%s2162_s7 + $0x1c8] sm:$0xff] }
 0x10d   :  { %v1362_v36 = vpop.eup %1361 }
 0x10e   :  { %v1049_v37 = vadd.f32 -1.0, %v1362_v36  ;;  %v518_v36 = vld [vmem:[%s2162_s7 + $0x200] sm:$0xff] }
 0x10f   :  { %v1221_v38 = vpack.c.bf16 %v518_v36, %v511_v35  ;;  %v588_v35 = vld [vmem:[%s2162_s7 + $0x430] sm:$0xff]  ;;  %v583_v36 = vld [vmem:[%s2162_s7 + $0x408] sm:$0xff] }
 0x110   :  { %v250_v40 = vmul.f32 1.6732632, %v1049_v37  ;;  %v513_v37 = vld [vmem:[%s2162_s7 + $0x1d8] sm:$0xff] }
 0x112   :  { %v251_v41 = vsel %vm245_vm3, %v242_v32, %v250_v40  ;;  %v505_v32 = vld [vmem:[%s2162_s7 + $0x198] sm:$0xff]  ;;  %v510_v40 = vld [vmem:[%s2162_s7 + $0x1c0] sm:$0xff] }
 0x113   :  { %v252_v43 = vmul.f32 1.050701, %v251_v41  ;;  %v1259_v33 = vpack.c.bf16 %v505_v32, %v498_v31  ;;  %v517_v41 = vld [vmem:[%s2162_s7 + $0x1f8] sm:$0xff]  ;;  %v575_v31 = vld [vmem:[%s2162_s7 + $0x3c8] sm:$0xff] }
 0x115   :  { %1146 = vmatmul.mubr.msk.f32.vlgmr.msra.gmra.mrb[2].mxu1 %vm267_vm4, %v252_v43  ;;  %v1223_v43 = vpack.c.bf16 %v517_v41, %v510_v40  ;;  %v587_v40 = vld [vmem:[%s2162_s7 + $0x428] sm:$0xff] }
 0x116   :  { %1204 = vmatpush1.bf16.msra.mxu1 %v1203_v42  ;;  %431 = vmatprep.mubr.f32.mxu1 %v1422_v16  ;;  %v454_v16 = vld [vmem:[%s2162_s7] sm:$0xff]  ;;  %v1261_v42 = vpack.c.bf16 %v520_v39, %v513_v37  ;;  %v580_v39 = vld [vmem:[%s2162_s7 + $0x3f0] sm:$0xff] }
 0x117   :  { %v1207_v51 = vpack.c.bf16 %v461_v49, %v454_v16  ;;  %1246 = vmatprep.subr.bf16.mxu1 %v1245_v50  ;;  %v527_v16 = vld [vmem:[%s2162_s7 + $0x248] sm:$0xff]  ;;  %v1225_v49 = vpack.c.bf16 %v532_v48, %v525_v47  ;;  %v534_v50 = vld [vmem:[%s2162_s7 + $0x280] sm:$0xff] }
 0x118   :  { %v1265_v53 = vpack.c.bf16 %v534_v50, %v527_v16  ;;  %v466_v47 = vld [vmem:[%s2162_s7 + $0x60] sm:$0xff]  ;;  %v355_v16 = vsub.s32 0, %v1518_v23  ;;  %v359_v50 = vsub.s32 1, %v1518_v23 }
 0x119   :  { %1208 = vmatpush1.bf16.msra.mxu0 %v1207_v51  ;;  %v524_v51 = vld [vmem:[%s2162_s7 + $0x230] sm:$0xff] }
 0x11a   :  { %1210 = vmatprep.subr.bf16.mxu0 %v1209_v54  ;;  %v1227_v54 = vpack.c.bf16 %v531_v52, %v524_v51 }
 0x11d   :  { %1212 = vmatpush1.bf16.msra.mxu0 %v1211_v57  ;;  %v1267_v57 = vpack.c.bf16 %v533_v56, %v526_v55 }
 0x11e   :  { %1214 = vmatprep.subr.bf16.mxu0 %v1213_v60  ;;  %v541_v60 = vld [vmem:[%s2162_s7 + $0x2b8] sm:$0xff] }
 0x11f   :  { %v1269_v1 = vpack.c.bf16 %v548_v62, %v541_v60 }
 0x121   :  { %1216 = vmatpush1.bf16.msra.mxu0 %v1215_v63  ;;  %v538_v63 = vld [vmem:[%s2162_s7 + $0x2a0] sm:$0xff] }
 0x122   :  { %1218 = vmatprep.subr.bf16.mxu0 %v1217_v2  ;;  %v1231_v2 = vpack.c.bf16 %v545_v0, %v538_v63 }
 0x125   :  { %1220 = vmatpush1.bf16.msra.mxu0 %v1219_v5  ;;  %v1271_v5 = vpack.c.bf16 %v547_v4, %v540_v3  ;;  %v465_v4 = vld [vmem:[%s2162_s7 + $0x58] sm:$0xff] }
 0x126   :  { %1222 = vmatprep.subr.bf16.mxu0 %v1221_v38  ;;  %v590_v38 = vld [vmem:[%s2162_s7 + $0x440] sm:$0xff] }
 0x127   :  { %v1281_v41 = vpack.c.bf16 %v590_v38, %v583_v36 }
 0x129   :  { %1224 = vmatpush1.bf16.msra.mxu0 %v1223_v43  ;;  %v582_v43 = vld [vmem:[%s2162_s7 + $0x400] sm:$0xff] }
 0x12a   :  { %1226 = vmatprep.subr.bf16.mxu0 %v1225_v49  ;;  %v1283_v45 = vpack.c.bf16 %v589_v44, %v582_v43  ;;  %v351_v49 = vld [vmem:[%s2161_s6] sm:$0x3] }
 0x12b   :  { %v356_v51 = vrot.slane %v351_v49, %v355_v16  ;;  %v360_v52 = vrot.slane %v351_v49, %v359_v50  ;;  %v522_v43 = vld [vmem:[%s2162_s7 + $0x220] sm:$0xff]  ;;  %v516_v49 = vld [vmem:[%s2162_s7 + $0x1f0] sm:$0xff] }
 0x12d   :  { %1228 = vmatpush1.bf16.msra.mxu0 %v1227_v54 }
 0x12e   :  { %1230 = vmatprep.subr.bf16.mxu0 %v1229_v61 }
 0x131   :  { %1232 = vmatpush1.bf16.msra.mxu0 %v1231_v2  ;;  %v458_v2 = vld [vmem:[%s2162_s7 + $0x20] sm:$0xff] }
 0x132   :  { %1234 = vmatprep.subr.bf16.mxu0 %v1233_v10  ;;  %v473_v10 = vld [vmem:[%s2162_s7 + $0x98] sm:$0xff] }
 0x1e8   :  { %v341_v12 = vpop.f32.mrb[2].mxu1 }
 0x1e9   :  { %v342_v14 = vadd.f32 %v1050_v9, %v341_v12  ;;  %v1147_v15 = vpop.f32.mrb[3].mxu1  ;;  %v555_v9 = vld [vmem:[%s2162_s7 + $0x328] sm:$0xff]  ;;  %v552_v12 = vld [vmem:[%s2162_s7 + $0x310] sm:$0xff] }
 0x1eb   :  { %1053 = vmatmul.mubr.msk.f32.vlgmr.msra.gmra.mrb[4].mxu1 %vm363_vm5, %v342_v14  ;;  %346 = vst.msk [vmem:[#allocation2] sm:$0x3] %vm345_vm6, %v342_v14  ;;  %v1273_v14 = vpack.c.bf16 %v562_v11, %v555_v9  ;;  %v480_v11 = vld [vmem:[%s2162_s7 + $0xd0] sm:$0xff] }
 0x1ec   :  { %1248 = vmatpush1.bf16.msra.mxu1 %v1247_v13  ;;  %v559_v13 = vld [vmem:[%s2162_s7 + $0x348] sm:$0xff] }
 0x1ed   :  { %1250 = vmatprep.subr.bf16.mxu1 %v1249_v17  ;;  %v1235_v15 = vpack.c.bf16 %v559_v13, %v552_v12  ;;  %v554_v17 = vld [vmem:[%s2162_s7 + $0x320] sm:$0xff]  ;;  %v1287_v13 = vpack.c.bf16 %v465_v4, %v458_v2  ;;  %v544_v4 = vld [vmem:[%s2162_s7 + $0x2d0] sm:$0xff] }
 0x1ee   :  { %v1275_v19 = vpack.c.bf16 %v561_v18, %v554_v17  ;;  %v479_v18 = vld [vmem:[%s2162_s7 + $0xc8] sm:$0xff] }
 0x1ef   :  { %1236 = vmatpush1.bf16.msra.mxu0 %v1235_v15  ;;  %v472_v15 = vld [vmem:[%s2162_s7 + $0x90] sm:$0xff] }
 0x1f0   :  { %1252 = vmatpush1.bf16.msra.mxu1 %v1251_v22  ;;  %v569_v22 = vld [vmem:[%s2162_s7 + $0x398] sm:$0xff] }
 0x1f1   :  { %1254 = vmatprep.subr.bf16.mxu1 %v1253_v24  ;;  %v1237_v24 = vpack.c.bf16 %v574_v21, %v567_v20  ;;  %v1277_v28 = vpack.c.bf16 %v576_v25, %v569_v22  ;;  %v481_v20 = vld [vmem:[%s2162_s7 + $0xd8] sm:$0xff]  ;;  %v1289_v21 = vpack.c.bf16 %v480_v11, %v473_v10  ;;  %v487_v22 = vld [vmem:[%s2162_s7 + $0x108] sm:$0xff]  ;;  %v1291_v25 = vpack.c.bf16 %v479_v18, %v472_v15  ;;  %v556_v11 = vld [vmem:[%s2162_s7 + $0x330] sm:$0xff] }
 0x1f2   :  { %v565_v15 = vld [vmem:[%s2162_s7 + $0x378] sm:$0xff]  ;;  %v571_v18 = vld [vmem:[%s2162_s7 + $0x3a8] sm:$0xff] }
 0x1f3   :  { %1238 = vmatprep.subr.bf16.mxu0 %v1237_v24  ;;  %v494_v24 = vld [vmem:[%s2162_s7 + $0x140] sm:$0xff] }
 0x1f4   :  { %1256 = vmatpush1.bf16.msra.mxu1 %v1255_v29  ;;  %v1239_v29 = vpack.c.bf16 %v573_v27, %v566_v26  ;;  %v486_v27 = vld [vmem:[%s2162_s7 + $0x100] sm:$0xff] }
 0x1f5   :  { %1258 = vmatprep.subr.bf16.mxu1 %v1257_v30  ;;  %v568_v30 = vld [vmem:[%s2162_s7 + $0x390] sm:$0xff] }
 0x1f6   :  { %v1279_v32 = vpack.c.bf16 %v575_v31, %v568_v30  ;;  %1240 = vmatpush1.bf16.msra.mxu0 %v1239_v29  ;;  %v493_v29 = vld [vmem:[%s2162_s7 + $0x138] sm:$0xff]  ;;  %v488_v30 = vld [vmem:[%s2162_s7 + $0x110] sm:$0xff]  ;;  %v495_v31 = vld [vmem:[%s2162_s7 + $0x148] sm:$0xff] }
 0x1f7   :  { %v1332_v36 = vpack.c.bf16 %v495_v31, %v488_v30 }
 0x1f8   :  { %1260 = vmatpush1.bf16.msra.mxu1 %v1259_v33  ;;  %v581_v33 = vld [vmem:[%s2162_s7 + $0x3f8] sm:$0xff] }
 0x1f9   :  { %1262 = vmatprep.subr.bf16.mxu1 %v1261_v42  ;;  %v1241_v37 = vpack.c.bf16 %v588_v35, %v581_v33  ;;  %v1243_v42 = vpack.c.bf16 %v587_v40, %v580_v39  ;;  %v508_v33 = vld [vmem:[%s2162_s7 + $0x1b0] sm:$0xff]  ;;  %v1295_v35 = vpack.c.bf16 %v493_v29, %v486_v27  ;;  %v507_v39 = vld [vmem:[%s2162_s7 + $0x1a8] sm:$0xff]  ;;  %v502_v40 = vld [vmem:[%s2162_s7 + $0x180] sm:$0xff] }
 0x1fa   :  { %v579_v27 = vld [vmem:[%s2162_s7 + $0x3e8] sm:$0xff]  ;;  %v592_v29 = vld [vmem:[%s2162_s7 + $0x450] sm:$0xff] }
 0x1fb   :  { %1242 = vmatprep.subr.bf16.mxu0 %v1241_v37  ;;  %v500_v37 = vld [vmem:[%s2162_s7 + $0x170] sm:$0xff] }
 0x1fc   :  { %1264 = vmatpush1.bf16.msra.mxu1 %v1263_v46  ;;  %1244 = vmatpush1.bf16.msra.mxu0 %v1243_v42  ;;  %v459_v46 = vld [vmem:[%s2162_s7 + $0x28] sm:$0xff]  ;;  %v1299_v44 = vpack.c.bf16 %v507_v39, %v500_v37  ;;  %v593_v37 = vld [vmem:[%s2162_s7 + $0x458] sm:$0xff] }
 0x1fd   :  { %1266 = vmatprep.subr.bf16.mxu1 %v1265_v53  ;;  %v1285_v48 = vpack.c.bf16 %v466_v47, %v459_v46  ;;  %v515_v42 = vld [vmem:[%s2162_s7 + $0x1e8] sm:$0xff]  ;;  %v514_v46 = vld [vmem:[%s2162_s7 + $0x1e0] sm:$0xff] }
 0x1fe   :  { %v1301_v47 = vpack.c.bf16 %v522_v43, %v515_v42 }
 0x1ff   :  { %1286 = vmatprep.subr.bf16.mxu0 %v1285_v48  ;;  %v521_v48 = vld [vmem:[%s2162_s7 + $0x218] sm:$0xff] }
 0x200   :  { %1268 = vmatpush1.bf16.msra.mxu1 %v1267_v57 }
 0x201   :  { %1270 = vmatprep.subr.bf16.mxu1 %v1269_v1 }
 0x204   :  { %1272 = vmatpush1.bf16.msra.mxu1 %v1271_v5  ;;  %v460_v5 = vld [vmem:[%s2162_s7 + $0x30] sm:$0xff] }
 0x205   :  { %1274 = vmatprep.subr.bf16.mxu1 %v1273_v14  ;;  %v1326_v14 = vpack.c.bf16 %v467_v6, %v460_v5  ;;  %v551_v5 = vld [vmem:[%s2162_s7 + $0x308] sm:$0xff]  ;;  %v557_v6 = vld [vmem:[%s2162_s7 + $0x338] sm:$0xff] }
 0x206   :  { %v1344_v10 = vpack.c.bf16 %v551_v5, %v544_v4 }
 0x208   :  { %1276 = vmatpush1.bf16.msra.mxu1 %v1275_v19  ;;  %v474_v19 = vld [vmem:[%s2162_s7 + $0xa0] sm:$0xff] }
 0x209   :  { %1278 = vmatprep.subr.bf16.mxu1 %v1277_v28  ;;  %v1329_v26 = vpack.c.bf16 %v481_v20, %v474_v19  ;;  %v1293_v28 = vpack.c.bf16 %v494_v24, %v487_v22  ;;  %v578_v19 = vld [vmem:[%s2162_s7 + $0x3e0] sm:$0xff] }
 0x20a   :  { %v570_v22 = vld [vmem:[%s2162_s7 + $0x3a0] sm:$0xff]  ;;  %v1317_v24 = vpack.c.bf16 %v578_v19, %v571_v18 }
 0x20c   :  { %1280 = vmatpush1.bf16.msra.mxu1 %v1279_v32  ;;  %v501_v32 = vld [vmem:[%s2162_s7 + $0x178] sm:$0xff] }
 0x20d   :  { %1282 = vmatprep.subr.bf16.mxu1 %v1281_v41  ;;  %v1297_v38 = vpack.c.bf16 %v508_v33, %v501_v32  ;;  %v509_v41 = vld [vmem:[%s2162_s7 + $0x1b8] sm:$0xff]  ;;  %v584_v32 = vld [vmem:[%s2162_s7 + $0x410] sm:$0xff] }
 0x210   :  { %1284 = vmatpush1.bf16.msra.mxu1 %v1283_v45  ;;  %v1335_v45 = vpack.c.bf16 %v509_v41, %v502_v40 }
 0x211   :  { %1325 = vmatprep.subr.bf16.mxu1 %v1419_v8 }
 0x2be   :  { %v433_v53 = vpop.f32.mrb[4].mxu1 }
 0x2bf   :  { %v434_v54 = vadd.f32 %v433_v53, %v356_v51  ;;  %v435_v55 = vpop.f32.mrb[5].mxu1  ;;  %v523_v51 = vld [vmem:[%s2162_s7 + $0x228] sm:$0xff]  ;;  %v536_v53 = vld [vmem:[%s2162_s7 + $0x290] sm:$0xff] }
 0x2c0   :  { %v436_v56 = vadd.f32 %v435_v55, %v360_v52  ;;  %v529_v52 = vld [vmem:[%s2162_s7 + $0x258] sm:$0xff]  ;;  %v1338_v55 = vpack.c.bf16 %v523_v51, %v516_v49 }
 0x2c1   :  { %v440_v57 = vmin.f32 %v434_v54, 0.0  ;;  %vm438_vm7 = vcmp.gt.f32.partialorder %v434_v54, 0.0 }
 0x2c2   :  { %v441_v58 = vmin.f32 %v436_v56, 0.0  ;;  %vm439_vm8 = vcmp.gt.f32.partialorder %v436_v56, 0.0 }
 0x2c3   :  { %v442_v59 = vmul.f32 1.442695, %v440_v57  ;;  %v1305_v57 = vpack.c.bf16 %v536_v53, %v529_v52 }
 0x2c4   :  { %v444_v60 = vmul.f32 1.442695, %v441_v58  ;;  %v535_v58 = vld [vmem:[%s2162_s7 + $0x288] sm:$0xff] }
 0x2c5   :  { %1363 = vpow2.f32 %v442_v59  ;;  %v530_v59 = vld [vmem:[%s2162_s7 + $0x260] sm:$0xff] }
 0x2c6   :  { %1365 = vpow2.f32 %v444_v60  ;;  %v537_v60 = vld [vmem:[%s2162_s7 + $0x298] sm:$0xff] }
 0x2cf   :  { %v1364_v61 = vpop.eup %1363 }
 0x2d0   :  { %v1366_v62 = vpop.eup %1365  ;;  %v1054_v63 = vadd.f32 -1.0, %v1364_v61  ;;  %v543_v61 = vld [vmem:[%s2162_s7 + $0x2c8] sm:$0xff] }
 0x2d1   :  { %v1055_v0 = vadd.f32 -1.0, %v1366_v62  ;;  %v550_v62 = vld [vmem:[%s2162_s7 + $0x300] sm:$0xff] }
 0x2d2   :  { %v448_v1 = vmul.f32 1.6732632, %v1054_v63  ;;  %v1309_v2 = vpack.c.bf16 %v550_v62, %v543_v61 }
 0x2d3   :  { %v449_v3 = vmul.f32 1.6732632, %v1055_v0  ;;  %v1341_v0 = vpack.c.bf16 %v537_v60, %v530_v59 }
 0x2d4   :  { %v450_v7 = vsel %vm438_vm7, %v434_v54, %v448_v1  ;;  %v1303_v54 = vpack.c.bf16 %v521_v48, %v514_v46  ;;  %v542_v1 = vld [vmem:[%s2162_s7 + $0x2c0] sm:$0xff] }
 0x2d5   :  { %v451_v9 = vsel %vm439_vm8, %v436_v56, %v449_v3  ;;  %v1939_v17 = vmul.f32 1.050701, %v450_v7  ;;  %v528_v56 = vld [vmem:[%s2162_s7 + $0x250] sm:$0xff]  ;;  %v549_v3 = vld [vmem:[%s2162_s7 + $0x2f8] sm:$0xff] }
 0x2d6   :  { %v453_v12 = vmul.f32 1.050701, %v451_v9  ;;  %v1307_v63 = vpack.c.bf16 %v535_v58, %v528_v56  ;;  %v564_v7 = vld [vmem:[%s2162_s7 + $0x370] sm:$0xff]  ;;  %v1311_v9 = vpack.c.bf16 %v549_v3, %v542_v1 }
 0x2d8   :  { %1056 = vmatprep.mubr.msk.f32.mxu0 %vm631_vm9, %v453_v12  ;;  %1057 = vmatprep.mubr.msk.f32.mxu1 %vm631_vm9, %v453_v12 }
 0x2d9   :  { %700 = vmatmul.mubr.f32.vlgmr.msra.gmra.mrb[2].mxu0 %v1939_v17  ;;  %771 = vmatmul.mubr.f32.vlgmr.msra.gmra.mrb[6].mxu1 %v1939_v17 }
 0x2da   :  { %1288 = vmatpush1.bf16.msra.mxu0 %v1287_v13  ;;  %1327 = vmatpush1.bf16.msra.mxu1 %v1326_v14  ;;  %v563_v13 = vld [vmem:[%s2162_s7 + $0x368] sm:$0xff]  ;;  %v558_v14 = vld [vmem:[%s2162_s7 + $0x340] sm:$0xff] }
 0x2db   :  { %1058 = vmatprep.mubr.msk.f32.mxu0 %vm631_vm9, %v453_v12  ;;  %1059 = vmatprep.mubr.msk.f32.mxu1 %vm631_vm9, %v453_v12  ;;  %v1313_v12 = vpack.c.bf16 %v564_v7, %v557_v6  ;;  %v1315_v20 = vpack.c.bf16 %v563_v13, %v556_v11 }
 0x2dc   :  { %1290 = vmatprep.subr.bf16.mxu0 %v1289_v21  ;;  %1328 = vmatprep.subr.bf16.mxu1 %v1419_v8  ;;  %v1347_v21 = vpack.c.bf16 %v565_v15, %v558_v14 }
 0x2de   :  { %1292 = vmatpush1.bf16.msra.mxu0 %v1291_v25  ;;  %1330 = vmatpush1.bf16.msra.mxu1 %v1329_v26  ;;  %v577_v25 = vld [vmem:[%s2162_s7 + $0x3d8] sm:$0xff]  ;;  %v572_v26 = vld [vmem:[%s2162_s7 + $0x3b0] sm:$0xff] }
 0x2df   :  { %1294 = vmatprep.subr.bf16.mxu0 %v1293_v28  ;;  %1331 = vmatprep.subr.bf16.mxu1 %v1419_v8  ;;  %v585_v28 = vld [vmem:[%s2162_s7 + $0x418] sm:$0xff]  ;;  %v1319_v30 = vpack.c.bf16 %v577_v25, %v570_v22  ;;  %v1350_v31 = vpack.c.bf16 %v579_v27, %v572_v26 }
 0x2e0   :  { %v1321_v33 = vpack.c.bf16 %v592_v29, %v585_v28 }
 0x2e2   :  { %1296 = vmatpush1.bf16.msra.mxu0 %v1295_v35  ;;  %1333 = vmatpush1.bf16.msra.mxu1 %v1332_v36  ;;  %v591_v35 = vld [vmem:[%s2162_s7 + $0x448] sm:$0xff]  ;;  %v586_v36 = vld [vmem:[%s2162_s7 + $0x420] sm:$0xff] }
 0x2e3   :  { %1298 = vmatprep.subr.bf16.mxu0 %v1297_v38  ;;  %1334 = vmatprep.subr.bf16.mxu1 %v1419_v8  ;;  %v1323_v38 = vpack.c.bf16 %v591_v35, %v584_v32  ;;  %v1353_v39 = vpack.c.bf16 %v593_v37, %v586_v36 }
 0x2e6   :  { %1300 = vmatpush1.bf16.msra.mxu0 %v1299_v44  ;;  %1336 = vmatpush1.bf16.msra.mxu1 %v1335_v45 }
 0x2e7   :  { %1302 = vmatprep.subr.bf16.mxu0 %v1301_v47  ;;  %1337 = vmatprep.subr.bf16.mxu1 %v1419_v8 }
 0x2ea   :  { %1304 = vmatpush1.bf16.msra.mxu0 %v1303_v54  ;;  %1339 = vmatpush1.bf16.msra.mxu1 %v1338_v55 }
 0x2eb   :  { %1306 = vmatprep.subr.bf16.mxu0 %v1305_v57  ;;  %1340 = vmatprep.subr.bf16.mxu1 %v1419_v8 }
 0x2ee   :  { %1308 = vmatpush1.bf16.msra.mxu0 %v1307_v63  ;;  %1342 = vmatpush1.bf16.msra.mxu1 %v1341_v0 }
 0x2ef   :  { %1310 = vmatprep.subr.bf16.mxu0 %v1309_v2  ;;  %1343 = vmatprep.subr.bf16.mxu1 %v1419_v8 }
 0x2f2   :  { %1312 = vmatpush1.bf16.msra.mxu0 %v1311_v9  ;;  %1345 = vmatpush1.bf16.msra.mxu1 %v1344_v10 }
 0x2f3   :  { %1314 = vmatprep.subr.bf16.mxu0 %v1313_v12  ;;  %1346 = vmatprep.subr.bf16.mxu1 %v1419_v8 }
 0x2f6   :  { %1316 = vmatpush1.bf16.msra.mxu0 %v1315_v20  ;;  %1348 = vmatpush1.bf16.msra.mxu1 %v1347_v21 }
 0x2f7   :  { %1318 = vmatprep.subr.bf16.mxu0 %v1317_v24  ;;  %1349 = vmatprep.subr.bf16.mxu1 %v1419_v8 }
 0x2fa   :  { %1320 = vmatpush1.bf16.msra.mxu0 %v1319_v30  ;;  %1351 = vmatpush1.bf16.msra.mxu1 %v1350_v31 }
 0x2fb   :  { %1322 = vmatprep.subr.bf16.mxu0 %v1321_v33  ;;  %1352 = vmatprep.subr.bf16.mxu1 %v1419_v8 }
 0x2fe   :  { %1324 = vmatpush1.bf16.msra.mxu0 %v1323_v38  ;;  %1354 = vmatpush1.bf16.msra.mxu1 %v1353_v39 }
 0x301   :  { %842 = vmatmul.mubr.f32.vlgmr.msra.gmra.mrb[4].mxu0 %v1939_v17  ;;  %913 = vmatmul.mubr.f32.vlgmr.msra.gmra.mrb[8].mxu1 %v1939_v17 }
 0x302   :  { %1406 = shalt.err (!%p1403_p4)
}
 0x303   :  { %s1407_s12 = scalar_lea.hbm %s2165_s10, 32 }
 0x304   :  { %p1408_p5 = scmp.ne.s32.totalorder %s2165_s10, %s1407_s12  ;;  %p1411_p6 = scmp.lt.u32.totalorder %s1407_s12, %s2165_s10 }
 0x306   :  { %p1413_p7 = pnand %p1411_p6, %p1408_p5 }
 0x308   :  { %1416 = shalt.err (!%p1413_p7)
}
 0x309   :  { %1040 = dma.vmem_to_hbm [thread:$0]  %s1038_s3, 32, %s2165_s10, [#allocation3]   ;;  %v606_v8 = vsub.s32 2, %v1518_v23  ;;  %v2127_v17 = vld [vmem:[%s2163_s8] sm:$0x7f]  ;;  %v610_v40 = vsub.s32 3, %v1518_v23 }
 0x30a   :  { %v599_v41 = vrot.slane %v2127_v17, %v355_v16  ;;  %v603_v43 = vrot.slane %v2127_v17, %v359_v50  ;;  %v614_v12 = vsub.s32 4, %v1518_v23  ;;  %v622_v13 = vsub.s32 6, %v1518_v23 }
 0x30b   :  { %v607_v42 = vrot.slane %v2127_v17, %v606_v8  ;;  %v611_v44 = vrot.slane %v2127_v17, %v610_v40  ;;  %v618_v18 = vsub.s32 5, %v1518_v23  ;;  %vm1024_vm15 = vcmask 1043458  }
 0x30c   :  { %v615_v26 = vrot.slane %v2127_v17, %v614_v12  ;;  %v623_v27 = vrot.slane %v2127_v17, %v622_v13  ;;  %vm1025_vm3 = vmor %vm1024_vm15, %vm271_vm2  ;;  %vm1026_vm4 = vcmask 128004  }
 0x30d   :  { %v619_v30 = vrot.slane %v2127_v17, %v618_v18  ;;  %vm1027_vm5 = vmor %vm1026_vm4, %vm1025_vm3 }
 0x3ac   :  { %v701_v45 = vpop.f32.mrb[2].mxu0  ;;  %v772_v46 = vpop.f32.mrb[6].mxu1 }
 0x3ad   :  { %v702_v47 = vadd.f32 %v701_v45, %v599_v41  ;;  %v773_v48 = vadd.f32 %v772_v46, %v607_v42  ;;  %v703_v49 = vpop.f32.mrb[3].mxu0  ;;  %v774_v51 = vpop.f32.mrb[7].mxu1 }
 0x3ae   :  { %v704_v52 = vadd.f32 %v703_v49, %v603_v43  ;;  %v775_v53 = vadd.f32 %v774_v51, %v611_v44 }
 0x3af   :  { %v918_v54 = vand.u32 2147483647, %v702_v47  ;;  %v920_v55 = vand.u32 2147483647, %v773_v48  ;;  %vm960_vm10 = vcmp.ge.f32.partialorder %v702_v47, 0.0  ;;  %vm962_vm11 = vcmp.ge.f32.partialorder %v773_v48, 0.0 }
 0x3b0   :  { %v919_v56 = vand.u32 2147483647, %v704_v52  ;;  %v921_v16 = vand.u32 2147483647, %v775_v53  ;;  %vm961_vm12 = vcmp.ge.f32.partialorder %v704_v52, 0.0  ;;  %vm963_vm13 = vcmp.ge.f32.partialorder %v775_v53, 0.0 }
 0x3b1   :  { %v925_v57 = vsub.f32 0.0, %v918_v54  ;;  %v927_v58 = vsub.f32 0.0, %v920_v55 }
 0x3b2   :  { %v926_v59 = vsub.f32 0.0, %v919_v56  ;;  %v928_v60 = vsub.f32 0.0, %v921_v16 }
 0x3b3   :  { %v932_v61 = vmul.f32 1.442695, %v925_v57  ;;  %v936_v50 = vmul.f32 1.442695, %v927_v58 }
 0x3b4   :  { %v934_v62 = vmul.f32 1.442695, %v926_v59  ;;  %v938_v63 = vmul.f32 1.442695, %v928_v60 }
 0x3b5   :  { %1367 = vpow2.f32 %v932_v61 }
 0x3b6   :  { %1369 = vpow2.f32 %v936_v50 }
 0x3b7   :  { %1371 = vpow2.f32 %v934_v62 }
 0x3b8   :  { %1373 = vpow2.f32 %v938_v63 }
 0x3bf   :  { %v1368_v0 = vpop.eup %1367 }
 0x3c0   :  { %v1370_v1 = vpop.eup %1369  ;;  %v946_v2 = vadd.f32 1.0, %v1368_v0 }
 0x3c1   :  { %v1372_v3 = vpop.eup %1371  ;;  %v948_v4 = vadd.f32 1.0, %v1370_v1 }
 0x3c2   :  { %v1374_v5 = vpop.eup %1373  ;;  %1375 = vrcp.f32 %v946_v2  ;;  %v947_v6 = vadd.f32 1.0, %v1372_v3 }
 0x3c3   :  { %1377 = vrcp.f32 %v948_v4  ;;  %v949_v7 = vadd.f32 1.0, %v1374_v5 }
 0x3c4   :  { %1379 = vrcp.f32 %v947_v6 }
 0x3c5   :  { %1381 = vrcp.f32 %v949_v7 }
 0x3cc   :  { %v1376_v9 = vpop.eup %1375 }
 0x3cd   :  { %v1378_v10 = vpop.eup %1377  ;;  %v967_v11 = vmul.f32 %v1376_v9, %v1368_v0 }
 0x3ce   :  { %v1380_v14 = vpop.eup %1379  ;;  %v969_v15 = vmul.f32 %v1378_v10, %v1370_v1 }
 0x3cf   :  { %v1382_v19 = vpop.eup %1381  ;;  %v974_v20 = vsel %vm960_vm10, %v1376_v9, %v967_v11  ;;  %v968_v21 = vmul.f32 %v1380_v14, %v1372_v3 }
 0x3d0   :  { %v976_v22 = vsel %vm962_vm11, %v1378_v10, %v969_v15  ;;  %v970_v24 = vmul.f32 %v1382_v19, %v1374_v5 }
 0x3d1   :  { %v975_v25 = vsel %vm961_vm12, %v1380_v14, %v968_v21 }
 0x3d2   :  { %v988_v28 = vcombine.low %v974_v20, %v975_v25  ;;  %v977_v29 = vsel %vm963_vm13, %v1382_v19, %v970_v24 }
 0x3d3   :  { %v989_v31 = vcombine.low %v976_v22, %v977_v29 }
 0x3d4   :  { %v996_v23 = vrot.slane %v988_v28, %v1542_v34  ;;  %v843_v32 = vpop.f32.mrb[4].mxu0  ;;  %v914_v33 = vpop.f32.mrb[8].mxu1 }
 0x3d5   :  { %v1003_v35 = vrot.slane %v989_v31, %v1542_v34  ;;  %v844_v36 = vadd.f32 %v843_v32, %v615_v26  ;;  %v915_v37 = vadd.f32 %v914_v33, %v623_v27  ;;  %v845_v38 = vpop.f32.mrb[5].mxu0  ;;  %v916_v39 = vpop.f32.mrb[9].mxu1 }
 0x3d6   :  { %v846_v8 = vadd.f32 %v845_v38, %v619_v30 }
 0x3d7   :  { %v1004_v40 = vcombine.low %v996_v23, %v1003_v35  ;;  %v922_v41 = vand.u32 2147483647, %v844_v36  ;;  %v924_v42 = vand.u32 2147483647, %v915_v37  ;;  %vm964_vm14 = vcmp.ge.f32.partialorder %v844_v36, 0.0 }
 0x3d8   :  { %v923_v43 = vand.u32 2147483647, %v846_v8  ;;  %vm966_vm0 = vcmp.ge.f32.partialorder %v915_v37, 0.0  ;;  %vm965_vm1 = vcmp.ge.f32.partialorder %v846_v8, 0.0 }
 0x3d9   :  { %1023 = vst [vmem:[%s2164_s9] sm:$0xff] %v1004_v40  ;;  %v929_v17 = vsub.f32 0.0, %v922_v41  ;;  %v931_v44 = vsub.f32 0.0, %v924_v42 }
 0x3da   :  { %v930_v45 = vsub.f32 0.0, %v923_v43 }
 0x3db   :  { %v940_v46 = vmul.f32 1.442695, %v929_v17  ;;  %v944_v47 = vmul.f32 1.442695, %v931_v44 }
 0x3dc   :  { %v942_v48 = vmul.f32 1.442695, %v930_v45 }
 0x3dd   :  { %1383 = vpow2.f32 %v940_v46 }
 0x3de   :  { %1385 = vpow2.f32 %v944_v47 }
 0x3df   :  { %1387 = vpow2.f32 %v942_v48 }
 0x3e7   :  { %v1384_v49 = vpop.eup %1383 }
 0x3e8   :  { %v1386_v51 = vpop.eup %1385  ;;  %v950_v52 = vadd.f32 1.0, %v1384_v49 }
 0x3e9   :  { %v1388_v53 = vpop.eup %1387  ;;  %v952_v54 = vadd.f32 1.0, %v1386_v51 }
 0x3ea   :  { %1389 = vrcp.f32 %v950_v52  ;;  %v951_v55 = vadd.f32 1.0, %v1388_v53 }
 0x3eb   :  { %1391 = vrcp.f32 %v952_v54 }
 0x3ec   :  { %1393 = vrcp.f32 %v951_v55 }
 0x3f4   :  { %v1390_v56 = vpop.eup %1389 }
 0x3f5   :  { %v1392_v16 = vpop.eup %1391  ;;  %v971_v57 = vmul.f32 %v1390_v56, %v1384_v49 }
 0x3f6   :  { %v1394_v58 = vpop.eup %1393  ;;  %v973_v59 = vmul.f32 %v1392_v16, %v1386_v51 }
 0x3f7   :  { %v978_v60 = vsel %vm964_vm14, %v1390_v56, %v971_v57  ;;  %v972_v61 = vmul.f32 %v1394_v58, %v1388_v53 }
 0x3f8   :  { %v980_v50 = vsel %vm966_vm0, %v1392_v16, %v973_v59 }
 0x3f9   :  { %v979_v62 = vsel %vm965_vm1, %v1394_v58, %v972_v61  ;;  %v1019_v0 = vrot.slane %v980_v50, %v1542_v34 }
 0x3fa   :  { %v1005_v63 = vcombine.low %v978_v60, %v979_v62 }
 0x3fc   :  { %v1012_v1 = vrot.slane %v1005_v63, %v1542_v34 }
 0x3fe   :  { %v1020_v2 = vcombine.low %v1012_v1, %v1019_v0 }
 0x400   :  { %1028 = vst.msk [vmem:[%s2164_s9 + $0x8] sm:$0x3f] %vm1027_vm5, %v1020_v2 }
 0x401   :  { %1417 = dma.done.wait [#allocation3], 32  }
 0x402   :  { %1418 = vsyncadd [#allocation3], 4294967264 }
 0x403   :  { %1046 = vsyncpa [#allocation3], 1 }

</bundles_post_ra>
